<compile_context>
chip_gen: v6e
topology: v6e:2x2x1
jax: 0.10.0
libtpu: 0.0.40
codegen_flags: <defaults>
</compile_context>

<pallas_src>
import functools
import math

import jax
import jax.numpy as jnp
from jax.experimental import pallas as pl
from jax.experimental.pallas import tpu as pltpu


# ---------------------------------------------------------------------------
# Helpers
# ---------------------------------------------------------------------------
def _round_up(x, m):
    return ((x + m - 1) // m) * m


def _choose_bt(n_img, rows_per_img, target_rows=1024):
    """Images per grid step: aim for ~target_rows matmul rows per tile, but
    keep >= 2 grid steps whenever the batch allows (v7x megacore sharding)."""
    cap = max(1, target_rows // rows_per_img)
    bt = max(1, min(cap, pl.cdiv(n_img, 2)))
    grid = pl.cdiv(n_img, bt)
    return bt, grid


# ---------------------------------------------------------------------------
# Pallas kernels
# ---------------------------------------------------------------------------
def _conv_relu_pool_kernel(x_ref, w_ref, b_ref, o_ref, *, kh):
    # x_ref: (R, 256)  R row-pairs of image rows; lanes [0,128) = even image
    #                  row, lanes [128,256) = odd image row, each packed as
    #                  (column * channels + channel) with zero-padded tail.
    # w_ref: (kh, 128, 256) resident banded conv weights; output lanes are
    #                  [pool-branch(2) x pooled column jp x output channel].
    # b_ref: (1, 128)  bias broadcast over (jp, oc) lanes (zeros on padding).
    # o_ref: (R, 128)  pooled + ReLU rows (image, pooled-row); the last `halo`
    #                  rows of the block are junk (zeroed here, never read).
    rows = o_ref.shape[0]
    halo = kh // 2
    r2 = rows - halo                      # rows actually computed per tile

    pooled = None
    for p in range(2):                    # vertical pool branch: i = 2*ip + p
        acc = None
        for di in range(kh):              # vertical conv tap
            u0 = (p + di) // 2            # starting row-pair
            half = (p + di) % 2           # parity half holding image row i+di
            lhs = x_ref[pl.ds(u0, r2), pl.ds(half * 128, 128)]
            d = jnp.dot(lhs, w_ref[di], preferred_element_type=jnp.float32)
            acc = d if acc is None else acc + d
        # horizontal pool: max over the two 128-lane output branches
        m = jnp.maximum(acc[:, :128], acc[:, 128:])
        pooled = m if pooled is None else jnp.maximum(pooled, m)

    # max over the 2x2 window commutes with (+bias) and ReLU (both monotone).
    res = jnp.maximum(pooled + b_ref[...], 0.0)
    o_ref[pl.ds(0, r2), :] = res.astype(o_ref.dtype)
    o_ref[pl.ds(r2, halo), :] = jnp.zeros((halo, 128), o_ref.dtype)


def _fc_fused_kernel(x_ref, w1_ref, b1_ref, w2_ref, b2_ref, w3_ref, b3_ref,
                     o_ref):
    # Fused fc1 -> ReLU -> fc2 -> ReLU -> fc3; all weights zero-padded to
    # lane-dense 128 columns so padded lanes stay exactly zero through ReLU.
    h = jnp.dot(x_ref[...], w1_ref[...], preferred_element_type=jnp.float32)
    h = jnp.maximum(h + b1_ref[...], 0.0)
    h = jnp.dot(h, w2_ref[...], preferred_element_type=jnp.float32)
    h = jnp.maximum(h + b2_ref[...], 0.0)
    h = jnp.dot(h, w3_ref[...], preferred_element_type=jnp.float32)
    o_ref[...] = (h + b3_ref[...]).astype(o_ref.dtype)


# ---------------------------------------------------------------------------
# Conv block wrapper (conv5x5 VALID + bias + ReLU + 2x2/2 max-pool, fused)
# ---------------------------------------------------------------------------
def conv_block_pallas(x_pairs, w_pack, b_row, *, n_img, pairs_per_img,
                      target_rows=1024):
    """x_pairs: (n_img*pairs_per_img, 256) paired activation rows.
    Returns (n_img*pairs_per_img, 128) pooled+ReLU rows (junk tail rows are
    zero / never consumed downstream)."""
    kh = w_pack.shape[0]
    bt, grid = _choose_bt(n_img, pairs_per_img, target_rows)
    n_pad = bt * grid
    if n_pad != n_img:
        x_pairs = jnp.pad(x_pairs,
                          ((0, (n_pad - n_img) * pairs_per_img), (0, 0)))
    rows_blk = bt * pairs_per_img

    out = pl.pallas_call(
        functools.partial(_conv_relu_pool_kernel, kh=kh),
        out_shape=jax.ShapeDtypeStruct((n_pad * pairs_per_img, 128),
                                       jnp.float32),
        grid=(grid,),
        in_specs=[
            pl.BlockSpec((rows_blk, 256), lambda i: (i, 0)),   # streamed rows
            pl.BlockSpec(w_pack.shape, lambda i: (0, 0, 0)),   # resident W
            pl.BlockSpec((1, 128), lambda i: (0, 0)),          # resident bias
        ],
        out_specs=pl.BlockSpec((rows_blk, 128), lambda i: (i, 0)),
        compiler_params=pltpu.CompilerParams(
            dimension_semantics=("parallel",),
            vmem_limit_bytes=32 * 1024 * 1024),
    )(x_pairs, w_pack, b_row)
    return out[: n_img * pairs_per_img]


# ---------------------------------------------------------------------------
# Fused fc1 + fc2 + fc3
# ---------------------------------------------------------------------------
def fc_fused_pallas(feat, w1, b1, w2, b2, w3, b3, *, tb_target=256):
    """feat: (B, 512) zero-padded features; returns (B, 128), cols 10.. = 0."""
    B, K = feat.shape
    tb = min(tb_target, _round_up(B, 8))
    bp = _round_up(B, tb)
    if bp != B:
        feat = jnp.pad(feat, ((0, bp - B), (0, 0)))

    out = pl.pallas_call(
        _fc_fused_kernel,
        out_shape=jax.ShapeDtypeStruct((bp, 128), jnp.float32),
        grid=(bp // tb,),
        in_specs=[
            pl.BlockSpec((tb, K), lambda i: (i, 0)),
            pl.BlockSpec(w1.shape, lambda i: (0, 0)),
            pl.BlockSpec(b1.shape, lambda i: (0, 0)),
            pl.BlockSpec(w2.shape, lambda i: (0, 0)),
            pl.BlockSpec(b2.shape, lambda i: (0, 0)),
            pl.BlockSpec(w3.shape, lambda i: (0, 0)),
            pl.BlockSpec(b3.shape, lambda i: (0, 0)),
        ],
        out_specs=pl.BlockSpec((tb, 128), lambda i: (i, 0)),
        compiler_params=pltpu.CompilerParams(
            dimension_semantics=("parallel",),
            vmem_limit_bytes=32 * 1024 * 1024),
    )(feat, w1, b1, w2, b2, w3, b3)
    return out[:B]


# ---------------------------------------------------------------------------
# Parameter packing (done once, outside the hot path)
# ---------------------------------------------------------------------------
def _pack_conv_weights(w_torch, *, c_lanes, oc_lanes, ow2):
    """Pack PyTorch (OC, IC, KH, KW) conv weights into a banded (KH, 128, 256)
    matrix.  Input lanes: j_in*c_lanes + c.  Output lanes:
    branch*128 + jp*oc_lanes + oc, branch = horizontal pool offset."""
    OC, IC, KH, KW = w_torch.shape
    di, dj, c, oc, jp, br = jnp.meshgrid(
        jnp.arange(KH), jnp.arange(KW), jnp.arange(IC), jnp.arange(OC),
        jnp.arange(ow2), jnp.arange(2), indexing="ij")
    lane_in = (2 * jp + br + dj) * c_lanes + c
    lane_out = br * 128 + jp * oc_lanes + oc
    vals = w_torch[oc, c, di, dj].astype(jnp.float32)
    packed = jnp.zeros((KH, 128, 256), jnp.float32)
    return packed.at[di, lane_in, lane_out].set(vals)


def _pack_conv_bias(b, *, oc_lanes, ow2):
    OC = b.shape[0]
    row = jnp.tile(jnp.pad(b, (0, oc_lanes - OC)), ow2)
    return jnp.pad(row, (0, 128 - ow2 * oc_lanes)).reshape(1, 128).astype(
        jnp.float32)


def prepare_params(params):
    prep = {}
    # conv1: 3 in ch (lane-packed x3), 6 out ch padded to 8 lanes, 14 pooled cols
    prep["c1_w"] = _pack_conv_weights(params["conv1_w"], c_lanes=3,
                                      oc_lanes=8, ow2=14)
    prep["c1_b"] = _pack_conv_bias(params["conv1_b"], oc_lanes=8, ow2=14)
    # conv2: 8 in ch lanes (6 real + 2 zero), 16 out ch, 5 pooled cols
    prep["c2_w"] = _pack_conv_weights(params["conv2_w"], c_lanes=8,
                                      oc_lanes=16, ow2=5)
    prep["c2_b"] = _pack_conv_bias(params["conv2_b"], oc_lanes=16, ow2=5)
    # fc1: PyTorch feature order is (c, h, w); ours is (h, w, c). Pad K to 512.
    w1 = jnp.transpose(params["fc1_w"].reshape(120, 16, 5, 5),
                       (2, 3, 1, 0)).reshape(400, 120)
    prep["fc1_w"] = jnp.pad(w1, ((0, 112), (0, 8)))          # (512, 128)
    prep["fc1_b"] = jnp.pad(params["fc1_b"], (0, 8)).reshape(1, 128)
    prep["fc2_w"] = jnp.pad(params["fc2_w"].T, ((0, 8), (0, 44)))    # (128,128)
    prep["fc2_b"] = jnp.pad(params["fc2_b"], (0, 44)).reshape(1, 128)
    prep["fc3_w"] = jnp.pad(params["fc3_w"].T, ((0, 44), (0, 118)))  # (128,128)
    prep["fc3_b"] = jnp.pad(params["fc3_b"], (0, 118)).reshape(1, 128)
    return prep


# ---------------------------------------------------------------------------
# Parameter init (deterministic, PyTorch-style uniform bounds)
# ---------------------------------------------------------------------------
def init_params(key):
    def uniform(k, shape, bound):
        return jax.random.uniform(k, shape, jnp.float32, -bound, bound)

    keys = jax.random.split(key, 10)
    p = {}
    b1 = 1.0 / math.sqrt(3 * 5 * 5)
    p["conv1_w"] = uniform(keys[0], (6, 3, 5, 5), b1)
    p["conv1_b"] = uniform(keys[1], (6,), b1)
    b2 = 1.0 / math.sqrt(6 * 5 * 5)
    p["conv2_w"] = uniform(keys[2], (16, 6, 5, 5), b2)
    p["conv2_b"] = uniform(keys[3], (16,), b2)
    b3 = 1.0 / math.sqrt(16 * 5 * 5)
    p["fc1_w"] = uniform(keys[4], (120, 400), b3)
    p["fc1_b"] = uniform(keys[5], (120,), b3)
    b4 = 1.0 / math.sqrt(120)
    p["fc2_w"] = uniform(keys[6], (84, 120), b4)
    p["fc2_b"] = uniform(keys[7], (84,), b4)
    b5 = 1.0 / math.sqrt(84)
    p["fc3_w"] = uniform(keys[8], (10, 84), b5)
    p["fc3_b"] = uniform(keys[9], (10,), b5)
    return p


# ---------------------------------------------------------------------------
# Forward pass (matches CNN_0.forward exactly)
# ---------------------------------------------------------------------------
def cnn_forward(prep, x_nchw):
    B = x_nchw.shape[0]
    # NCHW -> NHWC -> (image row, (col, channel)) -> pair even/odd rows along
    # lanes (96 -> pad 128 -> 2 x 128) so kernels only need contiguous,
    # 128-aligned slices.  One pass over ~1x the input bytes.
    x = jnp.transpose(x_nchw, (0, 2, 3, 1)).reshape(B * 32, 96)
    x = jnp.pad(x, ((0, 0), (0, 32))).reshape(B * 16, 256)

    h1 = conv_block_pallas(x, prep["c1_w"], prep["c1_b"],
                           n_img=B, pairs_per_img=16)        # (B*16, 128)
    # Re-pair conv1's pooled rows for conv2 (tiny copy: ~8 KiB / image).
    h1 = h1.reshape(B * 8, 256)
    h2 = conv_block_pallas(h1, prep["c2_w"], prep["c2_b"],
                           n_img=B, pairs_per_img=8)         # (B*8, 128)

    # Gather the 5x5x16 valid features per image, flatten (h, w, c), pad K->512.
    feat = h2.reshape(B, 8, 128)[:, :5, :80].reshape(B, 400)
    feat = jnp.pad(feat, ((0, 0), (0, 112)))                 # (B, 512)

    out = fc_fused_pallas(feat, prep["fc1_w"], prep["fc1_b"],
                          prep["fc2_w"], prep["fc2_b"],
                          prep["fc3_w"], prep["fc3_b"])      # (B, 128)
    return out[:, :10]


# ---------------------------------------------------------------------------
# Pure-JAX reference (for in-script numerical validation)
# ---------------------------------------------------------------------------
def cnn_reference(params, x):
    def conv(x, w, b):
        y = jax.lax.conv_general_dilated(
            x, w, (1, 1), "VALID",
            dimension_numbers=("NCHW", "OIHW", "NCHW"))
        return jax.nn.relu(y + b.reshape(1, -1, 1, 1))

    def pool(x):
        return jax.lax.reduce_window(x, -jnp.inf, jax.lax.max,
                                     (1, 1, 2, 2), (1, 1, 2, 2), "VALID")

    x = pool(conv(x, params["conv1_w"], params["conv1_b"]))
    x = pool(conv(x, params["conv2_w"], params["conv2_b"]))
    x = x.reshape(x.shape[0], -1)
    x = jax.nn.relu(x @ params["fc1_w"].T + params["fc1_b"])
    x = jax.nn.relu(x @ params["fc2_w"].T + params["fc2_b"])
    return x @ params["fc3_w"].T + params["fc3_b"]


if __name__ == "__main__":
    key = jax.random.PRNGKey(0)
    k_params, k_x = jax.random.split(key)
    params = init_params(k_params)
    # Forward math implies 32x32 spatial input (16*5*5 flatten). Small batch=2.
    x = jax.random.normal(k_x, (2, 3, 32, 32), jnp.float32)

    prep = prepare_params(params)                 # packed once, off hot path
    out = jax.block_until_ready(jax.jit(cnn_forward)(prep, x))
    assert out.shape == (2, 10) and out.dtype == jnp.float32

    ref = jax.block_until_ready(jax.jit(cnn_reference)(params, x))
    err = float(jnp.max(jnp.abs(out - ref)))
    assert err < 1e-3, f"max abs error vs reference: {err}"

    print("KERNEL_OK")
</pallas_src>

<mosaic_0001>
module attributes {stable_mosaic.version = 11 : i64} {
  func.func @_conv_relu_pool_kernel(%arg0: i32, %arg1: memref<16x256xf32, #tpu.memory_space<vmem>>, %arg2: memref<5x128x256xf32, #tpu.memory_space<vmem>>, %arg3: memref<1x128xf32, #tpu.memory_space<vmem>>, %arg4: memref<16x128xf32, #tpu.memory_space<vmem>>) attributes {dimension_semantics = [#tpu.dimension_semantics<parallel>], iteration_bounds = array<i64: 2>, scalar_prefetch = 0 : i64, scratch_operands = 0 : i64, tpu.core_type = #tpu.core_type<tc>, window_params = [{transform_indices = @transform_0, window_bounds = array<i64: 16, 256>}, {pipeline_mode = #tpu.pipeline_mode<synchronous>, transform_indices = @transform_1, window_bounds = array<i64: 5, 128, 256>}, {pipeline_mode = #tpu.pipeline_mode<synchronous>, transform_indices = @transform_2, window_bounds = array<i64: 1, 128>}, {transform_indices = @transform_3, window_bounds = array<i64: 16, 128>}]} {
    %c0 = arith.constant 0 : index
    %c0_0 = arith.constant 0 : index
    %0 = vector.load %arg1[%c0, %c0_0] : memref<16x256xf32, #tpu.memory_space<vmem>>, vector<14x128xf32>
    %c0_1 = arith.constant 0 : index
    %c0_2 = arith.constant 0 : index
    %c0_3 = arith.constant 0 : index
    %1 = vector.load %arg2[%c0_1, %c0_2, %c0_3] : memref<5x128x256xf32, #tpu.memory_space<vmem>>, vector<1x128x256xf32>
    %2 = vector.shape_cast %1 : vector<1x128x256xf32> to vector<128x256xf32>
    %cst = arith.constant dense<0.000000e+00> : vector<14x256xf32>
    %3 = tpu.matmul %0, %2, %cst {dimension_numbers = #tpu.dot_dimension_numbers<[1], [0], [0], [1], [0, 0, 1, 1], [], []>} : vector<14x128xf32>, vector<128x256xf32>, vector<14x256xf32> -> vector<14x256xf32>
    %c0_4 = arith.constant 0 : index
    %c128 = arith.constant 128 : index
    %4 = vector.load %arg1[%c0_4, %c128] : memref<16x256xf32, #tpu.memory_space<vmem>>, vector<14x128xf32>
    %c1 = arith.constant 1 : index
    %c0_5 = arith.constant 0 : index
    %c0_6 = arith.constant 0 : index
    %5 = vector.load %arg2[%c1, %c0_5, %c0_6] : memref<5x128x256xf32, #tpu.memory_space<vmem>>, vector<1x128x256xf32>
    %6 = vector.shape_cast %5 : vector<1x128x256xf32> to vector<128x256xf32>
    %cst_7 = arith.constant dense<0.000000e+00> : vector<14x256xf32>
    %7 = tpu.matmul %4, %6, %cst_7 {dimension_numbers = #tpu.dot_dimension_numbers<[1], [0], [0], [1], [0, 0, 1, 1], [], []>} : vector<14x128xf32>, vector<128x256xf32>, vector<14x256xf32> -> vector<14x256xf32>
    %8 = arith.addf %3, %7 : vector<14x256xf32>
    %c1_8 = arith.constant 1 : index
    %c0_9 = arith.constant 0 : index
    %9 = vector.load %arg1[%c1_8, %c0_9] : memref<16x256xf32, #tpu.memory_space<vmem>>, vector<14x128xf32>
    %c2 = arith.constant 2 : index
    %c0_10 = arith.constant 0 : index
    %c0_11 = arith.constant 0 : index
    %10 = vector.load %arg2[%c2, %c0_10, %c0_11] : memref<5x128x256xf32, #tpu.memory_space<vmem>>, vector<1x128x256xf32>
    %11 = vector.shape_cast %10 : vector<1x128x256xf32> to vector<128x256xf32>
    %cst_12 = arith.constant dense<0.000000e+00> : vector<14x256xf32>
    %12 = tpu.matmul %9, %11, %cst_12 {dimension_numbers = #tpu.dot_dimension_numbers<[1], [0], [0], [1], [0, 0, 1, 1], [], []>} : vector<14x128xf32>, vector<128x256xf32>, vector<14x256xf32> -> vector<14x256xf32>
    %13 = arith.addf %8, %12 : vector<14x256xf32>
    %c1_13 = arith.constant 1 : index
    %c128_14 = arith.constant 128 : index
    %14 = vector.load %arg1[%c1_13, %c128_14] : memref<16x256xf32, #tpu.memory_space<vmem>>, vector<14x128xf32>
    %c3 = arith.constant 3 : index
    %c0_15 = arith.constant 0 : index
    %c0_16 = arith.constant 0 : index
    %15 = vector.load %arg2[%c3, %c0_15, %c0_16] : memref<5x128x256xf32, #tpu.memory_space<vmem>>, vector<1x128x256xf32>
    %16 = vector.shape_cast %15 : vector<1x128x256xf32> to vector<128x256xf32>
    %cst_17 = arith.constant dense<0.000000e+00> : vector<14x256xf32>
    %17 = tpu.matmul %14, %16, %cst_17 {dimension_numbers = #tpu.dot_dimension_numbers<[1], [0], [0], [1], [0, 0, 1, 1], [], []>} : vector<14x128xf32>, vector<128x256xf32>, vector<14x256xf32> -> vector<14x256xf32>
    %18 = arith.addf %13, %17 : vector<14x256xf32>
    %c2_18 = arith.constant 2 : index
    %c0_19 = arith.constant 0 : index
    %19 = vector.load %arg1[%c2_18, %c0_19] : memref<16x256xf32, #tpu.memory_space<vmem>>, vector<14x128xf32>
    %c4 = arith.constant 4 : index
    %c0_20 = arith.constant 0 : index
    %c0_21 = arith.constant 0 : index
    %20 = vector.load %arg2[%c4, %c0_20, %c0_21] : memref<5x128x256xf32, #tpu.memory_space<vmem>>, vector<1x128x256xf32>
    %21 = vector.shape_cast %20 : vector<1x128x256xf32> to vector<128x256xf32>
    %cst_22 = arith.constant dense<0.000000e+00> : vector<14x256xf32>
    %22 = tpu.matmul %19, %21, %cst_22 {dimension_numbers = #tpu.dot_dimension_numbers<[1], [0], [0], [1], [0, 0, 1, 1], [], []>} : vector<14x128xf32>, vector<128x256xf32>, vector<14x256xf32> -> vector<14x256xf32>
    %23 = arith.addf %18, %22 : vector<14x256xf32>
    %24 = vector.extract_strided_slice %23 {offsets = [0, 0], sizes = [14, 128], strides = [1, 1]} : vector<14x256xf32> to vector<14x128xf32>
    %25 = vector.extract_strided_slice %23 {offsets = [0, 128], sizes = [14, 128], strides = [1, 1]} : vector<14x256xf32> to vector<14x128xf32>
    %26 = arith.maximumf %24, %25 : vector<14x128xf32>
    %c0_23 = arith.constant 0 : index
    %c128_24 = arith.constant 128 : index
    %27 = vector.load %arg1[%c0_23, %c128_24] : memref<16x256xf32, #tpu.memory_space<vmem>>, vector<14x128xf32>
    %c0_25 = arith.constant 0 : index
    %c0_26 = arith.constant 0 : index
    %c0_27 = arith.constant 0 : index
    %28 = vector.load %arg2[%c0_25, %c0_26, %c0_27] : memref<5x128x256xf32, #tpu.memory_space<vmem>>, vector<1x128x256xf32>
    %29 = vector.shape_cast %28 : vector<1x128x256xf32> to vector<128x256xf32>
    %cst_28 = arith.constant dense<0.000000e+00> : vector<14x256xf32>
    %30 = tpu.matmul %27, %29, %cst_28 {dimension_numbers = #tpu.dot_dimension_numbers<[1], [0], [0], [1], [0, 0, 1, 1], [], []>} : vector<14x128xf32>, vector<128x256xf32>, vector<14x256xf32> -> vector<14x256xf32>
    %c1_29 = arith.constant 1 : index
    %c0_30 = arith.constant 0 : index
    %31 = vector.load %arg1[%c1_29, %c0_30] : memref<16x256xf32, #tpu.memory_space<vmem>>, vector<14x128xf32>
    %c1_31 = arith.constant 1 : index
    %c0_32 = arith.constant 0 : index
    %c0_33 = arith.constant 0 : index
    %32 = vector.load %arg2[%c1_31, %c0_32, %c0_33] : memref<5x128x256xf32, #tpu.memory_space<vmem>>, vector<1x128x256xf32>
    %33 = vector.shape_cast %32 : vector<1x128x256xf32> to vector<128x256xf32>
    %cst_34 = arith.constant dense<0.000000e+00> : vector<14x256xf32>
    %34 = tpu.matmul %31, %33, %cst_34 {dimension_numbers = #tpu.dot_dimension_numbers<[1], [0], [0], [1], [0, 0, 1, 1], [], []>} : vector<14x128xf32>, vector<128x256xf32>, vector<14x256xf32> -> vector<14x256xf32>
    %35 = arith.addf %30, %34 : vector<14x256xf32>
    %c1_35 = arith.constant 1 : index
    %c128_36 = arith.constant 128 : index
    %36 = vector.load %arg1[%c1_35, %c128_36] : memref<16x256xf32, #tpu.memory_space<vmem>>, vector<14x128xf32>
    %c2_37 = arith.constant 2 : index
    %c0_38 = arith.constant 0 : index
    %c0_39 = arith.constant 0 : index
    %37 = vector.load %arg2[%c2_37, %c0_38, %c0_39] : memref<5x128x256xf32, #tpu.memory_space<vmem>>, vector<1x128x256xf32>
    %38 = vector.shape_cast %37 : vector<1x128x256xf32> to vector<128x256xf32>
    %cst_40 = arith.constant dense<0.000000e+00> : vector<14x256xf32>
    %39 = tpu.matmul %36, %38, %cst_40 {dimension_numbers = #tpu.dot_dimension_numbers<[1], [0], [0], [1], [0, 0, 1, 1], [], []>} : vector<14x128xf32>, vector<128x256xf32>, vector<14x256xf32> -> vector<14x256xf32>
    %40 = arith.addf %35, %39 : vector<14x256xf32>
    %c2_41 = arith.constant 2 : index
    %c0_42 = arith.constant 0 : index
    %41 = vector.load %arg1[%c2_41, %c0_42] : memref<16x256xf32, #tpu.memory_space<vmem>>, vector<14x128xf32>
    %c3_43 = arith.constant 3 : index
    %c0_44 = arith.constant 0 : index
    %c0_45 = arith.constant 0 : index
    %42 = vector.load %arg2[%c3_43, %c0_44, %c0_45] : memref<5x128x256xf32, #tpu.memory_space<vmem>>, vector<1x128x256xf32>
    %43 = vector.shape_cast %42 : vector<1x128x256xf32> to vector<128x256xf32>
    %cst_46 = arith.constant dense<0.000000e+00> : vector<14x256xf32>
    %44 = tpu.matmul %41, %43, %cst_46 {dimension_numbers = #tpu.dot_dimension_numbers<[1], [0], [0], [1], [0, 0, 1, 1], [], []>} : vector<14x128xf32>, vector<128x256xf32>, vector<14x256xf32> -> vector<14x256xf32>
    %45 = arith.addf %40, %44 : vector<14x256xf32>
    %c2_47 = arith.constant 2 : index
    %c128_48 = arith.constant 128 : index
    %46 = vector.load %arg1[%c2_47, %c128_48] : memref<16x256xf32, #tpu.memory_space<vmem>>, vector<14x128xf32>
    %c4_49 = arith.constant 4 : index
    %c0_50 = arith.constant 0 : index
    %c0_51 = arith.constant 0 : index
    %47 = vector.load %arg2[%c4_49, %c0_50, %c0_51] : memref<5x128x256xf32, #tpu.memory_space<vmem>>, vector<1x128x256xf32>
    %48 = vector.shape_cast %47 : vector<1x128x256xf32> to vector<128x256xf32>
    %cst_52 = arith.constant dense<0.000000e+00> : vector<14x256xf32>
    %49 = tpu.matmul %46, %48, %cst_52 {dimension_numbers = #tpu.dot_dimension_numbers<[1], [0], [0], [1], [0, 0, 1, 1], [], []>} : vector<14x128xf32>, vector<128x256xf32>, vector<14x256xf32> -> vector<14x256xf32>
    %50 = arith.addf %45, %49 : vector<14x256xf32>
    %51 = vector.extract_strided_slice %50 {offsets = [0, 0], sizes = [14, 128], strides = [1, 1]} : vector<14x256xf32> to vector<14x128xf32>
    %52 = vector.extract_strided_slice %50 {offsets = [0, 128], sizes = [14, 128], strides = [1, 1]} : vector<14x256xf32> to vector<14x128xf32>
    %53 = arith.maximumf %51, %52 : vector<14x128xf32>
    %54 = arith.maximumf %26, %53 : vector<14x128xf32>
    %c0_53 = arith.constant 0 : index
    %c0_54 = arith.constant 0 : index
    %55 = vector.load %arg3[%c0_53, %c0_54] : memref<1x128xf32, #tpu.memory_space<vmem>>, vector<1x128xf32>
    %56 = vector.broadcast %55 : vector<1x128xf32> to vector<14x128xf32>
    %57 = arith.addf %54, %56 : vector<14x128xf32>
    %cst_55 = arith.constant 0.000000e+00 : f32
    %58 = vector.broadcast %cst_55 : f32 to vector<14x128xf32>
    %59 = arith.maximumf %57, %58 : vector<14x128xf32>
    %c0_56 = arith.constant 0 : index
    %c0_57 = arith.constant 0 : index
    %60 = vector.load %arg4[%c0_56, %c0_57] : memref<16x128xf32, #tpu.memory_space<vmem>>, vector<14x128xf32>
    tpu.vector_store %arg4[%c0_56, %c0_57], %59 {strides = array<i32>} : memref<16x128xf32, #tpu.memory_space<vmem>>, vector<14x128xf32>,
    %cst_58 = arith.constant 0.000000e+00 : f32
    %61 = vector.broadcast %cst_58 : f32 to vector<2x128xf32>
    %c14 = arith.constant 14 : index
    %c0_59 = arith.constant 0 : index
    %62 = vector.load %arg4[%c14, %c0_59] : memref<16x128xf32, #tpu.memory_space<vmem>>, vector<2x128xf32>
    tpu.vector_store %arg4[%c14, %c0_59], %61 {strides = array<i32>} : memref<16x128xf32, #tpu.memory_space<vmem>>, vector<2x128xf32>,
    return
  }
  func.func @transform_0(%arg0: i32) -> (i32, i32) {
    %c0_i32 = arith.constant 0 : i32
    %c0_i32_0 = arith.constant 0 : i32
    return %arg0, %c0_i32 : i32, i32
  }
  func.func @transform_1(%arg0: i32) -> (i32, i32, i32) {
    %c0_i32 = arith.constant 0 : i32
    %c0_i32_0 = arith.constant 0 : i32
    %c0_i32_1 = arith.constant 0 : i32
    %c0_i32_2 = arith.constant 0 : i32
    return %c0_i32, %c0_i32_0, %c0_i32_1 : i32, i32, i32
  }
  func.func @transform_2(%arg0: i32) -> (i32, i32) {
    %c0_i32 = arith.constant 0 : i32
    %c0_i32_0 = arith.constant 0 : i32
    %c0_i32_1 = arith.constant 0 : i32
    return %c0_i32, %c0_i32_0 : i32, i32
  }
  func.func @transform_3(%arg0: i32) -> (i32, i32) {
    %c0_i32 = arith.constant 0 : i32
    %c0_i32_0 = arith.constant 0 : i32
    return %arg0, %c0_i32 : i32, i32
  }
}

module attributes {stable_mosaic.version = 11 : i64} {
  func.func @_conv_relu_pool_kernel(%arg0: i32, %arg1: memref<8x256xf32, #tpu.memory_space<vmem>>, %arg2: memref<5x128x256xf32, #tpu.memory_space<vmem>>, %arg3: memref<1x128xf32, #tpu.memory_space<vmem>>, %arg4: memref<8x128xf32, #tpu.memory_space<vmem>>) attributes {dimension_semantics = [#tpu.dimension_semantics<parallel>], iteration_bounds = array<i64: 2>, scalar_prefetch = 0 : i64, scratch_operands = 0 : i64, tpu.core_type = #tpu.core_type<tc>, window_params = [{transform_indices = @transform_0, window_bounds = array<i64: 8, 256>}, {pipeline_mode = #tpu.pipeline_mode<synchronous>, transform_indices = @transform_1, window_bounds = array<i64: 5, 128, 256>}, {pipeline_mode = #tpu.pipeline_mode<synchronous>, transform_indices = @transform_2, window_bounds = array<i64: 1, 128>}, {transform_indices = @transform_3, window_bounds = array<i64: 8, 128>}]} {
    %c0 = arith.constant 0 : index
    %c0_0 = arith.constant 0 : index
    %0 = vector.load %arg1[%c0, %c0_0] : memref<8x256xf32, #tpu.memory_space<vmem>>, vector<6x128xf32>
    %c0_1 = arith.constant 0 : index
    %c0_2 = arith.constant 0 : index
    %c0_3 = arith.constant 0 : index
    %1 = vector.load %arg2[%c0_1, %c0_2, %c0_3] : memref<5x128x256xf32, #tpu.memory_space<vmem>>, vector<1x128x256xf32>
    %2 = vector.shape_cast %1 : vector<1x128x256xf32> to vector<128x256xf32>
    %cst = arith.constant dense<0.000000e+00> : vector<6x256xf32>
    %3 = tpu.matmul %0, %2, %cst {dimension_numbers = #tpu.dot_dimension_numbers<[1], [0], [0], [1], [0, 0, 1, 1], [], []>} : vector<6x128xf32>, vector<128x256xf32>, vector<6x256xf32> -> vector<6x256xf32>
    %c0_4 = arith.constant 0 : index
    %c128 = arith.constant 128 : index
    %4 = vector.load %arg1[%c0_4, %c128] : memref<8x256xf32, #tpu.memory_space<vmem>>, vector<6x128xf32>
    %c1 = arith.constant 1 : index
    %c0_5 = arith.constant 0 : index
    %c0_6 = arith.constant 0 : index
    %5 = vector.load %arg2[%c1, %c0_5, %c0_6] : memref<5x128x256xf32, #tpu.memory_space<vmem>>, vector<1x128x256xf32>
    %6 = vector.shape_cast %5 : vector<1x128x256xf32> to vector<128x256xf32>
    %cst_7 = arith.constant dense<0.000000e+00> : vector<6x256xf32>
    %7 = tpu.matmul %4, %6, %cst_7 {dimension_numbers = #tpu.dot_dimension_numbers<[1], [0], [0], [1], [0, 0, 1, 1], [], []>} : vector<6x128xf32>, vector<128x256xf32>, vector<6x256xf32> -> vector<6x256xf32>
    %8 = arith.addf %3, %7 : vector<6x256xf32>
    %c1_8 = arith.constant 1 : index
    %c0_9 = arith.constant 0 : index
    %9 = vector.load %arg1[%c1_8, %c0_9] : memref<8x256xf32, #tpu.memory_space<vmem>>, vector<6x128xf32>
    %c2 = arith.constant 2 : index
    %c0_10 = arith.constant 0 : index
    %c0_11 = arith.constant 0 : index
    %10 = vector.load %arg2[%c2, %c0_10, %c0_11] : memref<5x128x256xf32, #tpu.memory_space<vmem>>, vector<1x128x256xf32>
    %11 = vector.shape_cast %10 : vector<1x128x256xf32> to vector<128x256xf32>
    %cst_12 = arith.constant dense<0.000000e+00> : vector<6x256xf32>
    %12 = tpu.matmul %9, %11, %cst_12 {dimension_numbers = #tpu.dot_dimension_numbers<[1], [0], [0], [1], [0, 0, 1, 1], [], []>} : vector<6x128xf32>, vector<128x256xf32>, vector<6x256xf32> -> vector<6x256xf32>
    %13 = arith.addf %8, %12 : vector<6x256xf32>
    %c1_13 = arith.constant 1 : index
    %c128_14 = arith.constant 128 : index
    %14 = vector.load %arg1[%c1_13, %c128_14] : memref<8x256xf32, #tpu.memory_space<vmem>>, vector<6x128xf32>
    %c3 = arith.constant 3 : index
    %c0_15 = arith.constant 0 : index
    %c0_16 = arith.constant 0 : index
    %15 = vector.load %arg2[%c3, %c0_15, %c0_16] : memref<5x128x256xf32, #tpu.memory_space<vmem>>, vector<1x128x256xf32>
    %16 = vector.shape_cast %15 : vector<1x128x256xf32> to vector<128x256xf32>
    %cst_17 = arith.constant dense<0.000000e+00> : vector<6x256xf32>
    %17 = tpu.matmul %14, %16, %cst_17 {dimension_numbers = #tpu.dot_dimension_numbers<[1], [0], [0], [1], [0, 0, 1, 1], [], []>} : vector<6x128xf32>, vector<128x256xf32>, vector<6x256xf32> -> vector<6x256xf32>
    %18 = arith.addf %13, %17 : vector<6x256xf32>
    %c2_18 = arith.constant 2 : index
    %c0_19 = arith.constant 0 : index
    %19 = vector.load %arg1[%c2_18, %c0_19] : memref<8x256xf32, #tpu.memory_space<vmem>>, vector<6x128xf32>
    %c4 = arith.constant 4 : index
    %c0_20 = arith.constant 0 : index
    %c0_21 = arith.constant 0 : index
    %20 = vector.load %arg2[%c4, %c0_20, %c0_21] : memref<5x128x256xf32, #tpu.memory_space<vmem>>, vector<1x128x256xf32>
    %21 = vector.shape_cast %20 : vector<1x128x256xf32> to vector<128x256xf32>
    %cst_22 = arith.constant dense<0.000000e+00> : vector<6x256xf32>
    %22 = tpu.matmul %19, %21, %cst_22 {dimension_numbers = #tpu.dot_dimension_numbers<[1], [0], [0], [1], [0, 0, 1, 1], [], []>} : vector<6x128xf32>, vector<128x256xf32>, vector<6x256xf32> -> vector<6x256xf32>
    %23 = arith.addf %18, %22 : vector<6x256xf32>
    %24 = vector.extract_strided_slice %23 {offsets = [0, 0], sizes = [6, 128], strides = [1, 1]} : vector<6x256xf32> to vector<6x128xf32>
    %25 = vector.extract_strided_slice %23 {offsets = [0, 128], sizes = [6, 128], strides = [1, 1]} : vector<6x256xf32> to vector<6x128xf32>
    %26 = arith.maximumf %24, %25 : vector<6x128xf32>
    %c0_23 = arith.constant 0 : index
    %c128_24 = arith.constant 128 : index
    %27 = vector.load %arg1[%c0_23, %c128_24] : memref<8x256xf32, #tpu.memory_space<vmem>>, vector<6x128xf32>
    %c0_25 = arith.constant 0 : index
    %c0_26 = arith.constant 0 : index
    %c0_27 = arith.constant 0 : index
    %28 = vector.load %arg2[%c0_25, %c0_26, %c0_27] : memref<5x128x256xf32, #tpu.memory_space<vmem>>, vector<1x128x256xf32>
    %29 = vector.shape_cast %28 : vector<1x128x256xf32> to vector<128x256xf32>
    %cst_28 = arith.constant dense<0.000000e+00> : vector<6x256xf32>
    %30 = tpu.matmul %27, %29, %cst_28 {dimension_numbers = #tpu.dot_dimension_numbers<[1], [0], [0], [1], [0, 0, 1, 1], [], []>} : vector<6x128xf32>, vector<128x256xf32>, vector<6x256xf32> -> vector<6x256xf32>
    %c1_29 = arith.constant 1 : index
    %c0_30 = arith.constant 0 : index
    %31 = vector.load %arg1[%c1_29, %c0_30] : memref<8x256xf32, #tpu.memory_space<vmem>>, vector<6x128xf32>
    %c1_31 = arith.constant 1 : index
    %c0_32 = arith.constant 0 : index
    %c0_33 = arith.constant 0 : index
    %32 = vector.load %arg2[%c1_31, %c0_32, %c0_33] : memref<5x128x256xf32, #tpu.memory_space<vmem>>, vector<1x128x256xf32>
    %33 = vector.shape_cast %32 : vector<1x128x256xf32> to vector<128x256xf32>
    %cst_34 = arith.constant dense<0.000000e+00> : vector<6x256xf32>
    %34 = tpu.matmul %31, %33, %cst_34 {dimension_numbers = #tpu.dot_dimension_numbers<[1], [0], [0], [1], [0, 0, 1, 1], [], []>} : vector<6x128xf32>, vector<128x256xf32>, vector<6x256xf32> -> vector<6x256xf32>
    %35 = arith.addf %30, %34 : vector<6x256xf32>
    %c1_35 = arith.constant 1 : index
    %c128_36 = arith.constant 128 : index
    %36 = vector.load %arg1[%c1_35, %c128_36] : memref<8x256xf32, #tpu.memory_space<vmem>>, vector<6x128xf32>
    %c2_37 = arith.constant 2 : index
    %c0_38 = arith.constant 0 : index
    %c0_39 = arith.constant 0 : index
    %37 = vector.load %arg2[%c2_37, %c0_38, %c0_39] : memref<5x128x256xf32, #tpu.memory_space<vmem>>, vector<1x128x256xf32>
    %38 = vector.shape_cast %37 : vector<1x128x256xf32> to vector<128x256xf32>
    %cst_40 = arith.constant dense<0.000000e+00> : vector<6x256xf32>
    %39 = tpu.matmul %36, %38, %cst_40 {dimension_numbers = #tpu.dot_dimension_numbers<[1], [0], [0], [1], [0, 0, 1, 1], [], []>} : vector<6x128xf32>, vector<128x256xf32>, vector<6x256xf32> -> vector<6x256xf32>
    %40 = arith.addf %35, %39 : vector<6x256xf32>
    %c2_41 = arith.constant 2 : index
    %c0_42 = arith.constant 0 : index
    %41 = vector.load %arg1[%c2_41, %c0_42] : memref<8x256xf32, #tpu.memory_space<vmem>>, vector<6x128xf32>
    %c3_43 = arith.constant 3 : index
    %c0_44 = arith.constant 0 : index
    %c0_45 = arith.constant 0 : index
    %42 = vector.load %arg2[%c3_43, %c0_44, %c0_45] : memref<5x128x256xf32, #tpu.memory_space<vmem>>, vector<1x128x256xf32>
    %43 = vector.shape_cast %42 : vector<1x128x256xf32> to vector<128x256xf32>
    %cst_46 = arith.constant dense<0.000000e+00> : vector<6x256xf32>
    %44 = tpu.matmul %41, %43, %cst_46 {dimension_numbers = #tpu.dot_dimension_numbers<[1], [0], [0], [1], [0, 0, 1, 1], [], []>} : vector<6x128xf32>, vector<128x256xf32>, vector<6x256xf32> -> vector<6x256xf32>
    %45 = arith.addf %40, %44 : vector<6x256xf32>
    %c2_47 = arith.constant 2 : index
    %c128_48 = arith.constant 128 : index
    %46 = vector.load %arg1[%c2_47, %c128_48] : memref<8x256xf32, #tpu.memory_space<vmem>>, vector<6x128xf32>
    %c4_49 = arith.constant 4 : index
    %c0_50 = arith.constant 0 : index
    %c0_51 = arith.constant 0 : index
    %47 = vector.load %arg2[%c4_49, %c0_50, %c0_51] : memref<5x128x256xf32, #tpu.memory_space<vmem>>, vector<1x128x256xf32>
    %48 = vector.shape_cast %47 : vector<1x128x256xf32> to vector<128x256xf32>
    %cst_52 = arith.constant dense<0.000000e+00> : vector<6x256xf32>
    %49 = tpu.matmul %46, %48, %cst_52 {dimension_numbers = #tpu.dot_dimension_numbers<[1], [0], [0], [1], [0, 0, 1, 1], [], []>} : vector<6x128xf32>, vector<128x256xf32>, vector<6x256xf32> -> vector<6x256xf32>
    %50 = arith.addf %45, %49 : vector<6x256xf32>
    %51 = vector.extract_strided_slice %50 {offsets = [0, 0], sizes = [6, 128], strides = [1, 1]} : vector<6x256xf32> to vector<6x128xf32>
    %52 = vector.extract_strided_slice %50 {offsets = [0, 128], sizes = [6, 128], strides = [1, 1]} : vector<6x256xf32> to vector<6x128xf32>
    %53 = arith.maximumf %51, %52 : vector<6x128xf32>
    %54 = arith.maximumf %26, %53 : vector<6x128xf32>
    %c0_53 = arith.constant 0 : index
    %c0_54 = arith.constant 0 : index
    %55 = vector.load %arg3[%c0_53, %c0_54] : memref<1x128xf32, #tpu.memory_space<vmem>>, vector<1x128xf32>
    %56 = vector.broadcast %55 : vector<1x128xf32> to vector<6x128xf32>
    %57 = arith.addf %54, %56 : vector<6x128xf32>
    %cst_55 = arith.constant 0.000000e+00 : f32
    %58 = vector.broadcast %cst_55 : f32 to vector<6x128xf32>
    %59 = arith.maximumf %57, %58 : vector<6x128xf32>
    %c0_56 = arith.constant 0 : index
    %c0_57 = arith.constant 0 : index
    %60 = vector.load %arg4[%c0_56, %c0_57] : memref<8x128xf32, #tpu.memory_space<vmem>>, vector<6x128xf32>
    tpu.vector_store %arg4[%c0_56, %c0_57], %59 {strides = array<i32>} : memref<8x128xf32, #tpu.memory_space<vmem>>, vector<6x128xf32>,
    %cst_58 = arith.constant 0.000000e+00 : f32
    %61 = vector.broadcast %cst_58 : f32 to vector<2x128xf32>
    %c6 = arith.constant 6 : index
    %c0_59 = arith.constant 0 : index
    %62 = vector.load %arg4[%c6, %c0_59] : memref<8x128xf32, #tpu.memory_space<vmem>>, vector<2x128xf32>
    tpu.vector_store %arg4[%c6, %c0_59], %61 {strides = array<i32>} : memref<8x128xf32, #tpu.memory_space<vmem>>, vector<2x128xf32>,
    return
  }
  func.func @transform_0(%arg0: i32) -> (i32, i32) {
    %c0_i32 = arith.constant 0 : i32
    %c0_i32_0 = arith.constant 0 : i32
    return %arg0, %c0_i32 : i32, i32
  }
  func.func @transform_1(%arg0: i32) -> (i32, i32, i32) {
    %c0_i32 = arith.constant 0 : i32
    %c0_i32_0 = arith.constant 0 : i32
    %c0_i32_1 = arith.constant 0 : i32
    %c0_i32_2 = arith.constant 0 : i32
    return %c0_i32, %c0_i32_0, %c0_i32_1 : i32, i32, i32
  }
  func.func @transform_2(%arg0: i32) -> (i32, i32) {
    %c0_i32 = arith.constant 0 : i32
    %c0_i32_0 = arith.constant 0 : i32
    %c0_i32_1 = arith.constant 0 : i32
    return %c0_i32, %c0_i32_0 : i32, i32
  }
  func.func @transform_3(%arg0: i32) -> (i32, i32) {
    %c0_i32 = arith.constant 0 : i32
    %c0_i32_0 = arith.constant 0 : i32
    return %arg0, %c0_i32 : i32, i32
  }
}

module attributes {stable_mosaic.version = 11 : i64} {
  func.func @_fc_fused_kernel(%arg0: i32, %arg1: memref<8x512xf32, #tpu.memory_space<vmem>>, %arg2: memref<512x128xf32, #tpu.memory_space<vmem>>, %arg3: memref<1x128xf32, #tpu.memory_space<vmem>>, %arg4: memref<128x128xf32, #tpu.memory_space<vmem>>, %arg5: memref<1x128xf32, #tpu.memory_space<vmem>>, %arg6: memref<128x128xf32, #tpu.memory_space<vmem>>, %arg7: memref<1x128xf32, #tpu.memory_space<vmem>>, %arg8: memref<8x128xf32, #tpu.memory_space<vmem>>) attributes {dimension_semantics = [#tpu.dimension_semantics<parallel>], iteration_bounds = array<i64: 1>, scalar_prefetch = 0 : i64, scratch_operands = 0 : i64, tpu.core_type = #tpu.core_type<tc>, window_params = [{transform_indices = @transform_0, window_bounds = array<i64: 8, 512>}, {pipeline_mode = #tpu.pipeline_mode<synchronous>, transform_indices = @transform_1, window_bounds = array<i64: 512, 128>}, {pipeline_mode = #tpu.pipeline_mode<synchronous>, transform_indices = @transform_2, window_bounds = array<i64: 1, 128>}, {pipeline_mode = #tpu.pipeline_mode<synchronous>, transform_indices = @transform_3, window_bounds = array<i64: 128, 128>}, {pipeline_mode = #tpu.pipeline_mode<synchronous>, transform_indices = @transform_4, window_bounds = array<i64: 1, 128>}, {pipeline_mode = #tpu.pipeline_mode<synchronous>, transform_indices = @transform_5, window_bounds = array<i64: 128, 128>}, {pipeline_mode = #tpu.pipeline_mode<synchronous>, transform_indices = @transform_6, window_bounds = array<i64: 1, 128>}, {transform_indices = @transform_7, window_bounds = array<i64: 8, 128>}]} {
    %c0 = arith.constant 0 : index
    %c0_0 = arith.constant 0 : index
    %0 = vector.load %arg1[%c0, %c0_0] : memref<8x512xf32, #tpu.memory_space<vmem>>, vector<8x512xf32>
    %c0_1 = arith.constant 0 : index
    %c0_2 = arith.constant 0 : index
    %1 = vector.load %arg2[%c0_1, %c0_2] : memref<512x128xf32, #tpu.memory_space<vmem>>, vector<512x128xf32>
    %cst = arith.constant dense<0.000000e+00> : vector<8x128xf32>
    %2 = tpu.matmul %0, %1, %cst {dimension_numbers = #tpu.dot_dimension_numbers<[1], [0], [0], [1], [0, 0, 1, 1], [], []>} : vector<8x512xf32>, vector<512x128xf32>, vector<8x128xf32> -> vector<8x128xf32>
    %c0_3 = arith.constant 0 : index
    %c0_4 = arith.constant 0 : index
    %3 = vector.load %arg3[%c0_3, %c0_4] : memref<1x128xf32, #tpu.memory_space<vmem>>, vector<1x128xf32>
    %4 = vector.broadcast %3 : vector<1x128xf32> to vector<8x128xf32>
    %5 = arith.addf %2, %4 : vector<8x128xf32>
    %cst_5 = arith.constant 0.000000e+00 : f32
    %6 = vector.broadcast %cst_5 : f32 to vector<8x128xf32>
    %7 = arith.maximumf %5, %6 : vector<8x128xf32>
    %c0_6 = arith.constant 0 : index
    %c0_7 = arith.constant 0 : index
    %8 = vector.load %arg4[%c0_6, %c0_7] : memref<128x128xf32, #tpu.memory_space<vmem>>, vector<128x128xf32>
    %cst_8 = arith.constant dense<0.000000e+00> : vector<8x128xf32>
    %9 = tpu.matmul %7, %8, %cst_8 {dimension_numbers = #tpu.dot_dimension_numbers<[1], [0], [0], [1], [0, 0, 1, 1], [], []>} : vector<8x128xf32>, vector<128x128xf32>, vector<8x128xf32> -> vector<8x128xf32>
    %c0_9 = arith.constant 0 : index
    %c0_10 = arith.constant 0 : index
    %10 = vector.load %arg5[%c0_9, %c0_10] : memref<1x128xf32, #tpu.memory_space<vmem>>, vector<1x128xf32>
    %11 = vector.broadcast %10 : vector<1x128xf32> to vector<8x128xf32>
    %12 = arith.addf %9, %11 : vector<8x128xf32>
    %cst_11 = arith.constant 0.000000e+00 : f32
    %13 = vector.broadcast %cst_11 : f32 to vector<8x128xf32>
    %14 = arith.maximumf %12, %13 : vector<8x128xf32>
    %c0_12 = arith.constant 0 : index
    %c0_13 = arith.constant 0 : index
    %15 = vector.load %arg6[%c0_12, %c0_13] : memref<128x128xf32, #tpu.memory_space<vmem>>, vector<128x128xf32>
    %cst_14 = arith.constant dense<0.000000e+00> : vector<8x128xf32>
    %16 = tpu.matmul %14, %15, %cst_14 {dimension_numbers = #tpu.dot_dimension_numbers<[1], [0], [0], [1], [0, 0, 1, 1], [], []>} : vector<8x128xf32>, vector<128x128xf32>, vector<8x128xf32> -> vector<8x128xf32>
    %c0_15 = arith.constant 0 : index
    %c0_16 = arith.constant 0 : index
    %17 = vector.load %arg7[%c0_15, %c0_16] : memref<1x128xf32, #tpu.memory_space<vmem>>, vector<1x128xf32>
    %18 = vector.broadcast %17 : vector<1x128xf32> to vector<8x128xf32>
    %19 = arith.addf %16, %18 : vector<8x128xf32>
    %c0_17 = arith.constant 0 : index
    %c0_18 = arith.constant 0 : index
    %20 = vector.load %arg8[%c0_17, %c0_18] : memref<8x128xf32, #tpu.memory_space<vmem>>, vector<8x128xf32>
    tpu.vector_store %arg8[%c0_17, %c0_18], %19 {strides = array<i32>} : memref<8x128xf32, #tpu.memory_space<vmem>>, vector<8x128xf32>,
    return
  }
  func.func @transform_0(%arg0: i32) -> (i32, i32) {
    %c0_i32 = arith.constant 0 : i32
    %c0_i32_0 = arith.constant 0 : i32
    return %arg0, %c0_i32 : i32, i32
  }
  func.func @transform_1(%arg0: i32) -> (i32, i32) {
    %c0_i32 = arith.constant 0 : i32
    %c0_i32_0 = arith.constant 0 : i32
    %c0_i32_1 = arith.constant 0 : i32
    return %c0_i32, %c0_i32_0 : i32, i32
  }
  func.func @transform_2(%arg0: i32) -> (i32, i32) {
    %c0_i32 = arith.constant 0 : i32
    %c0_i32_0 = arith.constant 0 : i32
    %c0_i32_1 = arith.constant 0 : i32
    return %c0_i32, %c0_i32_0 : i32, i32
  }
  func.func @transform_3(%arg0: i32) -> (i32, i32) {
    %c0_i32 = arith.constant 0 : i32
    %c0_i32_0 = arith.constant 0 : i32
    %c0_i32_1 = arith.constant 0 : i32
    return %c0_i32, %c0_i32_0 : i32, i32
  }
  func.func @transform_4(%arg0: i32) -> (i32, i32) {
    %c0_i32 = arith.constant 0 : i32
    %c0_i32_0 = arith.constant 0 : i32
    %c0_i32_1 = arith.constant 0 : i32
    return %c0_i32, %c0_i32_0 : i32, i32
  }
  func.func @transform_5(%arg0: i32) -> (i32, i32) {
    %c0_i32 = arith.constant 0 : i32
    %c0_i32_0 = arith.constant 0 : i32
    %c0_i32_1 = arith.constant 0 : i32
    return %c0_i32, %c0_i32_0 : i32, i32
  }
  func.func @transform_6(%arg0: i32) -> (i32, i32) {
    %c0_i32 = arith.constant 0 : i32
    %c0_i32_0 = arith.constant 0 : i32
    %c0_i32_1 = arith.constant 0 : i32
    return %c0_i32, %c0_i32_0 : i32, i32
  }
  func.func @transform_7(%arg0: i32) -> (i32, i32) {
    %c0_i32 = arith.constant 0 : i32
    %c0_i32_0 = arith.constant 0 : i32
    return %arg0, %c0_i32 : i32, i32
  }
}

</mosaic_0001>

<bundles_post_ra>
// kernel: cnn_forward.5
= control target key start
LH: loop header
LB: loop body
LE: loop exit
PB: predicated region body
PF: predicated region fallthrough
CT: control target
= control target key end

     0   :  { %vm614_vm0 = vmmov 0   ;;  %s1001_s1 = inlined_call_operand.vmem [shape: f32[512,128], index: 1, kind: input, shape index: {}]   ;;  %s1002_s0 = inlined_call_operand.vmem [shape: f32[8,512], index: 0, kind: input, shape index: {}]   ;;  %s1003_s3 = inlined_call_operand.vmem [shape: f32[128,128], index: 3, kind: input, shape index: {}]   ;;  %s1004_s5 = inlined_call_operand.vmem [shape: f32[128,128], index: 5, kind: input, shape index: {}]   ;;  %s1005_s2 = inlined_call_operand.vmem [shape: f32[1,128], index: 2, kind: input, shape index: {}]   ;;  %s1006_s4 = inlined_call_operand.vmem [shape: f32[1,128], index: 4, kind: input, shape index: {}]   ;;  %s1007_s6 = inlined_call_operand.vmem [shape: f32[1,128], index: 6, kind: input, shape index: {}]   ;;  %s1008_s7 = inlined_call_operand.vmem [shape: f32[8,128], index: 7, kind: output, shape index: {}]  }
   0x1   :  { %v61_v0 = vld [vmem:[%s1001_s1 + $0xf8] sm:$0xff]  ;;  %v60_v4 = vld [vmem:[%s1001_s1 + $0xf0] sm:$0xff]  ;;  %v59_v8 = vld [vmem:[%s1001_s1 + $0xe8] sm:$0xff] }
   0x2   :  { %v93_v1 = vld [vmem:[%s1001_s1 + $0x1f8] sm:$0xff]  ;;  %437 = vmatprep.subr.mxu0 %v61_v0  ;;  %v92_v5 = vld [vmem:[%s1001_s1 + $0x1f0] sm:$0xff]  ;;  %v91_v9 = vld [vmem:[%s1001_s1 + $0x1e8] sm:$0xff] }
   0x3   :  { %v45_v2 = vld [vmem:[%s1001_s1 + $0x78] sm:$0xff]  ;;  %472 = vmatprep.subr.mxu1 %v93_v1  ;;  %v44_v6 = vld [vmem:[%s1001_s1 + $0x70] sm:$0xff]  ;;  %v43_v10 = vld [vmem:[%s1001_s1 + $0x68] sm:$0xff] }
   0x4   :  { %v77_v3 = vld [vmem:[%s1001_s1 + $0x178] sm:$0xff]  ;;  %438 = vmatpush3.msra.mxu0 %v45_v2  ;;  %v76_v7 = vld [vmem:[%s1001_s1 + $0x170] sm:$0xff]  ;;  %v75_v11 = vld [vmem:[%s1001_s1 + $0x168] sm:$0xff] }
   0x5   :  { %473 = vmatpush3.msra.mxu1 %v77_v3  ;;  %439 = vmatprep.subr.mxu0 %v60_v4  ;;  %v58_v12 = vld [vmem:[%s1001_s1 + $0xe0] sm:$0xff]  ;;  %v57_v16 = vld [vmem:[%s1001_s1 + $0xd8] sm:$0xff]  ;;  %v56_v20 = vld [vmem:[%s1001_s1 + $0xd0] sm:$0xff] }
   0x6   :  { %474 = vmatprep.subr.mxu1 %v92_v5  ;;  %440 = vmatpush3.msra.mxu0 %v44_v6  ;;  %v90_v13 = vld [vmem:[%s1001_s1 + $0x1e0] sm:$0xff]  ;;  %v89_v17 = vld [vmem:[%s1001_s1 + $0x1d8] sm:$0xff]  ;;  %v88_v21 = vld [vmem:[%s1001_s1 + $0x1d0] sm:$0xff]  ;;  %v613_v5 = vmov 0.0  }
   0x7   :  { %475 = vmatpush3.msra.mxu1 %v76_v7  ;;  %441 = vmatprep.subr.mxu0 %v59_v8  ;;  %v42_v14 = vld [vmem:[%s1001_s1 + $0x60] sm:$0xff]  ;;  %v41_v18 = vld [vmem:[%s1001_s1 + $0x58] sm:$0xff]  ;;  %v40_v22 = vld [vmem:[%s1001_s1 + $0x50] sm:$0xff] }
   0x8   :  { %476 = vmatprep.subr.mxu1 %v91_v9  ;;  %v74_v15 = vld [vmem:[%s1001_s1 + $0x160] sm:$0xff]  ;;  %442 = vmatpush3.msra.mxu0 %v43_v10  ;;  %v73_v19 = vld [vmem:[%s1001_s1 + $0x158] sm:$0xff]  ;;  %v72_v23 = vld [vmem:[%s1001_s1 + $0x150] sm:$0xff] }
   0x9   :  { %477 = vmatpush3.msra.mxu1 %v75_v11  ;;  %443 = vmatprep.subr.mxu0 %v58_v12  ;;  %v55_v24 = vld [vmem:[%s1001_s1 + $0xc8] sm:$0xff]  ;;  %v54_v28 = vld [vmem:[%s1001_s1 + $0xc0] sm:$0xff]  ;;  %v53_v32 = vld [vmem:[%s1001_s1 + $0xb8] sm:$0xff] }
   0xa   :  { %478 = vmatprep.subr.mxu1 %v90_v13  ;;  %444 = vmatpush3.msra.mxu0 %v42_v14  ;;  %v87_v25 = vld [vmem:[%s1001_s1 + $0x1c8] sm:$0xff]  ;;  %v86_v29 = vld [vmem:[%s1001_s1 + $0x1c0] sm:$0xff]  ;;  %v85_v33 = vld [vmem:[%s1001_s1 + $0x1b8] sm:$0xff] }
   0xb   :  { %479 = vmatpush3.msra.mxu1 %v74_v15  ;;  %445 = vmatprep.subr.mxu0 %v57_v16  ;;  %v39_v26 = vld [vmem:[%s1001_s1 + $0x48] sm:$0xff]  ;;  %v38_v30 = vld [vmem:[%s1001_s1 + $0x40] sm:$0xff]  ;;  %v37_v34 = vld [vmem:[%s1001_s1 + $0x38] sm:$0xff] }
   0xc   :  { %480 = vmatprep.subr.mxu1 %v89_v17  ;;  %446 = vmatpush3.msra.mxu0 %v41_v18  ;;  %v71_v27 = vld [vmem:[%s1001_s1 + $0x148] sm:$0xff]  ;;  %v70_v31 = vld [vmem:[%s1001_s1 + $0x140] sm:$0xff]  ;;  %v69_v35 = vld [vmem:[%s1001_s1 + $0x138] sm:$0xff] }
   0xd   :  { %481 = vmatpush3.msra.mxu1 %v73_v19  ;;  %447 = vmatprep.subr.mxu0 %v56_v20  ;;  %v52_v36 = vld [vmem:[%s1001_s1 + $0xb0] sm:$0xff]  ;;  %v51_v40 = vld [vmem:[%s1001_s1 + $0xa8] sm:$0xff]  ;;  %v50_v44 = vld [vmem:[%s1001_s1 + $0xa0] sm:$0xff] }
   0xe   :  { %482 = vmatprep.subr.mxu1 %v88_v21  ;;  %448 = vmatpush3.msra.mxu0 %v40_v22  ;;  %v84_v37 = vld [vmem:[%s1001_s1 + $0x1b0] sm:$0xff]  ;;  %v83_v41 = vld [vmem:[%s1001_s1 + $0x1a8] sm:$0xff]  ;;  %v82_v45 = vld [vmem:[%s1001_s1 + $0x1a0] sm:$0xff] }
   0xf   :  { %483 = vmatpush3.msra.mxu1 %v72_v23  ;;  %449 = vmatprep.subr.mxu0 %v55_v24  ;;  %v36_v38 = vld [vmem:[%s1001_s1 + $0x30] sm:$0xff]  ;;  %v35_v42 = vld [vmem:[%s1001_s1 + $0x28] sm:$0xff]  ;;  %v34_v46 = vld [vmem:[%s1001_s1 + $0x20] sm:$0xff] }
  0x10   :  { %484 = vmatprep.subr.mxu1 %v87_v25  ;;  %450 = vmatpush3.msra.mxu0 %v39_v26  ;;  %v68_v39 = vld [vmem:[%s1001_s1 + $0x130] sm:$0xff]  ;;  %v67_v43 = vld [vmem:[%s1001_s1 + $0x128] sm:$0xff]  ;;  %v66_v47 = vld [vmem:[%s1001_s1 + $0x120] sm:$0xff] }
  0x11   :  { %485 = vmatpush3.msra.mxu1 %v71_v27  ;;  %451 = vmatprep.subr.mxu0 %v54_v28  ;;  %v49_v48 = vld [vmem:[%s1001_s1 + $0x98] sm:$0xff]  ;;  %v48_v52 = vld [vmem:[%s1001_s1 + $0x90] sm:$0xff]  ;;  %v47_v56 = vld [vmem:[%s1001_s1 + $0x88] sm:$0xff] }
  0x12   :  { %486 = vmatprep.subr.mxu1 %v86_v29  ;;  %452 = vmatpush3.msra.mxu0 %v38_v30  ;;  %v81_v49 = vld [vmem:[%s1001_s1 + $0x198] sm:$0xff]  ;;  %v80_v53 = vld [vmem:[%s1001_s1 + $0x190] sm:$0xff]  ;;  %v79_v57 = vld [vmem:[%s1001_s1 + $0x188] sm:$0xff] }
  0x13   :  { %487 = vmatpush3.msra.mxu1 %v70_v31  ;;  %453 = vmatprep.subr.mxu0 %v53_v32  ;;  %v33_v50 = vld [vmem:[%s1001_s1 + $0x18] sm:$0xff]  ;;  %v32_v54 = vld [vmem:[%s1001_s1 + $0x10] sm:$0xff]  ;;  %v31_v58 = vld [vmem:[%s1001_s1 + $0x8] sm:$0xff] }
  0x14   :  { %488 = vmatprep.subr.mxu1 %v85_v33  ;;  %454 = vmatpush3.msra.mxu0 %v37_v34  ;;  %v65_v51 = vld [vmem:[%s1001_s1 + $0x118] sm:$0xff]  ;;  %v64_v55 = vld [vmem:[%s1001_s1 + $0x110] sm:$0xff]  ;;  %v63_v59 = vld [vmem:[%s1001_s1 + $0x108] sm:$0xff] }
  0x15   :  { %489 = vmatpush3.msra.mxu1 %v69_v35  ;;  %455 = vmatprep.subr.mxu0 %v52_v36  ;;  %v46_v60 = vld [vmem:[%s1001_s1 + $0x80] sm:$0xff]  ;;  %v27_v63 = vld [vmem:[%s1002_s0 + $0x8] sm:$0xff]  ;;  %v29_v1 = vld [vmem:[%s1002_s0 + $0x18] sm:$0xff] }
  0x16   :  { %490 = vmatprep.subr.mxu1 %v84_v37  ;;  %456 = vmatpush3.msra.mxu0 %v36_v38  ;;  %v78_v61 = vld [vmem:[%s1001_s1 + $0x180] sm:$0xff]  ;;  %v28_v3 = vld [vmem:[%s1002_s0 + $0x10] sm:$0xff]  ;;  %v257_v4 = vld [vmem:[%s1003_s3 + $0x78] sm:$0xff] }
  0x17   :  { %491 = vmatpush3.msra.mxu1 %v68_v39  ;;  %457 = vmatprep.subr.mxu0 %v51_v40  ;;  %v30_v62 = vld [vmem:[%s1001_s1] sm:$0xff]  ;;  %v256_v6 = vld [vmem:[%s1003_s3 + $0x70] sm:$0xff]  ;;  %v255_v7 = vld [vmem:[%s1003_s3 + $0x68] sm:$0xff] }
  0x18   :  { %492 = vmatprep.subr.mxu1 %v83_v41  ;;  %458 = vmatpush3.msra.mxu0 %v35_v42  ;;  %v62_v0 = vld [vmem:[%s1001_s1 + $0x100] sm:$0xff]  ;;  %v253_v9 = vld [vmem:[%s1003_s3 + $0x58] sm:$0xff]  ;;  %v252_v10 = vld [vmem:[%s1003_s3 + $0x50] sm:$0xff] }
  0x19   :  { %493 = vmatpush3.msra.mxu1 %v67_v43  ;;  %459 = vmatprep.subr.mxu0 %v50_v44  ;;  %v26_v2 = vld [vmem:[%s1002_s0] sm:$0xff]  ;;  %v251_v11 = vld [vmem:[%s1003_s3 + $0x48] sm:$0xff]  ;;  %v249_v13 = vld [vmem:[%s1003_s3 + $0x38] sm:$0xff] }
  0x1a   :  { %494 = vmatprep.subr.mxu1 %v82_v45  ;;  %460 = vmatpush3.msra.mxu0 %v34_v46  ;;  %v254_v8 = vld [vmem:[%s1003_s3 + $0x60] sm:$0xff]  ;;  %v248_v14 = vld [vmem:[%s1003_s3 + $0x30] sm:$0xff]  ;;  %v247_v15 = vld [vmem:[%s1003_s3 + $0x28] sm:$0xff] }
  0x1b   :  { %495 = vmatpush3.msra.mxu1 %v66_v47  ;;  %461 = vmatprep.subr.mxu0 %v49_v48  ;;  %v250_v12 = vld [vmem:[%s1003_s3 + $0x40] sm:$0xff]  ;;  %v245_v17 = vld [vmem:[%s1003_s3 + $0x18] sm:$0xff]  ;;  %v244_v18 = vld [vmem:[%s1003_s3 + $0x10] sm:$0xff] }
  0x1c   :  { %496 = vmatprep.subr.mxu1 %v81_v49  ;;  %462 = vmatpush3.msra.mxu0 %v33_v50  ;;  %v246_v16 = vld [vmem:[%s1003_s3 + $0x20] sm:$0xff]  ;;  %v243_v19 = vld [vmem:[%s1003_s3 + $0x8] sm:$0xff]  ;;  %v351_v21 = vld [vmem:[%s1004_s5 + $0x78] sm:$0xff] }
  0x1d   :  { %497 = vmatpush3.msra.mxu1 %v65_v51  ;;  %463 = vmatprep.subr.mxu0 %v48_v52  ;;  %v242_v20 = vld [vmem:[%s1003_s3] sm:$0xff]  ;;  %v350_v22 = vld [vmem:[%s1004_s5 + $0x70] sm:$0xff]  ;;  %v349_v23 = vld [vmem:[%s1004_s5 + $0x68] sm:$0xff] }
  0x1e   :  { %498 = vmatprep.subr.mxu1 %v80_v53  ;;  %464 = vmatpush3.msra.mxu0 %v32_v54  ;;  %v348_v24 = vld [vmem:[%s1004_s5 + $0x60] sm:$0xff]  ;;  %v347_v25 = vld [vmem:[%s1004_s5 + $0x58] sm:$0xff]  ;;  %v346_v26 = vld [vmem:[%s1004_s5 + $0x50] sm:$0xff] }
  0x1f   :  { %499 = vmatpush3.msra.mxu1 %v64_v55  ;;  %465 = vmatprep.subr.mxu0 %v47_v56  ;;  %v345_v27 = vld [vmem:[%s1004_s5 + $0x48] sm:$0xff]  ;;  %v344_v28 = vld [vmem:[%s1004_s5 + $0x40] sm:$0xff]  ;;  %v343_v29 = vld [vmem:[%s1004_s5 + $0x38] sm:$0xff] }
  0x20   :  { %500 = vmatprep.subr.mxu1 %v79_v57  ;;  %466 = vmatpush3.msra.mxu0 %v31_v58  ;;  %v342_v30 = vld [vmem:[%s1004_s5 + $0x30] sm:$0xff]  ;;  %v341_v31 = vld [vmem:[%s1004_s5 + $0x28] sm:$0xff]  ;;  %v340_v32 = vld [vmem:[%s1004_s5 + $0x20] sm:$0xff] }
  0x21   :  { %501 = vmatpush3.msra.mxu1 %v63_v59  ;;  %467 = vmatprep.subr.mxu0 %v46_v60  ;;  %v339_v33 = vld [vmem:[%s1004_s5 + $0x18] sm:$0xff]  ;;  %v434_v36 = vld [vmem:[%s1005_s2] ss:$0 sm:$0xff]  ;;  %v338_v44 = vld [vmem:[%s1004_s5 + $0x10] sm:$0xff] }
  0x22   :  { %502 = vmatprep.subr.mxu1 %v78_v61  ;;  %468 = vmatpush3.msra.mxu0 %v30_v62  ;;  %v337_v45 = vld [vmem:[%s1004_s5 + $0x8] sm:$0xff]  ;;  %v336_v46 = vld [vmem:[%s1004_s5] sm:$0xff] }
  0x23   :  { %165 = vmatprep.mubr.f32.mxu0 %v27_v63  ;;  %503 = vmatpush3.msra.mxu1 %v62_v0  ;;  %v435_v47 = vld [vmem:[%s1006_s4] ss:$0 sm:$0xff] }
  0x24   :  { %235 = vmatprep.mubr.f32.mxu1 %v29_v1  ;;  %166 = vmatmul.mubr.f32.vlgmr.msra.gmra.mxu0 %v26_v2  ;;  %v436_v52 = vld [vmem:[%s1007_s6] ss:$0 sm:$0xff] }
  0x25   :  { %236 = vmatmul.mubr.f32.vlgmr.msra.gmra.mxu1 %v28_v3  ;;  %541 = vmatprep.subr.mxu0 %v613_v5 }
  0x26   :  { %576 = vmatprep.subr.mxu1 %v613_v5  ;;  %542 = vmatpush3.msra.mxu0 %v257_v4 }
  0x27   :  { %543 = vmatprep.subr.mxu0 %v613_v5  ;;  %573 = vmatprep.mubr.msk.f32.mxu0 %vm614_vm0, %v613_v5 }
  0x28   :  { %544 = vmatpush3.msra.mxu0 %v256_v6  ;;  %608 = vmatprep.mubr.msk.f32.mxu1 %vm614_vm0, %v613_v5 }
  0x29   :  { %545 = vmatprep.subr.mxu0 %v613_v5  ;;  %577 = vmatpush3.msra.mxu1 %v351_v21 }
  0x2a   :  { %546 = vmatpush3.msra.mxu0 %v255_v7  ;;  %578 = vmatprep.subr.mxu1 %v613_v5 }
  0x2b   :  { %547 = vmatprep.subr.mxu0 %v613_v5  ;;  %579 = vmatpush3.msra.mxu1 %v350_v22 }
  0x2c   :  { %548 = vmatpush3.msra.mxu0 %v254_v8  ;;  %580 = vmatprep.subr.mxu1 %v613_v5 }
  0x2d   :  { %549 = vmatprep.subr.mxu0 %v613_v5  ;;  %581 = vmatpush3.msra.mxu1 %v349_v23 }
  0x2e   :  { %550 = vmatpush3.msra.mxu0 %v253_v9  ;;  %582 = vmatprep.subr.mxu1 %v613_v5 }
  0x2f   :  { %551 = vmatprep.subr.mxu0 %v613_v5  ;;  %583 = vmatpush3.msra.mxu1 %v348_v24 }
  0x30   :  { %552 = vmatpush3.msra.mxu0 %v252_v10  ;;  %584 = vmatprep.subr.mxu1 %v613_v5 }
  0x31   :  { %553 = vmatprep.subr.mxu0 %v613_v5  ;;  %585 = vmatpush3.msra.mxu1 %v347_v25 }
  0x32   :  { %554 = vmatpush3.msra.mxu0 %v251_v11  ;;  %586 = vmatprep.subr.mxu1 %v613_v5 }
  0x33   :  { %555 = vmatprep.subr.mxu0 %v613_v5  ;;  %587 = vmatpush3.msra.mxu1 %v346_v26 }
  0x34   :  { %556 = vmatpush3.msra.mxu0 %v250_v12  ;;  %588 = vmatprep.subr.mxu1 %v613_v5 }
  0x35   :  { %557 = vmatprep.subr.mxu0 %v613_v5  ;;  %589 = vmatpush3.msra.mxu1 %v345_v27 }
  0x36   :  { %558 = vmatpush3.msra.mxu0 %v249_v13  ;;  %590 = vmatprep.subr.mxu1 %v613_v5 }
  0x37   :  { %559 = vmatprep.subr.mxu0 %v613_v5  ;;  %591 = vmatpush3.msra.mxu1 %v344_v28 }
  0x38   :  { %560 = vmatpush3.msra.mxu0 %v248_v14  ;;  %592 = vmatprep.subr.mxu1 %v613_v5 }
  0x39   :  { %561 = vmatprep.subr.mxu0 %v613_v5  ;;  %593 = vmatpush3.msra.mxu1 %v343_v29 }
  0x3a   :  { %562 = vmatpush3.msra.mxu0 %v247_v15  ;;  %594 = vmatprep.subr.mxu1 %v613_v5 }
  0x3b   :  { %563 = vmatprep.subr.mxu0 %v613_v5  ;;  %595 = vmatpush3.msra.mxu1 %v342_v30 }
  0x3c   :  { %564 = vmatpush3.msra.mxu0 %v246_v16  ;;  %596 = vmatprep.subr.mxu1 %v613_v5 }
  0x3d   :  { %565 = vmatprep.subr.mxu0 %v613_v5  ;;  %597 = vmatpush3.msra.mxu1 %v341_v31 }
  0x3e   :  { %566 = vmatpush3.msra.mxu0 %v245_v17  ;;  %598 = vmatprep.subr.mxu1 %v613_v5 }
  0x3f   :  { %567 = vmatprep.subr.mxu0 %v613_v5  ;;  %599 = vmatpush3.msra.mxu1 %v340_v32 }
  0x40   :  { %568 = vmatpush3.msra.mxu0 %v244_v18  ;;  %600 = vmatprep.subr.mxu1 %v613_v5 }
  0x41   :  { %569 = vmatprep.subr.mxu0 %v613_v5  ;;  %601 = vmatpush3.msra.mxu1 %v339_v33 }
  0x42   :  { %570 = vmatpush3.msra.mxu0 %v243_v19  ;;  %602 = vmatprep.subr.mxu1 %v613_v5 }
  0x43   :  { %571 = vmatprep.subr.mxu0 %v613_v5  ;;  %603 = vmatpush3.msra.mxu1 %v338_v44 }
  0x44   :  { %572 = vmatpush3.msra.mxu0 %v242_v20  ;;  %604 = vmatprep.subr.mxu1 %v613_v5 }
  0x45   :  { %605 = vmatpush3.msra.mxu1 %v337_v45 }
  0x46   :  { %606 = vmatprep.subr.mxu1 %v613_v5 }
  0x47   :  { %607 = vmatpush3.msra.mxu1 %v336_v46 }
  0xe4   :  { %v469_v34 = vpop.f32.mrf.mxu0 }
  0xe5   :  { %v504_v35 = vpop.f32.mrf.mxu1 }
  0xe6   :  { %v470_v37 = vpop.f32.mrf.mxu0 }
  0xe7   :  { %v505_v38 = vpop.f32.mrf.mxu1  ;;  %v471_v39 = vadd.f32 %v470_v37, %v469_v34 }
  0xe8   :  { %v506_v41 = vadd.f32 %v505_v38, %v504_v35 }
  0xe9   :  { %v168_v40 = vadd.f32 %v471_v39, %v434_v36 }
  0xeb   :  { %v238_v42 = vadd.f32 %v506_v41, %v168_v40 }
  0xed   :  { %v241_v43 = vmax.f32 %v238_v42, 0.0 }
  0xef   :  { %574 = vmatmul.mubr.f32.vlgmr.msra.gmra.mxu0 %v241_v43 }
 0x1af   :  { %v331_v48 = vpop.f32.mrf.mxu0 }
 0x1b0   :  { %v332_v49 = vadd.f32 %v435_v47, %v331_v48 }
 0x1b1   :  { %v575_v50 = vpop.f32.mrf.mxu0 }
 0x1b2   :  { %v335_v51 = vmax.f32 %v332_v49, 0.0 }
 0x1b4   :  { %609 = vmatmul.mubr.f32.vlgmr.msra.gmra.mxu1 %v335_v51 }
 0x274   :  { %v425_v53 = vpop.f32.mrf.mxu1 }
 0x275   :  { %v426_v54 = vadd.f32 %v436_v52, %v425_v53 }
 0x276   :  { %v610_v55 = vpop.f32.mrf.mxu1 }
 0x277   :  { %429 = vst [vmem:[%s1008_s7] sm:$0xff] %v426_v54 }

// kernel: cnn_forward.4
= control target key start
LH: loop header
LB: loop body
LE: loop exit
PB: predicated region body
PF: predicated region fallthrough
CT: control target
= control target key end

     0   :  { %s1318_s12 = smov 0   ;;  %s2520_s0 = inlined_call_operand.vmem [shape: f32[16,256], index: 0, kind: input, shape index: {}]   ;;  %s2521_s1 = inlined_call_operand.vmem [shape: f32[5,128,256], index: 1, kind: input, shape index: {}]   ;;  %s2522_s2 = inlined_call_operand.vmem [shape: f32[1,128], index: 2, kind: input, shape index: {}]   ;;  %s2523_s3 = inlined_call_operand.vmem [shape: f32[16,128], index: 3, kind: output, shape index: {}]  }
   0x1 LB: > { %s1140_s13 = sadd.s32 4294967295, %s1295_s12   ;;  %p1144_p0 = scmp.ge.s32.totalorder %s1295_s12, 1  ;;  %s1295_s12 = sphi %s1318_s12, %s13_s12  }
   0x2   : > { %p137_p1 = scmp.lt.s32.totalorder %s1295_s12, 3 }
   0x4   : > { %p138_p2 = pnand %p1144_p0, %p137_p1 }
   0x6   : > { %141 = sbr.rel (%p138_p2) target bundleno = 389 (0x185), region = 32 }
   0xb   : > { %v1329_v0 = vld [vmem:[%s2521_s1 + $0x1f8] sm:$0xff]  ;;  %v1339_v2 = vld [vmem:[%s2521_s1 + $0x1f0] sm:$0xff]  ;;  %v1351_v4 = vld [vmem:[%s2521_s1 + $0x1e8] sm:$0xff]  ;;  %p1562_p3 = scmp.lt.s32.totalorder %s1140_s13, 1 }
   0xc   : > { %v1334_v1 = vld [vmem:[%s2521_s1 + $0xf8] sm:$0xff]  ;;  %236 = vmatprep.subr.mxu0 %v1329_v0  ;;  %v1346_v3 = vld [vmem:[%s2521_s1 + $0xf0] sm:$0xff]  ;;  %v1356_v5 = vld [vmem:[%s2521_s1 + $0xe8] sm:$0xff] }
   0xd   : > { %307 = vmatprep.subr.mxu1 %v1334_v1  ;;  %237 = vmatpush1.msra.mxu0 %v1339_v2  ;;  %v1363_v6 = vld [vmem:[%s2521_s1 + $0x1e0] sm:$0xff]  ;;  %v1373_v8 = vld [vmem:[%s2521_s1 + $0x1d8] sm:$0xff]  ;;  %v1385_v10 = vld [vmem:[%s2521_s1 + $0x1d0] sm:$0xff]  ;;  %s2758_s13 = smov (!%p1562_p3, %s1140_s13), 1 }
   0xe   : > { %308 = vmatpush1.msra.mxu1 %v1346_v3  ;;  %v1368_v7 = vld [vmem:[%s2521_s1 + $0xe0] sm:$0xff]  ;;  %238 = vmatprep.subr.mxu0 %v1351_v4  ;;  %v1380_v9 = vld [vmem:[%s2521_s1 + $0xd8] sm:$0xff]  ;;  %v1390_v11 = vld [vmem:[%s2521_s1 + $0xd0] sm:$0xff]  ;;  %s1279_s27 = sshll.u32 %s2758_s13, 4 }
   0xf   : > { %309 = vmatprep.subr.mxu1 %v1356_v5  ;;  %239 = vmatpush1.msra.mxu0 %v1363_v6  ;;  %v1397_v12 = vld [vmem:[%s2521_s1 + $0x1c8] sm:$0xff]  ;;  %v1409_v14 = vld [vmem:[%s2521_s1 + $0x1c0] sm:$0xff]  ;;  %v1421_v16 = vld [vmem:[%s2521_s1 + $0x1b8] sm:$0xff]  ;;  %s1708_s17 = scalar_lea.vmem %s2520_s0, %s1279_s27 }
  0x10   : > { %310 = vmatpush1.msra.mxu1 %v1368_v7  ;;  %v1402_v13 = vld [vmem:[%s2521_s1 + $0xc8] sm:$0xff]  ;;  %240 = vmatprep.subr.mxu0 %v1373_v8  ;;  %v1414_v15 = vld [vmem:[%s2521_s1 + $0xc0] sm:$0xff]  ;;  %v1426_v17 = vld [vmem:[%s2521_s1 + $0xb8] sm:$0xff] }
  0x11   : > { %311 = vmatprep.subr.mxu1 %v1380_v9  ;;  %241 = vmatpush1.msra.mxu0 %v1385_v10  ;;  %v1433_v18 = vld [vmem:[%s2521_s1 + $0x1b0] sm:$0xff]  ;;  %v1445_v20 = vld [vmem:[%s2521_s1 + $0x1a8] sm:$0xff]  ;;  %v1457_v22 = vld [vmem:[%s2521_s1 + $0x1a0] sm:$0xff] }
  0x12   : > { %312 = vmatpush1.msra.mxu1 %v1390_v11  ;;  %242 = vmatprep.subr.mxu0 %v1397_v12  ;;  %v1438_v19 = vld [vmem:[%s2521_s1 + $0xb0] sm:$0xff]  ;;  %v1450_v21 = vld [vmem:[%s2521_s1 + $0xa8] sm:$0xff]  ;;  %v1462_v23 = vld [vmem:[%s2521_s1 + $0xa0] sm:$0xff] }
  0x13   : > { %313 = vmatprep.subr.mxu1 %v1402_v13  ;;  %243 = vmatpush1.msra.mxu0 %v1409_v14  ;;  %2601 = vst [vmem:[#allocation2_spill] sm:$0xff] %v1462_v23  ;;  %v1469_v24 = vld [vmem:[%s2521_s1 + $0x198] sm:$0xff]  ;;  %v1481_v26 = vld [vmem:[%s2521_s1 + $0x190] sm:$0xff]  ;;  %v1493_v28 = vld [vmem:[%s2521_s1 + $0x188] sm:$0xff] }
  0x14   : > { %314 = vmatpush1.msra.mxu1 %v1414_v15  ;;  %244 = vmatprep.subr.mxu0 %v1421_v16  ;;  %v1474_v25 = vld [vmem:[%s2521_s1 + $0x98] sm:$0xff]  ;;  %v1486_v27 = vld [vmem:[%s2521_s1 + $0x90] sm:$0xff]  ;;  %v1498_v29 = vld [vmem:[%s2521_s1 + $0x88] sm:$0xff] }
  0x15   : > { %315 = vmatprep.subr.mxu1 %v1426_v17  ;;  %245 = vmatpush1.msra.mxu0 %v1433_v18  ;;  %2602 = vst [vmem:[#allocation3_spill] sm:$0xff] %v1474_v25  ;;  %2603 = vst [vmem:[#allocation4_spill] sm:$0xff] %v1486_v27  ;;  %v1505_v30 = vld [vmem:[%s2521_s1 + $0x180] sm:$0xff]  ;;  %v1517_v32 = vld [vmem:[%s2521_s1 + $0x178] sm:$0xff] }
  0x16   : > { %316 = vmatpush1.msra.mxu1 %v1438_v19  ;;  %246 = vmatprep.subr.mxu0 %v1445_v20  ;;  %2604 = vst [vmem:[#allocation5_spill] sm:$0xff] %v1498_v29  ;;  %v1510_v31 = vld [vmem:[%s2521_s1 + $0x80] sm:$0xff]  ;;  %v1522_v33 = vld [vmem:[%s2521_s1 + $0x78] sm:$0xff]  ;;  %v1529_v34 = vld [vmem:[%s2521_s1 + $0x170] sm:$0xff] }
  0x17   : > { %317 = vmatprep.subr.mxu1 %v1450_v21  ;;  %247 = vmatpush1.msra.mxu0 %v1457_v22  ;;  %2605 = vst [vmem:[#allocation6_spill] sm:$0xff] %v1510_v31  ;;  %2606 = vst [vmem:[#allocation7_spill] sm:$0xff] %v1522_v33  ;;  %v1534_v35 = vld [vmem:[%s2521_s1 + $0x70] sm:$0xff]  ;;  %v1541_v36 = vld [vmem:[%s2521_s1 + $0x168] sm:$0xff] }
  0x18   : > { %318 = vmatpush1.msra.mxu1 %v1462_v23  ;;  %248 = vmatprep.subr.mxu0 %v1469_v24  ;;  %2607 = vst [vmem:[#allocation8_spill] sm:$0xff] %v1534_v35  ;;  %v1546_v37 = vld [vmem:[%s2521_s1 + $0x68] sm:$0xff]  ;;  %v1553_v38 = vld [vmem:[%s2521_s1 + $0x160] sm:$0xff]  ;;  %v1571_v40 = vld [vmem:[%s2521_s1 + $0x158] sm:$0xff] }
  0x19   : > { %319 = vmatprep.subr.mxu1 %v1474_v25  ;;  %249 = vmatpush1.msra.mxu0 %v1481_v26  ;;  %2608 = vst [vmem:[#allocation9_spill] sm:$0xff] %v1546_v37  ;;  %v1558_v39 = vld [vmem:[%s2521_s1 + $0x60] sm:$0xff]  ;;  %v1576_v41 = vld [vmem:[%s2521_s1 + $0x58] sm:$0xff]  ;;  %v1583_v42 = vld [vmem:[%s2521_s1 + $0x150] sm:$0xff] }
  0x1a   : > { %320 = vmatpush1.msra.mxu1 %v1486_v27  ;;  %250 = vmatprep.subr.mxu0 %v1493_v28  ;;  %2609 = vst [vmem:[#allocation10_spill] sm:$0xff] %v1558_v39  ;;  %2611 = vst [vmem:[#allocation11_spill] sm:$0xff] %v1576_v41  ;;  %v1588_v43 = vld [vmem:[%s2521_s1 + $0x50] sm:$0xff]  ;;  %v1595_v44 = vld [vmem:[%s2521_s1 + $0x148] sm:$0xff] }
  0x1b   : > { %321 = vmatprep.subr.mxu1 %v1498_v29  ;;  %251 = vmatpush1.msra.mxu0 %v1505_v30  ;;  %2612 = vst [vmem:[#allocation12_spill] sm:$0xff] %v1588_v43  ;;  %v1600_v45 = vld [vmem:[%s2521_s1 + $0x48] sm:$0xff]  ;;  %v1607_v46 = vld [vmem:[%s2521_s1 + $0x140] sm:$0xff]  ;;  %v1625_v48 = vld [vmem:[%s2521_s1 + $0x138] sm:$0xff] }
  0x1c   : > { %322 = vmatpush1.msra.mxu1 %v1510_v31  ;;  %252 = vmatprep.subr.mxu0 %v1517_v32  ;;  %2613 = vst [vmem:[#allocation13_spill] sm:$0xff] %v1600_v45  ;;  %v1612_v47 = vld [vmem:[%s2521_s1 + $0x40] sm:$0xff]  ;;  %v1630_v49 = vld [vmem:[%s2521_s1 + $0x38] sm:$0xff]  ;;  %v1637_v50 = vld [vmem:[%s2521_s1 + $0x130] sm:$0xff] }
  0x1d   : > { %323 = vmatprep.subr.mxu1 %v1522_v33  ;;  %253 = vmatpush1.msra.mxu0 %v1529_v34  ;;  %2614 = vst [vmem:[#allocation14_spill] sm:$0xff] %v1612_v47  ;;  %2615 = vst [vmem:[#allocation15_spill] sm:$0xff] %v1630_v49  ;;  %v1642_v51 = vld [vmem:[%s2521_s1 + $0x30] sm:$0xff]  ;;  %v1649_v52 = vld [vmem:[%s2521_s1 + $0x128] sm:$0xff] }
  0x1e   : > { %324 = vmatpush1.msra.mxu1 %v1534_v35  ;;  %254 = vmatprep.subr.mxu0 %v1541_v36  ;;  %2616 = vst [vmem:[#allocation16_spill] sm:$0xff] %v1642_v51  ;;  %v1654_v53 = vld [vmem:[%s2521_s1 + $0x28] sm:$0xff]  ;;  %v1661_v54 = vld [vmem:[%s2521_s1 + $0x120] sm:$0xff]  ;;  %v1674_v56 = vld [vmem:[%s2521_s1 + $0x118] sm:$0xff] }
  0x1f   : > { %325 = vmatprep.subr.mxu1 %v1546_v37  ;;  %255 = vmatpush1.msra.mxu0 %v1553_v38  ;;  %2617 = vst [vmem:[#allocation17_spill] sm:$0xff] %v1654_v53  ;;  %v1666_v55 = vld [vmem:[%s2521_s1 + $0x20] sm:$0xff]  ;;  %v1679_v57 = vld [vmem:[%s2521_s1 + $0x18] sm:$0xff]  ;;  %v1686_v58 = vld [vmem:[%s2521_s1 + $0x110] sm:$0xff] }
  0x20   : > { %326 = vmatpush1.msra.mxu1 %v1558_v39  ;;  %256 = vmatprep.subr.mxu0 %v1571_v40  ;;  %2618 = vst [vmem:[#allocation18_spill] sm:$0xff] %v1666_v55  ;;  %2619 = vst [vmem:[#allocation19_spill] sm:$0xff] %v1679_v57  ;;  %v1691_v59 = vld [vmem:[%s2521_s1 + $0x10] sm:$0xff]  ;;  %v1698_v60 = vld [vmem:[%s2521_s1 + $0x108] sm:$0xff] }
  0x21   : > { %327 = vmatprep.subr.mxu1 %v1576_v41  ;;  %257 = vmatpush1.msra.mxu0 %v1583_v42  ;;  %2620 = vst [vmem:[#allocation20_spill] sm:$0xff] %v1691_v59  ;;  %v1703_v61 = vld [vmem:[%s2521_s1 + $0x8] sm:$0xff]  ;;  %v1715_v62 = vld [vmem:[%s2521_s1 + $0x100] sm:$0xff]  ;;  %v1830_v39 = vld [vmem:[%s2521_s1 + $0x2b8] sm:$0xff] }
  0x22   : > { %328 = vmatpush1.msra.mxu1 %v1588_v43  ;;  %258 = vmatprep.subr.mxu0 %v1595_v44  ;;  %2621 = vst [vmem:[#allocation21_spill] sm:$0xff] %v1703_v61  ;;  %v1722_v63 = vld [vmem:[%s2521_s1] sm:$0xff]  ;;  %v1806_v43 = vld [vmem:[%s2521_s1 + $0x2c8] sm:$0xff]  ;;  %v1842_v37 = vld [vmem:[%s2521_s1 + $0x2b0] sm:$0xff] }
  0x23   : > { %329 = vmatprep.subr.mxu1 %v1600_v45  ;;  %259 = vmatpush1.msra.mxu0 %v1607_v46  ;;  %2622 = vst [vmem:[#allocation22_spill] sm:$0xff] %v1722_v63  ;;  %v1794_v45 = vld [vmem:[%s2521_s1 + $0x2d0] sm:$0xff]  ;;  %v1818_v41 = vld [vmem:[%s2521_s1 + $0x2c0] sm:$0xff]  ;;  %v1854_v35 = vld [vmem:[%s2521_s1 + $0x2a8] sm:$0xff] }
  0x24   : > { %330 = vmatpush1.msra.mxu1 %v1612_v47  ;;  %260 = vmatprep.subr.mxu0 %v1625_v48  ;;  %v1758_v47 = vld [vmem:[%s2521_s1 + $0x2e8] sm:$0xff]  ;;  %2634 = vst [vmem:[#allocation34_spill] sm:$0xff] %v1854_v35  ;;  %v1866_v33 = vld [vmem:[%s2521_s1 + $0x2a0] sm:$0xff]  ;;  %v1878_v31 = vld [vmem:[%s2521_s1 + $0x298] sm:$0xff] }
  0x25   : > { %331 = vmatprep.subr.mxu1 %v1630_v49  ;;  %261 = vmatpush1.msra.mxu0 %v1637_v50  ;;  %v1752_v49 = vld [vmem:[%s2521_s1 + $0x3f0] sm:$0xff]  ;;  %2636 = vst [vmem:[#allocation36_spill] sm:$0xff] %v1866_v33  ;;  %2638 = vst [vmem:[#allocation38_spill] sm:$0xff] %v1878_v31  ;;  %v1902_v27 = vld [vmem:[%s2521_s1 + $0x288] sm:$0xff] }
  0x26   : > { %332 = vmatpush1.msra.mxu1 %v1642_v51  ;;  %262 = vmatprep.subr.mxu0 %v1649_v52  ;;  %v1740_v51 = vld [vmem:[%s2521_s1 + $0x3f8] sm:$0xff]  ;;  %2625 = vst [vmem:[#allocation25_spill] sm:$0xff] %v1752_v49  ;;  %v1890_v29 = vld [vmem:[%s2521_s1 + $0x290] sm:$0xff]  ;;  %2642 = vst [vmem:[#allocation42_spill] sm:$0xff] %v1902_v27 }
  0x27   : > { %333 = vmatprep.subr.mxu1 %v1654_v53  ;;  %263 = vmatpush1.msra.mxu0 %v1661_v54  ;;  %v2532_v53 = vmov 0.0   ;;  %2624 = vst [vmem:[#allocation24_spill] sm:$0xff] %v1740_v51  ;;  %2640 = vst [vmem:[#allocation40_spill] sm:$0xff] %v1890_v29  ;;  %v1914_v25 = vld [vmem:[%s2521_s1 + $0x280] sm:$0xff]  ;;  %v2105_v23 = vld [vmem:[%s1708_s17 + $0x8] sm:$0x7e] }
  0x28   : > { %334 = vmatpush1.msra.mxu1 %v1666_v55  ;;  %264 = vmatprep.subr.mxu0 %v1674_v56  ;;  %v1727_v55 = vld [vmem:[%s1708_s17 + $0x8] sm:$0x3f]  ;;  %2644 = vst [vmem:[#allocation44_spill] sm:$0xff] %v1914_v25 }
  0x29   : > { %335 = vmatprep.subr.mxu1 %v1679_v57  ;;  %265 = vmatpush1.msra.mxu0 %v1686_v58  ;;  %2623 = vst [vmem:[#allocation23_spill] sm:$0xff] %v1727_v55  ;;  %v169_v57 = vld [vmem:[%s1708_s17] sm:$0x3f] }
  0x2a   : > { %336 = vmatpush1.msra.mxu1 %v1691_v59  ;;  %266 = vmatprep.subr.mxu0 %v1698_v60  ;;  %v1735_v59 = vld [vmem:[%s2521_s1 + $0x2f8] sm:$0xff] }
  0x2b   : > { %337 = vmatprep.subr.mxu1 %v1703_v61  ;;  %267 = vmatpush1.msra.mxu0 %v1715_v62  ;;  %v1747_v61 = vld [vmem:[%s2521_s1 + $0x2f0] sm:$0xff] }
  0x2c   : > { %300 = vmatprep.mubr.f32.mxu0 %v2532_v53  ;;  %338 = vmatpush1.msra.mxu1 %v1722_v63  ;;  %v1770_v63 = vld [vmem:[%s2521_s1 + $0x2e0] sm:$0xff] }
  0x2d   : > { %371 = vmatprep.mubr.f32.mxu1 %v2532_v53  ;;  %301 = vmatmul.mubr.f32.vlgmr.msra.gmra.mxu0 %v1727_v55  ;;  %v1763_v53 = vld [vmem:[%s2521_s1 + $0x3e8] sm:$0xff]  ;;  %v1782_v55 = vld [vmem:[%s2521_s1 + $0x2d8] sm:$0xff] }
  0x2e   : > { %372 = vmatmul.mubr.f32.vlgmr.msra.gmra.mxu1 %v169_v57  ;;  %2626 = vst [vmem:[#allocation26_spill] sm:$0xff] %v1763_v53  ;;  %415 = vmatprep.subr.mxu0 %v1735_v59  ;;  %v1775_v57 = vld [vmem:[%s2521_s1 + $0x3e0] sm:$0xff] }
  0x2f   : > { %525 = vmatprep.subr.mxu1 %v1740_v51  ;;  %2627 = vst [vmem:[#allocation27_spill] sm:$0xff] %v1775_v57  ;;  %416 = vmatpush1.msra.mxu0 %v1747_v61  ;;  %v1787_v51 = vld [vmem:[%s2521_s1 + $0x3d8] sm:$0xff] }
  0x30   : > { %526 = vmatpush1.msra.mxu1 %v1752_v49  ;;  %2628 = vst [vmem:[#allocation28_spill] sm:$0xff] %v1787_v51  ;;  %417 = vmatprep.subr.mxu0 %v1758_v47  ;;  %v1799_v49 = vld [vmem:[%s2521_s1 + $0x3d0] sm:$0xff] }
  0x31   : > { %527 = vmatprep.subr.mxu1 %v1763_v53  ;;  %2629 = vst [vmem:[#allocation29_spill] sm:$0xff] %v1799_v49  ;;  %418 = vmatpush1.msra.mxu0 %v1770_v63  ;;  %v1811_v53 = vld [vmem:[%s2521_s1 + $0x3c8] sm:$0xff] }
  0x32   : > { %528 = vmatpush1.msra.mxu1 %v1775_v57  ;;  %2630 = vst [vmem:[#allocation30_spill] sm:$0xff] %v1811_v53  ;;  %419 = vmatprep.subr.mxu0 %v1782_v55  ;;  %v1823_v57 = vld [vmem:[%s2521_s1 + $0x3c0] sm:$0xff] }
  0x33   : > { %529 = vmatprep.subr.mxu1 %v1787_v51  ;;  %2631 = vst [vmem:[#allocation31_spill] sm:$0xff] %v1823_v57  ;;  %420 = vmatpush1.msra.mxu0 %v1794_v45  ;;  %v1835_v51 = vld [vmem:[%s2521_s1 + $0x3b8] sm:$0xff] }
  0x34   : > { %530 = vmatpush1.msra.mxu1 %v1799_v49  ;;  %2632 = vst [vmem:[#allocation32_spill] sm:$0xff] %v1835_v51  ;;  %421 = vmatprep.subr.mxu0 %v1806_v43  ;;  %v1847_v49 = vld [vmem:[%s2521_s1 + $0x3b0] sm:$0xff] }
  0x35   : > { %531 = vmatprep.subr.mxu1 %v1811_v53  ;;  %2633 = vst [vmem:[#allocation33_spill] sm:$0xff] %v1847_v49  ;;  %422 = vmatpush1.msra.mxu0 %v1818_v41  ;;  %v1859_v53 = vld [vmem:[%s2521_s1 + $0x3a8] sm:$0xff] }
  0x36   : > { %532 = vmatpush1.msra.mxu1 %v1823_v57  ;;  %2635 = vst [vmem:[#allocation35_spill] sm:$0xff] %v1859_v53  ;;  %423 = vmatprep.subr.mxu0 %v1830_v39  ;;  %v1871_v57 = vld [vmem:[%s2521_s1 + $0x3a0] sm:$0xff] }
  0x37   : > { %533 = vmatprep.subr.mxu1 %v1835_v51  ;;  %2637 = vst [vmem:[#allocation37_spill] sm:$0xff] %v1871_v57  ;;  %424 = vmatpush1.msra.mxu0 %v1842_v37  ;;  %v1883_v51 = vld [vmem:[%s2521_s1 + $0x398] sm:$0xff] }
  0x38   : > { %534 = vmatpush1.msra.mxu1 %v1847_v49  ;;  %2639 = vst [vmem:[#allocation39_spill] sm:$0xff] %v1883_v51  ;;  %425 = vmatprep.subr.mxu0 %v1854_v35  ;;  %v1895_v49 = vld [vmem:[%s2521_s1 + $0x390] sm:$0xff]  ;;  %v2120_v35 = vld [vmem:[%s2521_s1 + $0x300] sm:$0xff] }
  0x39   : > { %535 = vmatprep.subr.mxu1 %v1859_v53  ;;  %2641 = vst [vmem:[#allocation41_spill] sm:$0xff] %v1895_v49  ;;  %426 = vmatpush1.msra.mxu0 %v1866_v33  ;;  %v1907_v53 = vld [vmem:[%s2521_s1 + $0x388] sm:$0xff]  ;;  %v2078_v33 = vld [vmem:[%s1708_s17] sm:$0x7e]  ;;  %2674 = vst [vmem:[#allocation74_spill] sm:$0xff] %v2120_v35 }
  0x3a   : > { %536 = vmatpush1.msra.mxu1 %v1871_v57  ;;  %2643 = vst [vmem:[#allocation43_spill] sm:$0xff] %v1907_v53  ;;  %427 = vmatprep.subr.mxu0 %v1878_v31  ;;  %v1919_v57 = vld [vmem:[%s2521_s1 + $0x380] sm:$0xff]  ;;  %v1926_v31 = vld [vmem:[%s2521_s1 + $0x278] sm:$0xff] }
  0x3b   : > { %537 = vmatprep.subr.mxu1 %v1883_v51  ;;  %2645 = vst [vmem:[#allocation45_spill] sm:$0xff] %v1919_v57  ;;  %428 = vmatpush1.msra.mxu0 %v1890_v29  ;;  %2646 = vst [vmem:[#allocation46_spill] sm:$0xff] %v1926_v31  ;;  %v1931_v51 = vld [vmem:[%s2521_s1 + $0x378] sm:$0xff]  ;;  %v1938_v29 = vld [vmem:[%s2521_s1 + $0x270] sm:$0xff] }
  0x3c   : > { %538 = vmatpush1.msra.mxu1 %v1895_v49  ;;  %2647 = vst [vmem:[#allocation47_spill] sm:$0xff] %v1931_v51  ;;  %429 = vmatprep.subr.mxu0 %v1902_v27  ;;  %2648 = vst [vmem:[#allocation48_spill] sm:$0xff] %v1938_v29  ;;  %v1943_v49 = vld [vmem:[%s2521_s1 + $0x370] sm:$0xff]  ;;  %v1950_v27 = vld [vmem:[%s2521_s1 + $0x268] sm:$0xff] }
  0x3d   : > { %539 = vmatprep.subr.mxu1 %v1907_v53  ;;  %2649 = vst [vmem:[#allocation49_spill] sm:$0xff] %v1943_v49  ;;  %430 = vmatpush1.msra.mxu0 %v1914_v25  ;;  %2650 = vst [vmem:[#allocation50_spill] sm:$0xff] %v1950_v27  ;;  %v1955_v53 = vld [vmem:[%s2521_s1 + $0x368] sm:$0xff]  ;;  %v1962_v25 = vld [vmem:[%s2521_s1 + $0x260] sm:$0xff] }
  0x3e   : > { %540 = vmatpush1.msra.mxu1 %v1919_v57  ;;  %2651 = vst [vmem:[#allocation51_spill] sm:$0xff] %v1955_v53  ;;  %431 = vmatprep.subr.mxu0 %v1926_v31  ;;  %2652 = vst [vmem:[#allocation52_spill] sm:$0xff] %v1962_v25  ;;  %v1967_v57 = vld [vmem:[%s2521_s1 + $0x360] sm:$0xff]  ;;  %v1974_v31 = vld [vmem:[%s2521_s1 + $0x258] sm:$0xff] }
  0x3f   : > { %541 = vmatprep.subr.mxu1 %v1931_v51  ;;  %2653 = vst [vmem:[#allocation53_spill] sm:$0xff] %v1967_v57  ;;  %432 = vmatpush1.msra.mxu0 %v1938_v29  ;;  %2654 = vst [vmem:[#allocation54_spill] sm:$0xff] %v1974_v31  ;;  %v1979_v51 = vld [vmem:[%s2521_s1 + $0x358] sm:$0xff]  ;;  %v1986_v29 = vld [vmem:[%s2521_s1 + $0x250] sm:$0xff] }
  0x40   : > { %542 = vmatpush1.msra.mxu1 %v1943_v49  ;;  %2655 = vst [vmem:[#allocation55_spill] sm:$0xff] %v1979_v51  ;;  %433 = vmatprep.subr.mxu0 %v1950_v27  ;;  %2656 = vst [vmem:[#allocation56_spill] sm:$0xff] %v1986_v29  ;;  %v1991_v49 = vld [vmem:[%s2521_s1 + $0x350] sm:$0xff]  ;;  %v1998_v27 = vld [vmem:[%s2521_s1 + $0x248] sm:$0xff] }
  0x41   : > { %543 = vmatprep.subr.mxu1 %v1955_v53  ;;  %2657 = vst [vmem:[#allocation57_spill] sm:$0xff] %v1991_v49  ;;  %434 = vmatpush1.msra.mxu0 %v1962_v25  ;;  %2658 = vst [vmem:[#allocation58_spill] sm:$0xff] %v1998_v27  ;;  %v2003_v53 = vld [vmem:[%s2521_s1 + $0x348] sm:$0xff]  ;;  %v2010_v25 = vld [vmem:[%s2521_s1 + $0x240] sm:$0xff] }
  0x42   : > { %544 = vmatpush1.msra.mxu1 %v1967_v57  ;;  %2659 = vst [vmem:[#allocation59_spill] sm:$0xff] %v2003_v53  ;;  %435 = vmatprep.subr.mxu0 %v1974_v31  ;;  %2660 = vst [vmem:[#allocation60_spill] sm:$0xff] %v2010_v25  ;;  %v2015_v57 = vld [vmem:[%s2521_s1 + $0x340] sm:$0xff]  ;;  %v2022_v31 = vld [vmem:[%s2521_s1 + $0x238] sm:$0xff] }
  0x43   : > { %545 = vmatprep.subr.mxu1 %v1979_v51  ;;  %2661 = vst [vmem:[#allocation61_spill] sm:$0xff] %v2015_v57  ;;  %436 = vmatpush1.msra.mxu0 %v1986_v29  ;;  %2662 = vst [vmem:[#allocation62_spill] sm:$0xff] %v2022_v31  ;;  %v2027_v51 = vld [vmem:[%s2521_s1 + $0x338] sm:$0xff]  ;;  %v2034_v29 = vld [vmem:[%s2521_s1 + $0x230] sm:$0xff] }
  0x44   : > { %546 = vmatpush1.msra.mxu1 %v1991_v49  ;;  %2663 = vst [vmem:[#allocation63_spill] sm:$0xff] %v2027_v51  ;;  %437 = vmatprep.subr.mxu0 %v1998_v27  ;;  %2664 = vst [vmem:[#allocation64_spill] sm:$0xff] %v2034_v29  ;;  %v2039_v49 = vld [vmem:[%s2521_s1 + $0x330] sm:$0xff]  ;;  %v2046_v27 = vld [vmem:[%s2521_s1 + $0x228] sm:$0xff] }
  0x45   : > { %547 = vmatprep.subr.mxu1 %v2003_v53  ;;  %2665 = vst [vmem:[#allocation65_spill] sm:$0xff] %v2039_v49  ;;  %438 = vmatpush1.msra.mxu0 %v2010_v25  ;;  %2666 = vst [vmem:[#allocation66_spill] sm:$0xff] %v2046_v27  ;;  %v2051_v53 = vld [vmem:[%s2521_s1 + $0x328] sm:$0xff]  ;;  %v2058_v25 = vld [vmem:[%s2521_s1 + $0x220] sm:$0xff] }
  0x46   : > { %548 = vmatpush1.msra.mxu1 %v2015_v57  ;;  %2667 = vst [vmem:[#allocation67_spill] sm:$0xff] %v2051_v53  ;;  %439 = vmatprep.subr.mxu0 %v2022_v31  ;;  %2668 = vst [vmem:[#allocation68_spill] sm:$0xff] %v2058_v25  ;;  %v2063_v57 = vld [vmem:[%s2521_s1 + $0x320] sm:$0xff]  ;;  %v2070_v31 = vld [vmem:[%s2521_s1 + $0x218] sm:$0xff] }
  0x47   : > { %549 = vmatprep.subr.mxu1 %v2027_v51  ;;  %2669 = vst [vmem:[#allocation69_spill] sm:$0xff] %v2063_v57  ;;  %440 = vmatpush1.msra.mxu0 %v2034_v29  ;;  %v2075_v51 = vld [vmem:[%s2521_s1 + $0x318] sm:$0xff]  ;;  %v2090_v29 = vld [vmem:[%s2521_s1 + $0x310] sm:$0xff] }
  0x48   : > { %550 = vmatpush1.msra.mxu1 %v2039_v49  ;;  %2670 = vst [vmem:[#allocation70_spill] sm:$0xff] %v2075_v51  ;;  %441 = vmatprep.subr.mxu0 %v2046_v27  ;;  %v2085_v49 = vld [vmem:[%s2521_s1 + $0x210] sm:$0xff]  ;;  %2672 = vst [vmem:[#allocation72_spill] sm:$0xff] %v2090_v29  ;;  %v2097_v27 = vld [vmem:[%s2521_s1 + $0x208] sm:$0xff] }
  0x49   : > { %551 = vmatprep.subr.mxu1 %v2051_v53  ;;  %2671 = vst [vmem:[#allocation71_spill] sm:$0xff] %v2085_v49  ;;  %442 = vmatpush1.msra.mxu0 %v2058_v25  ;;  %v2102_v53 = vld [vmem:[%s2521_s1 + $0x308] sm:$0xff] }
  0x4a   : > { %552 = vmatpush1.msra.mxu1 %v2063_v57  ;;  %2673 = vst [vmem:[#allocation73_spill] sm:$0xff] %v2102_v53  ;;  %443 = vmatprep.subr.mxu0 %v2070_v31  ;;  %v2112_v57 = vld [vmem:[%s2521_s1 + $0x200] sm:$0xff]  ;;  %v2145_v25 = vld [vmem:[%s2521_s1 + $0x4e8] sm:$0xff] }
  0x4b   : > { %553 = vmatprep.subr.mxu1 %v2075_v51  ;;  %444 = vmatpush1.msra.mxu0 %v2085_v49  ;;  %v2127_v51 = vld [vmem:[%s2521_s1 + $0x4f8] sm:$0xff]  ;;  %v2676_v49 = vmov 0.0  }
  0x4c   : > { %554 = vmatpush1.msra.mxu1 %v2090_v29  ;;  %445 = vmatprep.subr.mxu0 %v2097_v27  ;;  %2675 = vst [vmem:[#allocation75_spill] sm:$0xff] %v2127_v51  ;;  %v2677_v29 = vrot.slane %v2078_v33, 1 }
  0x4d   : > { %555 = vmatprep.subr.mxu1 %v2102_v53  ;;  %446 = vmatpush1.msra.mxu0 %v2112_v57  ;;  %v2138_v53 = vld [vmem:[%s2521_s1 + $0x4f0] sm:$0xff] }
  0x4e   : > { %479 = vmatprep.mubr.f32.mxu0 %v2676_v49  ;;  %556 = vmatpush1.msra.mxu1 %v2120_v35  ;;  %v2678_v35 = vrot.slane %v2105_v23, 1 }
  0x4f   : > { %480 = vmatmul.mubr.f32.vlgmr.msra.gmra.mxu0 %v2677_v29  ;;  %589 = vmatprep.mubr.f32.mxu1 %v2676_v49  ;;  %v2153_v29 = vld [vmem:[%s2521_s1 + $0x4e0] sm:$0xff] }
  0x50   : > { %635 = vmatprep.subr.mxu0 %v2127_v51  ;;  %709 = vmatprep.subr.mxu1 %v1329_v0  ;;  %v2160_v51 = vld [vmem:[%s2521_s1 + $0x4d8] sm:$0xff]  ;;  %v2167_v0 = vld [vmem:[%s2521_s1 + $0x4d0] sm:$0xff] }
  0x51   : > { %590 = vmatmul.mubr.f32.vlgmr.msra.gmra.mxu1 %v2678_v35  ;;  %636 = vmatpush1.msra.mxu0 %v2138_v53  ;;  %v2293_v35 = vld [vmem:[%s2521_s1 + $0x440] sm:$0xff] }
  0x52   : > { %710 = vmatpush1.msra.mxu1 %v1339_v2  ;;  %637 = vmatprep.subr.mxu0 %v2145_v25  ;;  %v2174_v2 = vld [vmem:[%s2521_s1 + $0x4c8] sm:$0xff] }
  0x53   : > { %711 = vmatprep.subr.mxu1 %v1351_v4  ;;  %638 = vmatpush1.msra.mxu0 %v2153_v29  ;;  %v2181_v4 = vld [vmem:[%s2521_s1 + $0x4c0] sm:$0xff] }
  0x54   : > { %712 = vmatpush1.msra.mxu1 %v1363_v6  ;;  %639 = vmatprep.subr.mxu0 %v2160_v51  ;;  %v2188_v6 = vld [vmem:[%s2521_s1 + $0x4b8] sm:$0xff] }
  0x55   : > { %713 = vmatprep.subr.mxu1 %v1373_v8  ;;  %640 = vmatpush1.msra.mxu0 %v2167_v0  ;;  %v2195_v8 = vld [vmem:[%s2521_s1 + $0x4b0] sm:$0xff] }
  0x56   : > { %714 = vmatpush1.msra.mxu1 %v1385_v10  ;;  %641 = vmatprep.subr.mxu0 %v2174_v2  ;;  %v2202_v10 = vld [vmem:[%s2521_s1 + $0x4a8] sm:$0xff] }
  0x57   : > { %715 = vmatprep.subr.mxu1 %v1397_v12  ;;  %642 = vmatpush1.msra.mxu0 %v2181_v4  ;;  %v2209_v12 = vld [vmem:[%s2521_s1 + $0x4a0] sm:$0xff] }
  0x58   : > { %716 = vmatpush1.msra.mxu1 %v1409_v14  ;;  %643 = vmatprep.subr.mxu0 %v2188_v6  ;;  %v2216_v14 = vld [vmem:[%s2521_s1 + $0x498] sm:$0xff] }
  0x59   : > { %717 = vmatprep.subr.mxu1 %v1421_v16  ;;  %644 = vmatpush1.msra.mxu0 %v2195_v8  ;;  %v2223_v16 = vld [vmem:[%s2521_s1 + $0x490] sm:$0xff] }
  0x5a   : > { %718 = vmatpush1.msra.mxu1 %v1433_v18  ;;  %645 = vmatprep.subr.mxu0 %v2202_v10  ;;  %v2230_v18 = vld [vmem:[%s2521_s1 + $0x488] sm:$0xff] }
  0x5b   : > { %719 = vmatprep.subr.mxu1 %v1445_v20  ;;  %646 = vmatpush1.msra.mxu0 %v2209_v12  ;;  %v2237_v20 = vld [vmem:[%s2521_s1 + $0x480] sm:$0xff] }
  0x5c   : > { %720 = vmatpush1.msra.mxu1 %v1457_v22  ;;  %647 = vmatprep.subr.mxu0 %v2216_v14  ;;  %v2244_v22 = vld [vmem:[%s2521_s1 + $0x478] sm:$0xff] }
  0x5d   : > { %721 = vmatprep.subr.mxu1 %v1469_v24  ;;  %648 = vmatpush1.msra.mxu0 %v2223_v16  ;;  %v2251_v24 = vld [vmem:[%s2521_s1 + $0x470] sm:$0xff] }
  0x5e   : > { %722 = vmatpush1.msra.mxu1 %v1481_v26  ;;  %649 = vmatprep.subr.mxu0 %v2230_v18  ;;  %v2258_v26 = vld [vmem:[%s2521_s1 + $0x468] sm:$0xff] }
  0x5f   : > { %723 = vmatprep.subr.mxu1 %v1493_v28  ;;  %650 = vmatpush1.msra.mxu0 %v2237_v20  ;;  %v2265_v28 = vld [vmem:[%s2521_s1 + $0x460] sm:$0xff] }
  0x60   : > { %724 = vmatpush1.msra.mxu1 %v1505_v30  ;;  %651 = vmatprep.subr.mxu0 %v2244_v22  ;;  %v2272_v30 = vld [vmem:[%s2521_s1 + $0x458] sm:$0xff] }
  0x61   : > { %725 = vmatprep.subr.mxu1 %v1517_v32  ;;  %652 = vmatpush1.msra.mxu0 %v2251_v24  ;;  %v2279_v32 = vld [vmem:[%s2521_s1 + $0x450] sm:$0xff] }
  0x62   : > { %726 = vmatpush1.msra.mxu1 %v1529_v34  ;;  %653 = vmatprep.subr.mxu0 %v2258_v26  ;;  %v2286_v34 = vld [vmem:[%s2521_s1 + $0x448] sm:$0xff] }
  0x63   : > { %727 = vmatprep.subr.mxu1 %v1541_v36  ;;  %654 = vmatpush1.msra.mxu0 %v2265_v28  ;;  %v2300_v36 = vld [vmem:[%s2521_s1 + $0x438] sm:$0xff] }
  0x64   : > { %728 = vmatpush1.msra.mxu1 %v1553_v38  ;;  %655 = vmatprep.subr.mxu0 %v2272_v30  ;;  %v2307_v38 = vld [vmem:[%s2521_s1 + $0x430] sm:$0xff] }
  0x65   : > { %729 = vmatprep.subr.mxu1 %v1571_v40  ;;  %656 = vmatpush1.msra.mxu0 %v2279_v32  ;;  %v2314_v40 = vld [vmem:[%s2521_s1 + $0x428] sm:$0xff] }
  0x66   : > { %730 = vmatpush1.msra.mxu1 %v1583_v42  ;;  %657 = vmatprep.subr.mxu0 %v2286_v34  ;;  %2679 = vst [vmem:[#allocation76_spill] sm:$0xff] %v2314_v40  ;;  %v2321_v42 = vld [vmem:[%s2521_s1 + $0x420] sm:$0xff] }
  0x67   : > { %731 = vmatprep.subr.mxu1 %v1595_v44  ;;  %658 = vmatpush1.msra.mxu0 %v2293_v35  ;;  %v2328_v44 = vld [vmem:[%s2521_s1 + $0x418] sm:$0xff] }
  0x68   : > { %732 = vmatpush1.msra.mxu1 %v1607_v46  ;;  %659 = vmatprep.subr.mxu0 %v2300_v36  ;;  %v2331_v46 = vld [vmem:[%s1708_s17] sm:$0xfc] }
  0x69   : > { %733 = vmatprep.subr.mxu1 %v1625_v48  ;;  %660 = vmatpush1.msra.mxu0 %v2307_v38  ;;  %v2338_v48 = vld [vmem:[%s2521_s1 + $0x410] sm:$0xff] }
  0x6a   : > { %734 = vmatpush1.msra.mxu1 %v1637_v50  ;;  %661 = vmatprep.subr.mxu0 %v2314_v40  ;;  %v2345_v50 = vld [vmem:[%s2521_s1 + $0x408] sm:$0xff]  ;;  %v633_v40 = vrot.slane %v2331_v46, 2 }
  0x6b   : > { %735 = vmatprep.subr.mxu1 %v1649_v52  ;;  %662 = vmatpush1.msra.mxu0 %v2321_v42  ;;  %v2352_v52 = vld [vmem:[%s2521_s1 + $0x400] sm:$0xff] }
  0x6c   : > { %736 = vmatpush1.msra.mxu1 %v1661_v54  ;;  %663 = vmatprep.subr.mxu0 %v2328_v44  ;;  %v2680_v54 = vrot.slane %v2078_v33, 1  ;;  %v2692_v33 = vld [vmem:[#allocation7_spill] sm:$0xff] }
  0x6d   : > { %737 = vmatprep.subr.mxu1 %v1674_v56  ;;  %664 = vmatpush1.msra.mxu0 %v2338_v48  ;;  %v2700_v56 = vld [vmem:[#allocation11_spill] sm:$0xff] }
  0x6e   : > { %738 = vmatpush1.msra.mxu1 %v1686_v58  ;;  %665 = vmatprep.subr.mxu0 %v2345_v50  ;;  %v2701_v58 = vld [vmem:[#allocation54_spill] sm:$0xff] }
  0x6f   : > { %739 = vmatprep.subr.mxu1 %v1698_v60  ;;  %666 = vmatpush1.msra.mxu0 %v2352_v52  ;;  %v2703_v60 = vld [vmem:[#allocation56_spill] sm:$0xff] }
  0x70   : > { %699 = vmatprep.mubr.f32.mxu0 %v2676_v49  ;;  %740 = vmatpush1.msra.mxu1 %v1715_v62  ;;  %v2705_v62 = vld [vmem:[#allocation58_spill] sm:$0xff] }
  0x71   : > { %700 = vmatmul.mubr.f32.vlgmr.msra.gmra.mxu0 %v633_v40  ;;  %773 = vmatprep.mubr.f32.mxu1 %v2676_v49 }
  0x72   : > { %780 = vmatprep.subr.mxu0 %v1334_v1  ;;  %851 = vmatprep.subr.mxu1 %v1735_v59  ;;  %v2681_v1 = vld [vmem:[#allocation34_spill] sm:$0xff]  ;;  %v2702_v59 = vld [vmem:[#allocation12_spill] sm:$0xff] }
  0x73   : > { %774 = vmatmul.mubr.f32.vlgmr.msra.gmra.mxu1 %v2680_v54  ;;  %781 = vmatpush1.msra.mxu0 %v1346_v3  ;;  %v2682_v3 = vld [vmem:[#allocation2_spill] sm:$0xff]  ;;  %v2707_v54 = vld [vmem:[#allocation60_spill] sm:$0xff] }
  0x74   : > { %852 = vmatpush1.msra.mxu1 %v1747_v61  ;;  %782 = vmatprep.subr.mxu0 %v1356_v5  ;;  %v2683_v5 = vld [vmem:[#allocation36_spill] sm:$0xff]  ;;  %v2704_v61 = vld [vmem:[#allocation13_spill] sm:$0xff] }
  0x75   : > { %853 = vmatprep.subr.mxu1 %v1758_v47  ;;  %783 = vmatpush1.msra.mxu0 %v1368_v7  ;;  %v2684_v7 = vld [vmem:[#allocation3_spill] sm:$0xff]  ;;  %v2698_v47 = vld [vmem:[#allocation10_spill] sm:$0xff] }
  0x76   : > { %854 = vmatpush1.msra.mxu1 %v1770_v63  ;;  %784 = vmatprep.subr.mxu0 %v1380_v9  ;;  %v2685_v9 = vld [vmem:[#allocation38_spill] sm:$0xff] }
  0x77   : > { %855 = vmatprep.subr.mxu1 %v1782_v55  ;;  %785 = vmatpush1.msra.mxu0 %v1390_v11  ;;  %v2686_v11 = vld [vmem:[#allocation4_spill] sm:$0xff]  ;;  %v2706_v63 = vld [vmem:[#allocation14_spill] sm:$0xff] }
  0x78   : > { %856 = vmatpush1.msra.mxu1 %v1794_v45  ;;  %786 = vmatprep.subr.mxu0 %v1402_v13  ;;  %v2687_v13 = vld [vmem:[#allocation40_spill] sm:$0xff]  ;;  %v2697_v45 = vld [vmem:[#allocation50_spill] sm:$0xff] }
  0x79   : > { %857 = vmatprep.subr.mxu1 %v1806_v43  ;;  %787 = vmatpush1.msra.mxu0 %v1414_v15  ;;  %v2688_v15 = vld [vmem:[#allocation5_spill] sm:$0xff]  ;;  %v2699_v55 = vld [vmem:[#allocation52_spill] sm:$0xff] }
  0x7a   : > { %858 = vmatpush1.msra.mxu1 %v1818_v41  ;;  %788 = vmatprep.subr.mxu0 %v1426_v17  ;;  %v2689_v17 = vld [vmem:[#allocation42_spill] sm:$0xff]  ;;  %v2695_v41 = vld [vmem:[#allocation48_spill] sm:$0xff]  ;;  %v2696_v43 = vld [vmem:[#allocation9_spill] sm:$0xff] }
  0x7b   : > { %859 = vmatprep.subr.mxu1 %v1830_v39  ;;  %789 = vmatpush1.msra.mxu0 %v1438_v19  ;;  %v2690_v19 = vld [vmem:[#allocation6_spill] sm:$0xff]  ;;  %v2694_v39 = vld [vmem:[#allocation8_spill] sm:$0xff] }
  0x7c   : > { %860 = vmatpush1.msra.mxu1 %v1842_v37  ;;  %790 = vmatprep.subr.mxu0 %v1450_v21  ;;  %v2691_v21 = vld [vmem:[#allocation44_spill] sm:$0xff]  ;;  %v2693_v37 = vld [vmem:[#allocation46_spill] sm:$0xff] }
  0x7d   : > { %861 = vmatprep.subr.mxu1 %v2681_v1  ;;  %791 = vmatpush1.msra.mxu0 %v2682_v3  ;;  %v2708_v1 = vld [vmem:[#allocation15_spill] sm:$0xff]  ;;  %v2709_v3 = vld [vmem:[#allocation62_spill] sm:$0xff] }
  0x7e   : > { %862 = vmatpush1.msra.mxu1 %v2683_v5  ;;  %792 = vmatprep.subr.mxu0 %v2684_v7  ;;  %v2710_v5 = vld [vmem:[#allocation16_spill] sm:$0xff] }
  0x7f   : > { %863 = vmatprep.subr.mxu1 %v2685_v9  ;;  %793 = vmatpush1.msra.mxu0 %v2686_v11  ;;  %v2711_v7 = vld [vmem:[#allocation64_spill] sm:$0xff]  ;;  %v2712_v9 = vld [vmem:[#allocation17_spill] sm:$0xff]  ;;  %v2713_v11 = vld [vmem:[#allocation66_spill] sm:$0xff] }
  0x80   : > { %864 = vmatpush1.msra.mxu1 %v2687_v13  ;;  %794 = vmatprep.subr.mxu0 %v2688_v15  ;;  %v2714_v13 = vld [vmem:[#allocation18_spill] sm:$0xff]  ;;  %v2715_v15 = vld [vmem:[#allocation68_spill] sm:$0xff] }
  0x81   : > { %865 = vmatprep.subr.mxu1 %v2689_v17  ;;  %795 = vmatpush1.msra.mxu0 %v2690_v19  ;;  %v2716_v17 = vld [vmem:[#allocation19_spill] sm:$0xff]  ;;  %v2717_v19 = vld [vmem:[#allocation20_spill] sm:$0xff] }
  0x82   : > { %866 = vmatpush1.msra.mxu1 %v2691_v21  ;;  %796 = vmatprep.subr.mxu0 %v2692_v33  ;;  %v2718_v21 = vld [vmem:[#allocation71_spill] sm:$0xff]  ;;  %v2719_v33 = vld [vmem:[#allocation21_spill] sm:$0xff] }
  0x83   : > { %867 = vmatprep.subr.mxu1 %v2693_v37  ;;  %797 = vmatpush1.msra.mxu0 %v2694_v39  ;;  %v2720_v37 = vld [vmem:[#allocation22_spill] sm:$0xff]  ;;  %v2721_v39 = vld [vmem:[#allocation23_spill] sm:$0xff] }
  0x84   : > { %868 = vmatpush1.msra.mxu1 %v2695_v41  ;;  %798 = vmatprep.subr.mxu0 %v2696_v43  ;;  %v2722_v41 = vld [vmem:[#allocation24_spill] sm:$0xff]  ;;  %v2724_v43 = vrot.slane %v2105_v23, 1  ;;  %v2730_v23 = vld [vmem:[#allocation30_spill] sm:$0xff] }
  0x85   : > { %869 = vmatprep.subr.mxu1 %v2697_v45  ;;  %799 = vmatpush1.msra.mxu0 %v2698_v47  ;;  %v2725_v45 = vld [vmem:[#allocation25_spill] sm:$0xff]  ;;  %v2728_v47 = vld [vmem:[#allocation28_spill] sm:$0xff] }
  0x86   : > { %870 = vmatpush1.msra.mxu1 %v2699_v55  ;;  %800 = vmatprep.subr.mxu0 %v2700_v56  ;;  %v2729_v55 = vld [vmem:[#allocation29_spill] sm:$0xff]  ;;  %v2751_v56 = vld [vmem:[#allocation76_spill] sm:$0xff] }
  0x87   : > { %871 = vmatprep.subr.mxu1 %v2701_v58  ;;  %801 = vmatpush1.msra.mxu0 %v2702_v59  ;;  %v2752_v58 = vld [vmem:[#allocation69_spill] sm:$0xff]  ;;  %v2756_v59 = vld [vmem:[#allocation74_spill] sm:$0xff] }
  0x88   : > { %872 = vmatpush1.msra.mxu1 %v2703_v60  ;;  %802 = vmatprep.subr.mxu0 %v2704_v61 }
  0x89   : > { %873 = vmatprep.subr.mxu1 %v2705_v62  ;;  %803 = vmatpush1.msra.mxu0 %v2706_v63 }
  0x8a   : > { %874 = vmatpush1.msra.mxu1 %v2707_v54  ;;  %804 = vmatprep.subr.mxu0 %v2708_v1 }
  0x8b   : > { %875 = vmatprep.subr.mxu1 %v2709_v3  ;;  %805 = vmatpush1.msra.mxu0 %v2710_v5 }
  0x8c   : > { %876 = vmatpush1.msra.mxu1 %v2711_v7  ;;  %806 = vmatprep.subr.mxu0 %v2712_v9 }
  0x8d   : > { %877 = vmatprep.subr.mxu1 %v2713_v11  ;;  %807 = vmatpush1.msra.mxu0 %v2714_v13 }
  0x8e   : > { %878 = vmatpush1.msra.mxu1 %v2715_v15  ;;  %808 = vmatprep.subr.mxu0 %v2716_v17 }
  0x8f   : > { %879 = vmatprep.subr.mxu1 %v2070_v31  ;;  %809 = vmatpush1.msra.mxu0 %v2717_v19  ;;  %v2723_v31 = vld [vmem:[#allocation75_spill] sm:$0xff] }
  0x90   : > { %880 = vmatpush1.msra.mxu1 %v2718_v21  ;;  %810 = vmatprep.subr.mxu0 %v2719_v33 }
  0x91   : > { %881 = vmatprep.subr.mxu1 %v2097_v27  ;;  %811 = vmatpush1.msra.mxu0 %v2720_v37  ;;  %v2726_v27 = vld [vmem:[#allocation26_spill] sm:$0xff] }
  0x92   : > { %844 = vmatprep.mubr.f32.mxu0 %v2676_v49  ;;  %882 = vmatpush1.msra.mxu1 %v2112_v57  ;;  %v2727_v57 = vld [vmem:[#allocation27_spill] sm:$0xff] }
  0x93   : > { %845 = vmatmul.mubr.f32.vlgmr.msra.gmra.mxu0 %v2721_v39  ;;  %915 = vmatprep.mubr.f32.mxu1 %v2676_v49 }
  0x94   : > { %924 = vmatprep.subr.mxu0 %v2722_v41  ;;  %1001 = vmatprep.subr.mxu1 %v2723_v31 }
  0x95   : > { %916 = vmatmul.mubr.f32.vlgmr.msra.gmra.mxu1 %v2724_v43  ;;  %925 = vmatpush1.msra.mxu0 %v2725_v45 }
  0x96   : > { %1002 = vmatpush1.msra.mxu1 %v2138_v53  ;;  %926 = vmatprep.subr.mxu0 %v2726_v27  ;;  %v2731_v53 = vld [vmem:[#allocation31_spill] sm:$0xff] }
  0x97   : > { %1003 = vmatprep.subr.mxu1 %v2145_v25  ;;  %927 = vmatpush1.msra.mxu0 %v2727_v57  ;;  %v2732_v25 = vld [vmem:[#allocation32_spill] sm:$0xff] }
  0x98   : > { %1004 = vmatpush1.msra.mxu1 %v2153_v29  ;;  %928 = vmatprep.subr.mxu0 %v2728_v47  ;;  %v2733_v29 = vld [vmem:[#allocation33_spill] sm:$0xff] }
  0x99   : > { %1005 = vmatprep.subr.mxu1 %v2160_v51  ;;  %929 = vmatpush1.msra.mxu0 %v2729_v55  ;;  %v2734_v51 = vld [vmem:[#allocation35_spill] sm:$0xff] }
  0x9a   : > { %1006 = vmatpush1.msra.mxu1 %v2167_v0  ;;  %930 = vmatprep.subr.mxu0 %v2730_v23  ;;  %v2735_v0 = vld [vmem:[#allocation37_spill] sm:$0xff] }
  0x9b   : > { %1007 = vmatprep.subr.mxu1 %v2174_v2  ;;  %931 = vmatpush1.msra.mxu0 %v2731_v53  ;;  %v2736_v2 = vld [vmem:[#allocation39_spill] sm:$0xff] }
  0x9c   : > { %1008 = vmatpush1.msra.mxu1 %v2181_v4  ;;  %932 = vmatprep.subr.mxu0 %v2732_v25  ;;  %v2737_v4 = vld [vmem:[#allocation41_spill] sm:$0xff] }
  0x9d   : > { %1009 = vmatprep.subr.mxu1 %v2188_v6  ;;  %933 = vmatpush1.msra.mxu0 %v2733_v29  ;;  %v2738_v6 = vld [vmem:[#allocation43_spill] sm:$0xff]  ;;  %v1276_v29 = vld [vmem:[%s2522_s2] ss:$0 sm:$0xff] }
  0x9e   : > { %1010 = vmatpush1.msra.mxu1 %v2195_v8  ;;  %934 = vmatprep.subr.mxu0 %v2734_v51  ;;  %v2739_v8 = vld [vmem:[#allocation45_spill] sm:$0xff] }
  0x9f   : > { %1011 = vmatprep.subr.mxu1 %v2202_v10  ;;  %935 = vmatpush1.msra.mxu0 %v2735_v0  ;;  %v2740_v10 = vld [vmem:[#allocation47_spill] sm:$0xff] }
  0xa0   : > { %1012 = vmatpush1.msra.mxu1 %v2209_v12  ;;  %936 = vmatprep.subr.mxu0 %v2736_v2  ;;  %v2741_v12 = vld [vmem:[#allocation49_spill] sm:$0xff] }
  0xa1   : > { %1013 = vmatprep.subr.mxu1 %v2216_v14  ;;  %937 = vmatpush1.msra.mxu0 %v2737_v4  ;;  %v2742_v14 = vld [vmem:[#allocation51_spill] sm:$0xff] }
  0xa2   : > { %1014 = vmatpush1.msra.mxu1 %v2223_v16  ;;  %938 = vmatprep.subr.mxu0 %v2738_v6  ;;  %v2743_v16 = vld [vmem:[#allocation53_spill] sm:$0xff] }
  0xa3   : > { %1015 = vmatprep.subr.mxu1 %v2230_v18  ;;  %939 = vmatpush1.msra.mxu0 %v2739_v8  ;;  %v2744_v18 = vld [vmem:[#allocation55_spill] sm:$0xff] }
  0xa4   : > { %1016 = vmatpush1.msra.mxu1 %v2237_v20  ;;  %940 = vmatprep.subr.mxu0 %v2740_v10  ;;  %v2745_v20 = vld [vmem:[#allocation57_spill] sm:$0xff] }
  0xa5   : > { %1017 = vmatprep.subr.mxu1 %v2244_v22  ;;  %941 = vmatpush1.msra.mxu0 %v2741_v12  ;;  %v2746_v22 = vld [vmem:[#allocation59_spill] sm:$0xff] }
  0xa6   : > { %1018 = vmatpush1.msra.mxu1 %v2251_v24  ;;  %942 = vmatprep.subr.mxu0 %v2742_v14  ;;  %v2747_v24 = vld [vmem:[#allocation61_spill] sm:$0xff] }
  0xa7   : > { %1019 = vmatprep.subr.mxu1 %v2258_v26  ;;  %943 = vmatpush1.msra.mxu0 %v2743_v16  ;;  %v2748_v26 = vld [vmem:[#allocation63_spill] sm:$0xff] }
  0xa8   : > { %1020 = vmatpush1.msra.mxu1 %v2265_v28  ;;  %944 = vmatprep.subr.mxu0 %v2744_v18  ;;  %v2749_v28 = vld [vmem:[#allocation65_spill] sm:$0xff] }
  0xa9   : > { %1021 = vmatprep.subr.mxu1 %v2272_v30  ;;  %945 = vmatpush1.msra.mxu0 %v2745_v20  ;;  %v2750_v30 = vld [vmem:[#allocation67_spill] sm:$0xff] }
  0xaa   : > { %1022 = vmatpush1.msra.mxu1 %v2279_v32  ;;  %946 = vmatprep.subr.mxu0 %v2746_v22  ;;  %v997_v32 = vld [vmem:[%s1708_s17 + $0x8] sm:$0xfc]  ;;  %s1147_s17 = sshll.u32 %s2758_s13, 3 }
  0xab   : > { %1023 = vmatprep.subr.mxu1 %v2286_v34  ;;  %947 = vmatpush1.msra.mxu0 %v2747_v24  ;;  %v2753_v34 = vld [vmem:[#allocation70_spill] sm:$0xff]  ;;  %s2509_s24 = scalar_lea.vmem %s2523_s3, %s1147_s17 }
  0xac   : > { %1024 = vmatpush1.msra.mxu1 %v2293_v35  ;;  %948 = vmatprep.subr.mxu0 %v2748_v26  ;;  %v2754_v35 = vld [vmem:[#allocation72_spill] sm:$0xff]  ;;  %1086 = vst [vmem:[%s2509_s24 + $0x6] sm:$0x3] %v2676_v49 }
  0xad   : > { %1025 = vmatprep.subr.mxu1 %v2300_v36  ;;  %949 = vmatpush1.msra.mxu0 %v2749_v28  ;;  %v999_v36 = vrot.slane %v997_v32, 2 }
  0xae   : > { %1026 = vmatpush1.msra.mxu1 %v2307_v38  ;;  %950 = vmatprep.subr.mxu0 %v2750_v30  ;;  %v2755_v38 = vld [vmem:[#allocation73_spill] sm:$0xff] }
  0xaf   : > { %1027 = vmatprep.subr.mxu1 %v2751_v56  ;;  %951 = vmatpush1.msra.mxu0 %v2752_v58 }
  0xb0   : > { %1028 = vmatpush1.msra.mxu1 %v2321_v42  ;;  %952 = vmatprep.subr.mxu0 %v2753_v34 }
  0xb1   : > { %1029 = vmatprep.subr.mxu1 %v2328_v44  ;;  %953 = vmatpush1.msra.mxu0 %v2754_v35 }
  0xb2   : > { %1030 = vmatpush1.msra.mxu1 %v2338_v48  ;;  %954 = vmatprep.subr.mxu0 %v2755_v38 }
  0xb3   : > { %1031 = vmatprep.subr.mxu1 %v2345_v50  ;;  %955 = vmatpush1.msra.mxu0 %v2756_v59 }
  0xb4   : > { %988 = vmatprep.mubr.f32.mxu0 %v2676_v49  ;;  %1032 = vmatpush1.msra.mxu1 %v2352_v52 }
  0xb5   : > { %1065 = vmatprep.mubr.f32.mxu1 %v2676_v49  ;;  %989 = vmatmul.mubr.f32.vlgmr.msra.gmra.mxu0 %v633_v40 }
  0xb6   : > { %1066 = vmatmul.mubr.f32.vlgmr.msra.gmra.mxu1 %v999_v36 }
  0xed   : > { %v302_v42 = vpop.f32.mrf.mxu0 }
  0xee   : > { %v373_v44 = vpop.f32.mrf.mxu1 }
  0xef   : > { %v304_v48 = vpop.f32.mrf.mxu0  ;;  %v374_v11 = vadd.f32 %v373_v44, %v302_v42 }
  0xf0   : > { %v375_v52 = vpop.f32.mrf.mxu1 }
  0xf1   : > { %v376_v7 = vadd.f32 %v375_v52, %v304_v48 }
 0x10f   : > { %v481_v50 = vpop.f32.mrf.mxu0 }
 0x110   : > { %v486_v17 = vadd.f32 %v481_v50, %v374_v11 }
 0x111   : > { %v591_v60 = vpop.f32.mrf.mxu1  ;;  %v483_v61 = vpop.f32.mrf.mxu0 }
 0x112   : > { %v487_v13 = vadd.f32 %v483_v61, %v376_v7  ;;  %v596_v43 = vadd.f32 %v591_v60, %v486_v17 }
 0x113   : > { %v593_v46 = vpop.f32.mrf.mxu1 }
 0x114   : > { %v597_v37 = vadd.f32 %v593_v46, %v487_v13 }
 0x131   : > { %v701_v62 = vpop.f32.mrf.mxu0 }
 0x132   : > { %v706_v47 = vadd.f32 %v701_v62, %v596_v43 }
 0x133   : > { %v775_v40 = vpop.f32.mrf.mxu1  ;;  %v703_v63 = vpop.f32.mrf.mxu0 }
 0x134   : > { %v707_v45 = vadd.f32 %v703_v63, %v597_v37 }
 0x135   : > { %v777_v1 = vpop.f32.mrf.mxu1 }
 0x136   : > { %v708_v53 = vmax.f32 %v706_v47, %v707_v45 }
 0x153   : > { %v846_v54 = vpop.f32.mrf.mxu0 }
 0x154   : > { %v847_v9 = vadd.f32 %v846_v54, %v775_v40 }
 0x155   : > { %v917_v3 = vpop.f32.mrf.mxu1  ;;  %v848_v5 = vpop.f32.mrf.mxu0 }
 0x156   : > { %v849_v49 = vadd.f32 %v848_v5, %v777_v1  ;;  %v922_v19 = vadd.f32 %v917_v3, %v847_v9 }
 0x157   : > { %v919_v15 = vpop.f32.mrf.mxu1 }
 0x158   : > { %v923_v39 = vadd.f32 %v919_v15, %v849_v49 }
 0x175   : > { %v990_v21 = vpop.f32.mrf.mxu0 }
 0x176   : > { %v1067_v33 = vpop.f32.mrf.mxu1  ;;  %v995_v41 = vadd.f32 %v990_v21, %v922_v19 }
 0x177   : > { %v992_v31 = vpop.f32.mrf.mxu0 }
 0x178   : > { %v996_v27 = vadd.f32 %v992_v31, %v923_v39  ;;  %v1069_v57 = vpop.f32.mrf.mxu1  ;;  %v1072_v55 = vadd.f32 %v1067_v33, %v995_v41 }
 0x17a   : > { %v1073_v23 = vadd.f32 %v1069_v57, %v996_v27 }
 0x17c   : > { %v1074_v25 = vmax.f32 %v1072_v55, %v1073_v23 }
 0x17e   : > { %v1075_v51 = vmax.f32 %v708_v53, %v1074_v25 }
 0x180   : > { %v1083_v0 = vadd.f32 %v1276_v29, %v1075_v51 }
 0x182   : > { %v1084_v2 = vmax.f32 %v1083_v0, 0.0 }
 0x184   : > { %1085 = vst [vmem:[%s2509_s24] sm:$0x3f] %v1084_v2 }
 0x185 PF: > { %s13_s12 = sadd.s32 1, %s1295_s12  }
 0x186   : > { %p10_p4 = scmp.ge.s32.totalorder %s13_s12, 4  }
 0x188   :  { %12 = sbr.rel (!%p10_p4) target bundleno = 1 (0x1), region = 66 }

// kernel: cnn_forward.3
= control target key start
LH: loop header
LB: loop body
LE: loop exit
PB: predicated region body
PF: predicated region fallthrough
CT: control target
= control target key end

     0   :  { %8 = vsyncpa [#allocation3], 0  ;;  %s2245_s0 = inlined_call_operand.vmem [shape: f32[32,256], index: 0, kind: input, shape index: {}]   ;;  %s2246_s1 = inlined_call_operand.hbm [shape: f32[5,128,256], index: 1, kind: input, shape index: {}]   ;;  %s2247_s2 = inlined_call_operand.hbm [shape: f32[1,128], index: 2, kind: input, shape index: {}]   ;;  %s2248_s3 = inlined_call_operand.vmem [shape: f32[32,128], index: 3, kind: output, shape index: {}]  }
   0x1   :  { %9 = vsyncpa [#allocation5], 0  ;;  %s1446_s12 = smov 0  }
   0x2 LB: > { %s1303_s13 = sadd.s32 4294967295, %s1419_s12   ;;  %p1305_p0 = scmp.ge.s32.totalorder %s1419_s12, 1  ;;  %s1419_s12 = sphi %s1446_s12, %s15_s12  }
   0x3   : > { %p114_p1 = scmp.lt.s32.totalorder %s1419_s12, 3  ;;  %s1421_s14 = smov [#allocation2]  }
   0x4   : > { %s126_s15 = sshll.u32 %s1421_s14, 4  ;;  %p1460_p3 = scmp.eq.s32.totalorder %s1303_s13, 0  ;;  %s127_s15 = int_to_ptr.vmem [resolvable:$true] %s126_s15 }
   0x5   : > { %p1454_p2 = pnand %p1305_p0, %p114_p1  ;;  %s1422_s18 = smov [#allocation4]  }
   0x6   : > { %s140_s19 = sshll.u32 %s1422_s18, 4  ;;  %s1364_s21 = scalar_lea.vmem %s127_s15, 20480  ;;  %s141_s19 = int_to_ptr.vmem [resolvable:$true] %s140_s19 }
   0x7   : > { %p1329_p4 = pneg %p1454_p2  ;;  %p1365_p7 = scmp.ne.s32.totalorder %s127_s15, %s1364_s21 }
   0x8   : > { %p1372_p10 = scmp.lt.s32.totalorder %s127_s15, %s127_s15  ;;  %p1373_p11 = scmp.lt.s32.totalorder %s1364_s21, %s1364_s21 }
   0x9   : > { %p1468_p5 = pnand %p1460_p3, %p1329_p4 }
   0xa   : > { %p1374_p12 = por %p1373_p11, %p1372_p10 }
   0xb   : > { %p1355_p6 = pneg %p1468_p5 }
   0xd   : > { %p1367_p8 = pnand %p1365_p7, %p1355_p6 }
   0xf   : > { %p1368_p9 = pneg %p1367_p8 }
  0x11   : > { %p1375_p13 = pnand %p1374_p12, %p1368_p9 }
  0x13   : > { %1378 = shalt.err (!%p1375_p13)
}
  0x14   : > { %s1423_s22 = smov 256   ;;  %s1424_s23 = smov 16  }
  0x15   : > { %1332 = dma.hbm_to_vmem [thread:$0]  (!%p1468_p5), %s2246_s1, 20480, %s127_s15, [#allocation3], %s1423_s22, %s1423_s22, %s1424_s23  }
  0x16   : > { %s1390_s26 = scalar_lea.vmem %s141_s19, 16  ;;  %s1397_s27 = scalar_lea.vmem %s141_s19, 32 }
  0x17   : > { %p1391_p0 = scmp.ne.s32.totalorder %s141_s19, %s1390_s26  ;;  %p1398_p7 = scmp.lt.s32.totalorder %s141_s19, %s141_s19 }
  0x18   : > { %p1399_p8 = scmp.lt.s32.totalorder %s1397_s27, %s1390_s26 }
  0x19   : > { %p1393_p1 = pnand %p1391_p0, %p1355_p6 }
  0x1a   : > { %p1400_p9 = por %p1399_p8, %p1398_p7 }
  0x1b   : > { %p1394_p4 = pneg %p1393_p1 }
  0x1d   : > { %p1401_p10 = pnand %p1400_p9, %p1394_p4 }
  0x1f   : > { %1404 = shalt.err (!%p1401_p10)
}
  0x20   : > { %1335 = dma.hbm_to_vmem [thread:$0]  (!%p1468_p5), %s2247_s2, 16, %s141_s19, [#allocation5]  }
  0x21   : > { %163 = sbr.rel (%p1454_p2) target bundleno = 431 (0x1af), region = 32 }
  0x26   : > { %1410 = dma.done.wait (%p1460_p3), [#allocation3], 20480  }
  0x27   : > { %1412 = vsyncadd (%p1460_p3), [#allocation3], 4294946816 }
  0x28   : > { %1414 = dma.done.wait (%p1460_p3), [#allocation5], 16  }
  0x29   : > { %1416 = vsyncadd (%p1460_p3), [#allocation5], 4294967280  ;;  %v2249_v0 = vmov 0.0   ;;  %v1502_v1 = vld [vmem:[#allocation2 + $0x1f8] sm:$0xff]  ;;  %v1506_v3 = vld [vmem:[#allocation2 + $0x1f0] sm:$0xff]  ;;  %s1594_s30 = sshll.u32 %s1303_s13, 1 }
  0x2a   : > { %338 = vmatprep.mubr.f32.mxu0 %v2249_v0  ;;  %415 = vmatprep.mubr.f32.mxu1 %v2249_v0  ;;  %v1504_v2 = vld [vmem:[#allocation2 + $0xf8] sm:$0xff]  ;;  %v1510_v4 = vld [vmem:[#allocation2 + $0xf0] sm:$0xff]  ;;  %v1512_v5 = vld [vmem:[#allocation2 + $0x1e8] sm:$0xff]  ;;  %p193_p2 = scmp.lt.s32.totalorder %s1594_s30, 3  ;;  %vm712_vm0 = vcmask 1045504   ;;  %vm465_vm1 = vcmask 1046528  }
  0x2b   : > { %274 = vmatprep.subr.mxu0 %v1502_v1  ;;  %351 = vmatprep.subr.mxu1 %v1504_v2  ;;  %v1514_v6 = vld [vmem:[#allocation2 + $0xe8] sm:$0xff]  ;;  %v1518_v7 = vld [vmem:[#allocation2 + $0x1e0] sm:$0xff]  ;;  %v1522_v9 = vld [vmem:[#allocation2 + $0x1d8] sm:$0xff] }
  0x2c   : > { %275 = vmatpush1.msra.mxu0 %v1506_v3  ;;  %352 = vmatpush1.msra.mxu1 %v1510_v4  ;;  %v1520_v8 = vld [vmem:[#allocation2 + $0xe0] sm:$0xff]  ;;  %v1526_v10 = vld [vmem:[#allocation2 + $0xd8] sm:$0xff]  ;;  %v1528_v11 = vld [vmem:[#allocation2 + $0x1d0] sm:$0xff]  ;;  %s2506_s30 = smov (!%p193_p2, %s1594_s30), 3 }
  0x2d   : > { %276 = vmatprep.subr.mxu0 %v1512_v5  ;;  %353 = vmatprep.subr.mxu1 %v1514_v6  ;;  %v1530_v12 = vld [vmem:[#allocation2 + $0xd0] sm:$0xff]  ;;  %v1534_v13 = vld [vmem:[#allocation2 + $0x1c8] sm:$0xff]  ;;  %v1540_v15 = vld [vmem:[#allocation2 + $0x1c0] sm:$0xff]  ;;  %s1320_s4 = sshll.u32 %s2506_s30, 4  ;;  %s1316_s8 = sshll.u32 %s2506_s30, 3 }
  0x2e   : > { %277 = vmatpush1.msra.mxu0 %v1518_v7  ;;  %354 = vmatpush1.msra.mxu1 %v1520_v8  ;;  %v1536_v14 = vld [vmem:[#allocation2 + $0xc8] sm:$0xff]  ;;  %v1542_v16 = vld [vmem:[#allocation2 + $0xc0] sm:$0xff]  ;;  %v1546_v17 = vld [vmem:[#allocation2 + $0x1b8] sm:$0xff]  ;;  %s1690_s7 = scalar_lea.vmem %s2245_s0, %s1320_s4  ;;  %s203_s11 = scalar_lea.vmem %s2248_s3, %s1316_s8 }
  0x2f   : > { %2337 = vst [vmem:[#allocation8_spill] sm:$0xff] %v1536_v14  ;;  %278 = vmatprep.subr.mxu0 %v1522_v9  ;;  %355 = vmatprep.subr.mxu1 %v1526_v10  ;;  %2338 = vst [vmem:[#allocation9_spill] sm:$0xff] %v1542_v16  ;;  %v1548_v18 = vld [vmem:[#allocation2 + $0xb8] sm:$0xff]  ;;  %v1552_v19 = vld [vmem:[#allocation2 + $0x1b0] sm:$0xff] }
  0x30   : > { %279 = vmatpush1.msra.mxu0 %v1528_v11  ;;  %356 = vmatpush1.msra.mxu1 %v1530_v12  ;;  %2339 = vst [vmem:[#allocation10_spill] sm:$0xff] %v1548_v18  ;;  %v1554_v20 = vld [vmem:[#allocation2 + $0xb0] sm:$0xff]  ;;  %v1558_v21 = vld [vmem:[#allocation2 + $0x1a8] sm:$0xff]  ;;  %v1564_v23 = vld [vmem:[#allocation2 + $0x1a0] sm:$0xff] }
  0x31   : > { %280 = vmatprep.subr.mxu0 %v1534_v13  ;;  %357 = vmatprep.subr.mxu1 %v1536_v14  ;;  %2340 = vst [vmem:[#allocation11_spill] sm:$0xff] %v1554_v20  ;;  %v1560_v22 = vld [vmem:[#allocation2 + $0xa8] sm:$0xff]  ;;  %v1566_v24 = vld [vmem:[#allocation2 + $0xa0] sm:$0xff]  ;;  %v1570_v25 = vld [vmem:[#allocation2 + $0x198] sm:$0xff] }
  0x32   : > { %281 = vmatpush1.msra.mxu0 %v1540_v15  ;;  %358 = vmatpush1.msra.mxu1 %v1542_v16  ;;  %2341 = vst [vmem:[#allocation12_spill] sm:$0xff] %v1560_v22  ;;  %2342 = vst [vmem:[#allocation13_spill] sm:$0xff] %v1566_v24  ;;  %v1572_v26 = vld [vmem:[#allocation2 + $0x98] sm:$0xff]  ;;  %v1576_v27 = vld [vmem:[#allocation2 + $0x190] sm:$0xff] }
  0x33   : > { %282 = vmatprep.subr.mxu0 %v1546_v17  ;;  %359 = vmatprep.subr.mxu1 %v1548_v18  ;;  %2343 = vst [vmem:[#allocation14_spill] sm:$0xff] %v1572_v26  ;;  %v1578_v28 = vld [vmem:[#allocation2 + $0x90] sm:$0xff]  ;;  %v1582_v29 = vld [vmem:[#allocation2 + $0x188] sm:$0xff]  ;;  %v1588_v31 = vld [vmem:[#allocation2 + $0x180] sm:$0xff]  ;;  %v2412_v18 = vmov 0.0  }
  0x34   : > { %283 = vmatpush1.msra.mxu0 %v1552_v19  ;;  %360 = vmatpush1.msra.mxu1 %v1554_v20  ;;  %2344 = vst [vmem:[#allocation15_spill] sm:$0xff] %v1578_v28  ;;  %v1584_v30 = vld [vmem:[#allocation2 + $0x88] sm:$0xff]  ;;  %v1590_v32 = vld [vmem:[#allocation2 + $0x80] sm:$0xff]  ;;  %v1598_v33 = vld [vmem:[#allocation2 + $0x178] sm:$0xff] }
  0x35   : > { %284 = vmatprep.subr.mxu0 %v1558_v21  ;;  %361 = vmatprep.subr.mxu1 %v1560_v22  ;;  %2345 = vst [vmem:[#allocation16_spill] sm:$0xff] %v1584_v30  ;;  %2346 = vst [vmem:[#allocation17_spill] sm:$0xff] %v1590_v32  ;;  %v1600_v34 = vld [vmem:[#allocation2 + $0x78] sm:$0xff]  ;;  %v1604_v35 = vld [vmem:[#allocation2 + $0x170] sm:$0xff] }
  0x36   : > { %285 = vmatpush1.msra.mxu0 %v1564_v23  ;;  %362 = vmatpush1.msra.mxu1 %v1566_v24  ;;  %2347 = vst [vmem:[#allocation18_spill] sm:$0xff] %v1600_v34  ;;  %v1606_v36 = vld [vmem:[#allocation2 + $0x70] sm:$0xff]  ;;  %v1610_v37 = vld [vmem:[#allocation2 + $0x168] sm:$0xff]  ;;  %v1617_v39 = vld [vmem:[#allocation2 + $0x160] sm:$0xff] }
  0x37   : > { %286 = vmatprep.subr.mxu0 %v1570_v25  ;;  %363 = vmatprep.subr.mxu1 %v1572_v26  ;;  %2348 = vst [vmem:[#allocation19_spill] sm:$0xff] %v1606_v36  ;;  %v1612_v38 = vld [vmem:[#allocation2 + $0x68] sm:$0xff]  ;;  %v1619_v40 = vld [vmem:[#allocation2 + $0x60] sm:$0xff]  ;;  %v1623_v41 = vld [vmem:[#allocation2 + $0x158] sm:$0xff] }
  0x38   : > { %287 = vmatpush1.msra.mxu0 %v1576_v27  ;;  %364 = vmatpush1.msra.mxu1 %v1578_v28  ;;  %2349 = vst [vmem:[#allocation20_spill] sm:$0xff] %v1612_v38  ;;  %2350 = vst [vmem:[#allocation21_spill] sm:$0xff] %v1619_v40  ;;  %v1625_v42 = vld [vmem:[#allocation2 + $0x58] sm:$0xff]  ;;  %v1629_v43 = vld [vmem:[#allocation2 + $0x150] sm:$0xff] }
  0x39   : > { %288 = vmatprep.subr.mxu0 %v1582_v29  ;;  %365 = vmatprep.subr.mxu1 %v1584_v30  ;;  %2351 = vst [vmem:[#allocation22_spill] sm:$0xff] %v1625_v42  ;;  %v1631_v44 = vld [vmem:[#allocation2 + $0x50] sm:$0xff]  ;;  %v1635_v45 = vld [vmem:[#allocation2 + $0x148] sm:$0xff]  ;;  %v1646_v47 = vld [vmem:[#allocation2 + $0x140] sm:$0xff] }
  0x3a   : > { %289 = vmatpush1.msra.mxu0 %v1588_v31  ;;  %366 = vmatpush1.msra.mxu1 %v1590_v32  ;;  %2352 = vst [vmem:[#allocation23_spill] sm:$0xff] %v1631_v44  ;;  %v1637_v46 = vld [vmem:[#allocation2 + $0x48] sm:$0xff]  ;;  %v1648_v48 = vld [vmem:[#allocation2 + $0x40] sm:$0xff]  ;;  %v1652_v49 = vld [vmem:[#allocation2 + $0x138] sm:$0xff] }
  0x3b   : > { %290 = vmatprep.subr.mxu0 %v1598_v33  ;;  %367 = vmatprep.subr.mxu1 %v1600_v34  ;;  %2353 = vst [vmem:[#allocation24_spill] sm:$0xff] %v1637_v46  ;;  %2354 = vst [vmem:[#allocation25_spill] sm:$0xff] %v1648_v48  ;;  %v1654_v50 = vld [vmem:[#allocation2 + $0x38] sm:$0xff]  ;;  %v1658_v51 = vld [vmem:[#allocation2 + $0x130] sm:$0xff] }
  0x3c   : > { %291 = vmatpush1.msra.mxu0 %v1604_v35  ;;  %368 = vmatpush1.msra.mxu1 %v1606_v36  ;;  %2355 = vst [vmem:[#allocation26_spill] sm:$0xff] %v1654_v50  ;;  %v1660_v52 = vld [vmem:[#allocation2 + $0x30] sm:$0xff]  ;;  %v1664_v53 = vld [vmem:[#allocation2 + $0x128] sm:$0xff]  ;;  %v1671_v55 = vld [vmem:[#allocation2 + $0x120] sm:$0xff] }
  0x3d   : > { %292 = vmatprep.subr.mxu0 %v1610_v37  ;;  %369 = vmatprep.subr.mxu1 %v1612_v38  ;;  %2356 = vst [vmem:[#allocation27_spill] sm:$0xff] %v1660_v52  ;;  %v1666_v54 = vld [vmem:[#allocation2 + $0x28] sm:$0xff]  ;;  %v1673_v56 = vld [vmem:[#allocation2 + $0x20] sm:$0xff]  ;;  %v1677_v57 = vld [vmem:[#allocation2 + $0x118] sm:$0xff] }
  0x3e   : > { %293 = vmatpush1.msra.mxu0 %v1617_v39  ;;  %370 = vmatpush1.msra.mxu1 %v1619_v40  ;;  %2357 = vst [vmem:[#allocation28_spill] sm:$0xff] %v1666_v54  ;;  %2358 = vst [vmem:[#allocation29_spill] sm:$0xff] %v1673_v56  ;;  %v1679_v58 = vld [vmem:[#allocation2 + $0x18] sm:$0xff]  ;;  %v1683_v59 = vld [vmem:[#allocation2 + $0x110] sm:$0xff] }
  0x3f   : > { %294 = vmatprep.subr.mxu0 %v1623_v41  ;;  %371 = vmatprep.subr.mxu1 %v1625_v42  ;;  %2359 = vst [vmem:[#allocation30_spill] sm:$0xff] %v1679_v58  ;;  %v1685_v60 = vld [vmem:[#allocation2 + $0x10] sm:$0xff]  ;;  %v1694_v61 = vld [vmem:[#allocation2 + $0x108] sm:$0xff]  ;;  %v1700_v63 = vld [vmem:[#allocation2 + $0x100] sm:$0xff] }
  0x40   : > { %295 = vmatpush1.msra.mxu0 %v1629_v43  ;;  %372 = vmatpush1.msra.mxu1 %v1631_v44  ;;  %2360 = vst [vmem:[#allocation31_spill] sm:$0xff] %v1685_v60  ;;  %v1696_v62 = vld [vmem:[#allocation2 + $0x8] sm:$0xff]  ;;  %v1702_v0 = vld [vmem:[#allocation2] sm:$0xff]  ;;  %v1743_v42 = vld [vmem:[#allocation2 + $0x3d0] sm:$0xff] }
  0x41   : > { %296 = vmatprep.subr.mxu0 %v1635_v45  ;;  %373 = vmatprep.subr.mxu1 %v1637_v46  ;;  %2361 = vst [vmem:[#allocation32_spill] sm:$0xff] %v1696_v62  ;;  %2362 = vst [vmem:[#allocation33_spill] sm:$0xff] %v1702_v0  ;;  %v1725_v46 = vld [vmem:[#allocation2 + $0x3e8] sm:$0xff]  ;;  %v1731_v44 = vld [vmem:[#allocation2 + $0x3e0] sm:$0xff] }
  0x42   : > { %297 = vmatpush1.msra.mxu0 %v1646_v47  ;;  %374 = vmatpush1.msra.mxu1 %v1648_v48  ;;  %v1720_v48 = vld [vmem:[#allocation2 + $0x3f0] sm:$0xff]  ;;  %2366 = vst [vmem:[#allocation37_spill] sm:$0xff] %v1725_v46  ;;  %2367 = vst [vmem:[#allocation38_spill] sm:$0xff] %v1731_v44  ;;  %v1749_v40 = vld [vmem:[#allocation2 + $0x3c8] sm:$0xff] }
  0x43   : > { %298 = vmatprep.subr.mxu0 %v1652_v49  ;;  %375 = vmatprep.subr.mxu1 %v1654_v50  ;;  %v1714_v50 = vld [vmem:[#allocation2 + $0x3f8] sm:$0xff]  ;;  %2365 = vst [vmem:[#allocation36_spill] sm:$0xff] %v1720_v48  ;;  %2369 = vst [vmem:[#allocation40_spill] sm:$0xff] %v1743_v42  ;;  %v1755_v38 = vld [vmem:[#allocation2 + $0x3c0] sm:$0xff] }
  0x44   : > { %299 = vmatpush1.msra.mxu0 %v1658_v51  ;;  %376 = vmatpush1.msra.mxu1 %v1660_v52  ;;  %v205_v52 = vld [vmem:[%s1690_s7] sm:$0xff]  ;;  %2364 = vst [vmem:[#allocation35_spill] sm:$0xff] %v1714_v50  ;;  %2371 = vst [vmem:[#allocation42_spill] sm:$0xff] %v1749_v40  ;;  %v1761_v36 = vld [vmem:[#allocation2 + $0x3b8] sm:$0xff] }
  0x45   : > { %300 = vmatprep.subr.mxu0 %v1664_v53  ;;  %377 = vmatprep.subr.mxu1 %v1666_v54  ;;  %v1707_v54 = vld [vmem:[%s1690_s7 + $0x8] sm:$0xff]  ;;  %2373 = vst [vmem:[#allocation44_spill] sm:$0xff] %v1755_v38  ;;  %2375 = vst [vmem:[#allocation46_spill] sm:$0xff] %v1761_v36  ;;  %v1767_v34 = vld [vmem:[#allocation2 + $0x3b0] sm:$0xff] }
  0x46   : > { %301 = vmatpush1.msra.mxu0 %v1671_v55  ;;  %378 = vmatpush1.msra.mxu1 %v1673_v56  ;;  %2363 = vst [vmem:[#allocation34_spill] sm:$0xff] %v1707_v54  ;;  %v1712_v56 = vld [vmem:[#allocation2 + $0x2f8] sm:$0xff]  ;;  %2377 = vst [vmem:[#allocation48_spill] sm:$0xff] %v1767_v34  ;;  %v1773_v32 = vld [vmem:[#allocation2 + $0x3a8] sm:$0xff] }
  0x47   : > { %302 = vmatprep.subr.mxu0 %v1677_v57  ;;  %379 = vmatprep.subr.mxu1 %v1679_v58  ;;  %v1718_v58 = vld [vmem:[#allocation2 + $0x2f0] sm:$0xff]  ;;  %2379 = vst [vmem:[#allocation50_spill] sm:$0xff] %v1773_v32  ;;  %v1779_v30 = vld [vmem:[#allocation2 + $0x3a0] sm:$0xff]  ;;  %v1785_v28 = vld [vmem:[#allocation2 + $0x398] sm:$0xff] }
  0x48   : > { %303 = vmatpush1.msra.mxu0 %v1683_v59  ;;  %380 = vmatpush1.msra.mxu1 %v1685_v60  ;;  %v1723_v60 = vld [vmem:[#allocation2 + $0x2e8] sm:$0xff]  ;;  %2381 = vst [vmem:[#allocation52_spill] sm:$0xff] %v1779_v30  ;;  %2383 = vst [vmem:[#allocation54_spill] sm:$0xff] %v1785_v28  ;;  %v1791_v26 = vld [vmem:[#allocation2 + $0x390] sm:$0xff] }
  0x49   : > { %304 = vmatprep.subr.mxu0 %v1694_v61  ;;  %381 = vmatprep.subr.mxu1 %v1696_v62  ;;  %v1729_v62 = vld [vmem:[#allocation2 + $0x2e0] sm:$0xff]  ;;  %2385 = vst [vmem:[#allocation56_spill] sm:$0xff] %v1791_v26  ;;  %v1797_v24 = vld [vmem:[#allocation2 + $0x388] sm:$0xff]  ;;  %v1873_v22 = vld [vmem:[%s1690_s7 + $0x18] sm:$0xff] }
  0x4a   : > { %305 = vmatpush1.msra.mxu0 %v1700_v63  ;;  %382 = vmatpush1.msra.mxu1 %v1702_v0  ;;  %v1735_v0 = vld [vmem:[#allocation2 + $0x2d8] sm:$0xff]  ;;  %2387 = vst [vmem:[#allocation58_spill] sm:$0xff] %v1797_v24  ;;  %2411 = vst [vmem:[#allocation82_spill] sm:$0xff] %v1873_v22  ;;  %v2325_v20 = vrot.slane %v1873_v22, 2  ;;  %v1908_v14 = vld [vmem:[#allocation2 + $0x210] sm:$0xff] }
  0x4b   : > { %339 = vmatmul.mubr.f32.vlgmr.msra.gmra.mxu0 %v1707_v54  ;;  %416 = vmatmul.mubr.f32.vlgmr.msra.gmra.mxu1 %v205_v52  ;;  %v1737_v54 = vld [vmem:[#allocation2 + $0x3d8] sm:$0xff]  ;;  %v1741_v52 = vld [vmem:[#allocation2 + $0x2d0] sm:$0xff]  ;;  %1224 = vst [vmem:[%s203_s11 + $0xe] sm:$0x3] %v2412_v18 }
  0x4c   : > { %471 = vmatprep.subr.mxu0 %v1712_v56  ;;  %594 = vmatprep.subr.mxu1 %v1714_v50  ;;  %2368 = vst [vmem:[#allocation39_spill] sm:$0xff] %v1737_v54  ;;  %v1747_v50 = vld [vmem:[#allocation2 + $0x2c8] sm:$0xff]  ;;  %v1910_v22 = vld [vmem:[#allocation2 + $0x310] sm:$0xff] }
  0x4d   : > { %472 = vmatpush1.msra.mxu0 %v1718_v58  ;;  %595 = vmatpush1.msra.mxu1 %v1720_v48  ;;  %2370 = vst [vmem:[#allocation41_spill] sm:$0xff] %v1747_v50  ;;  %v1753_v48 = vld [vmem:[#allocation2 + $0x2c0] sm:$0xff]  ;;  %2416 = vst [vmem:[#allocation86_spill] sm:$0xff] %v1910_v22 }
  0x4e   : > { %473 = vmatprep.subr.mxu0 %v1723_v60  ;;  %596 = vmatprep.subr.mxu1 %v1725_v46  ;;  %2372 = vst [vmem:[#allocation43_spill] sm:$0xff] %v1753_v48  ;;  %v1759_v46 = vld [vmem:[#allocation2 + $0x2b8] sm:$0xff] }
  0x4f   : > { %474 = vmatpush1.msra.mxu0 %v1729_v62  ;;  %597 = vmatpush1.msra.mxu1 %v1731_v44  ;;  %2374 = vst [vmem:[#allocation45_spill] sm:$0xff] %v1759_v46  ;;  %v1765_v44 = vld [vmem:[#allocation2 + $0x2b0] sm:$0xff] }
  0x50   : > { %475 = vmatprep.subr.mxu0 %v1735_v0  ;;  %598 = vmatprep.subr.mxu1 %v1737_v54  ;;  %2376 = vst [vmem:[#allocation47_spill] sm:$0xff] %v1765_v44  ;;  %v1771_v54 = vld [vmem:[#allocation2 + $0x2a8] sm:$0xff] }
  0x51   : > { %476 = vmatpush1.msra.mxu0 %v1741_v52  ;;  %599 = vmatpush1.msra.mxu1 %v1743_v42  ;;  %2378 = vst [vmem:[#allocation49_spill] sm:$0xff] %v1771_v54  ;;  %v1777_v42 = vld [vmem:[#allocation2 + $0x2a0] sm:$0xff] }
  0x52   : > { %477 = vmatprep.subr.mxu0 %v1747_v50  ;;  %600 = vmatprep.subr.mxu1 %v1749_v40  ;;  %2380 = vst [vmem:[#allocation51_spill] sm:$0xff] %v1777_v42  ;;  %v1783_v40 = vld [vmem:[#allocation2 + $0x298] sm:$0xff] }
  0x53   : > { %478 = vmatpush1.msra.mxu0 %v1753_v48  ;;  %601 = vmatpush1.msra.mxu1 %v1755_v38  ;;  %2382 = vst [vmem:[#allocation53_spill] sm:$0xff] %v1783_v40  ;;  %v1789_v38 = vld [vmem:[#allocation2 + $0x290] sm:$0xff]  ;;  %v1903_v48 = vld [vmem:[#allocation2 + $0x318] sm:$0xff] }
  0x54   : > { %479 = vmatprep.subr.mxu0 %v1759_v46  ;;  %602 = vmatprep.subr.mxu1 %v1761_v36  ;;  %2384 = vst [vmem:[#allocation55_spill] sm:$0xff] %v1789_v38  ;;  %v1795_v36 = vld [vmem:[#allocation2 + $0x288] sm:$0xff]  ;;  %v1886_v46 = vld [vmem:[#allocation2 + $0x220] sm:$0xff]  ;;  %2415 = vst [vmem:[#allocation85_spill] sm:$0xff] %v1903_v48 }
  0x55   : > { %480 = vmatpush1.msra.mxu0 %v1765_v44  ;;  %603 = vmatpush1.msra.mxu1 %v1767_v34  ;;  %2386 = vst [vmem:[#allocation57_spill] sm:$0xff] %v1795_v36  ;;  %v1801_v34 = vld [vmem:[#allocation2 + $0x280] sm:$0xff] }
  0x56   : > { %481 = vmatprep.subr.mxu0 %v1771_v54  ;;  %604 = vmatprep.subr.mxu1 %v1773_v32  ;;  %2388 = vst [vmem:[#allocation59_spill] sm:$0xff] %v1801_v34  ;;  %v1803_v54 = vld [vmem:[#allocation2 + $0x380] sm:$0xff]  ;;  %v1807_v32 = vld [vmem:[#allocation2 + $0x278] sm:$0xff] }
  0x57   : > { %482 = vmatpush1.msra.mxu0 %v1777_v42  ;;  %605 = vmatpush1.msra.mxu1 %v1779_v30  ;;  %2389 = vst [vmem:[#allocation60_spill] sm:$0xff] %v1803_v54  ;;  %2390 = vst [vmem:[#allocation61_spill] sm:$0xff] %v1807_v32  ;;  %v1809_v42 = vld [vmem:[#allocation2 + $0x378] sm:$0xff]  ;;  %v1813_v30 = vld [vmem:[#allocation2 + $0x270] sm:$0xff] }
  0x58   : > { %483 = vmatprep.subr.mxu0 %v1783_v40  ;;  %606 = vmatprep.subr.mxu1 %v1785_v28  ;;  %2391 = vst [vmem:[#allocation62_spill] sm:$0xff] %v1809_v42  ;;  %2392 = vst [vmem:[#allocation63_spill] sm:$0xff] %v1813_v30  ;;  %v1815_v40 = vld [vmem:[#allocation2 + $0x370] sm:$0xff]  ;;  %v1819_v28 = vld [vmem:[#allocation2 + $0x268] sm:$0xff] }
  0x59   : > { %484 = vmatpush1.msra.mxu0 %v1789_v38  ;;  %607 = vmatpush1.msra.mxu1 %v1791_v26  ;;  %2393 = vst [vmem:[#allocation64_spill] sm:$0xff] %v1815_v40  ;;  %2394 = vst [vmem:[#allocation65_spill] sm:$0xff] %v1819_v28  ;;  %v1821_v38 = vld [vmem:[#allocation2 + $0x368] sm:$0xff]  ;;  %v1825_v26 = vld [vmem:[#allocation2 + $0x260] sm:$0xff] }
  0x5a   : > { %485 = vmatprep.subr.mxu0 %v1795_v36  ;;  %608 = vmatprep.subr.mxu1 %v1797_v24  ;;  %2395 = vst [vmem:[#allocation66_spill] sm:$0xff] %v1821_v38  ;;  %2396 = vst [vmem:[#allocation67_spill] sm:$0xff] %v1825_v26  ;;  %v1827_v36 = vld [vmem:[#allocation2 + $0x360] sm:$0xff]  ;;  %v1831_v24 = vld [vmem:[#allocation2 + $0x258] sm:$0xff] }
  0x5b   : > { %486 = vmatpush1.msra.mxu0 %v1801_v34  ;;  %609 = vmatpush1.msra.mxu1 %v1803_v54  ;;  %2397 = vst [vmem:[#allocation68_spill] sm:$0xff] %v1827_v36  ;;  %2398 = vst [vmem:[#allocation69_spill] sm:$0xff] %v1831_v24  ;;  %v1833_v34 = vld [vmem:[#allocation2 + $0x358] sm:$0xff]  ;;  %v1837_v54 = vld [vmem:[#allocation2 + $0x250] sm:$0xff] }
  0x5c   : > { %487 = vmatprep.subr.mxu0 %v1807_v32  ;;  %610 = vmatprep.subr.mxu1 %v1809_v42  ;;  %2399 = vst [vmem:[#allocation70_spill] sm:$0xff] %v1833_v34  ;;  %2400 = vst [vmem:[#allocation71_spill] sm:$0xff] %v1837_v54  ;;  %v1839_v32 = vld [vmem:[#allocation2 + $0x350] sm:$0xff]  ;;  %v1843_v42 = vld [vmem:[#allocation2 + $0x248] sm:$0xff] }
  0x5d   : > { %488 = vmatpush1.msra.mxu0 %v1813_v30  ;;  %611 = vmatpush1.msra.mxu1 %v1815_v40  ;;  %2401 = vst [vmem:[#allocation72_spill] sm:$0xff] %v1839_v32  ;;  %2402 = vst [vmem:[#allocation73_spill] sm:$0xff] %v1843_v42  ;;  %v1845_v30 = vld [vmem:[#allocation2 + $0x348] sm:$0xff]  ;;  %v1849_v40 = vld [vmem:[#allocation2 + $0x240] sm:$0xff] }
  0x5e   : > { %489 = vmatprep.subr.mxu0 %v1819_v28  ;;  %612 = vmatprep.subr.mxu1 %v1821_v38  ;;  %2403 = vst [vmem:[#allocation74_spill] sm:$0xff] %v1845_v30  ;;  %2404 = vst [vmem:[#allocation75_spill] sm:$0xff] %v1849_v40  ;;  %v1851_v38 = vld [vmem:[#allocation2 + $0x340] sm:$0xff]  ;;  %v1865_v28 = vld [vmem:[#allocation2 + $0x228] sm:$0xff] }
  0x5f   : > { %490 = vmatpush1.msra.mxu0 %v1825_v26  ;;  %613 = vmatpush1.msra.mxu1 %v1827_v36  ;;  %2405 = vst [vmem:[#allocation76_spill] sm:$0xff] %v1851_v38  ;;  %v1855_v36 = vld [vmem:[#allocation2 + $0x238] sm:$0xff] }
  0x60   : > { %491 = vmatprep.subr.mxu0 %v1831_v24  ;;  %614 = vmatprep.subr.mxu1 %v1833_v34  ;;  %2406 = vst [vmem:[#allocation77_spill] sm:$0xff] %v1855_v36  ;;  %v1857_v26 = vld [vmem:[#allocation2 + $0x338] sm:$0xff]  ;;  %v1861_v34 = vld [vmem:[#allocation2 + $0x230] sm:$0xff] }
  0x61   : > { %492 = vmatpush1.msra.mxu0 %v1837_v54  ;;  %615 = vmatpush1.msra.mxu1 %v1839_v32  ;;  %2407 = vst [vmem:[#allocation78_spill] sm:$0xff] %v1857_v26  ;;  %2408 = vst [vmem:[#allocation79_spill] sm:$0xff] %v1861_v34  ;;  %v1863_v24 = vld [vmem:[#allocation2 + $0x330] sm:$0xff]  ;;  %v1869_v32 = vld [vmem:[#allocation2 + $0x328] sm:$0xff] }
  0x62   : > { %493 = vmatprep.subr.mxu0 %v1843_v42  ;;  %616 = vmatprep.subr.mxu1 %v1845_v30  ;;  %2409 = vst [vmem:[#allocation80_spill] sm:$0xff] %v1863_v24  ;;  %2410 = vst [vmem:[#allocation81_spill] sm:$0xff] %v1869_v32  ;;  %v1117_v54 = vld [vmem:[%s1690_s7 + $0x8] sm:$0xfc]  ;;  %v428_v30 = vld [vmem:[%s1690_s7] sm:$0xfe] }
  0x63   : > { %494 = vmatpush1.msra.mxu0 %v1849_v40  ;;  %617 = vmatpush1.msra.mxu1 %v1851_v38  ;;  %v429_v42 = vld [vmem:[%s1690_s7 + $0x10] sm:$0x7f]  ;;  %v1121_v44 = vrot.slane %v1117_v54, 2  ;;  %v1883_v38 = vld [vmem:[%s1690_s7 + $0x18] sm:$0x3f]  ;;  %v466_v16 = vrot.slane %v428_v30, 1 }
  0x64   : > { %495 = vmatprep.subr.mxu0 %v1855_v36  ;;  %618 = vmatprep.subr.mxu1 %v1857_v26  ;;  %v206_v40 = vld [vmem:[%s1690_s7 + $0x10] sm:$0x3f]  ;;  %v1890_v26 = vld [vmem:[#allocation2 + $0x320] sm:$0xff]  ;;  %v552_v36 = vld [vmem:[%s1690_s7 + $0x8] sm:$0xfe]  ;;  %v1905_v50 = vrot.slane %v429_v42, 1 }
  0x65   : > { %496 = vmatpush1.msra.mxu0 %v1861_v34  ;;  %619 = vmatpush1.msra.mxu1 %v1863_v24  ;;  %2413 = vst [vmem:[#allocation83_spill] sm:$0xff] %v1890_v26  ;;  %v553_v54 = vld [vmem:[%s1690_s7 + $0x18] sm:$0x7f]  ;;  %v1897_v34 = vsel %vm712_vm0, %v1121_v44, %v2325_v20  ;;  %v1914_v44 = vld [vmem:[#allocation2 + $0x208] sm:$0xff]  ;;  %v1926_v42 = vld [vmem:[#allocation2 + $0x300] sm:$0xff] }
  0x66   : > { %344 = vmatprep.mubr.f32.mxu0 %v2412_v18  ;;  %421 = vmatprep.mubr.f32.mxu1 %v2412_v18  ;;  %2414 = vst [vmem:[#allocation84_spill] sm:$0xff] %v1897_v34  ;;  %v1901_v24 = vld [vmem:[#allocation2 + $0x218] sm:$0xff]  ;;  %v1916_v20 = vld [vmem:[#allocation2 + $0x308] sm:$0xff]  ;;  %v589_v34 = vrot.slane %v552_v36, 1  ;;  %v1918_v30 = vrot.slane %v553_v54, 1  ;;  %2418 = vst [vmem:[#allocation88_spill] sm:$0xff] %v1926_v42 }
  0x67   : > { %497 = vmatprep.subr.mxu0 %v1865_v28  ;;  %620 = vmatprep.subr.mxu1 %v1869_v32  ;;  %2417 = vst [vmem:[#allocation87_spill] sm:$0xff] %v1916_v20  ;;  %v1934_v36 = vld [vmem:[#allocation2 + $0x4f8] sm:$0xff]  ;;  %v676_v32 = vld [vmem:[%s1690_s7 + $0x10] sm:$0xff] }
  0x68   : > { %345 = vmatmul.mubr.f32.gmra.mxu0 %v1883_v38  ;;  %422 = vmatmul.mubr.f32.gmra.mxu1 %v206_v40  ;;  %v1922_v40 = vld [vmem:[#allocation2 + $0x200] sm:$0xff]  ;;  %v1940_v54 = vsel %vm465_vm1, %v589_v34, %v1918_v30  ;;  %v1958_v34 = vld [vmem:[#allocation2 + $0x4d8] sm:$0xff] }
  0x69   : > { %498 = vmatpush1.msra.mxu0 %v1886_v46  ;;  %621 = vmatpush1.msra.mxu1 %v1890_v26  ;;  %v1930_v26 = vsel %vm465_vm1, %v466_v16, %v1905_v50  ;;  %v1944_v16 = vld [vmem:[#allocation2 + $0x4f0] sm:$0xff] }
  0x6a   : > { %499 = vmatprep.subr.mxu0 %v1901_v24  ;;  %622 = vmatprep.subr.mxu1 %v1903_v48  ;;  %v1992_v48 = vld [vmem:[#allocation2 + $0x498] sm:$0xff] }
  0x6b   : > { %500 = vmatpush1.msra.mxu0 %v1908_v14  ;;  %623 = vmatpush1.msra.mxu1 %v1910_v22  ;;  %v1952_v22 = vld [vmem:[#allocation2 + $0x4e0] sm:$0xff] }
  0x6c   : > { %501 = vmatprep.subr.mxu0 %v1914_v44  ;;  %624 = vmatprep.subr.mxu1 %v1916_v20  ;;  %v1948_v20 = vld [vmem:[#allocation2 + $0x4e8] sm:$0xff] }
  0x6d   : > { %502 = vmatpush1.msra.mxu0 %v1922_v40  ;;  %535 = vmatprep.mubr.f32.mxu0 %v2412_v18 }
  0x6e   : > { %625 = vmatpush1.msra.mxu1 %v1926_v42  ;;  %536 = vmatmul.mubr.f32.vlgmr.msra.gmra.mxu0 %v1930_v26  ;;  %v1962_v42 = vld [vmem:[#allocation2 + $0x4d0] sm:$0xff] }
  0x6f   : > { %658 = vmatprep.mubr.f32.mxu1 %v2412_v18  ;;  %718 = vmatprep.subr.mxu0 %v1934_v36 }
  0x70   : > { %801 = vmatprep.subr.mxu1 %v1502_v1  ;;  %659 = vmatmul.mubr.f32.vlgmr.msra.gmra.mxu1 %v1940_v54  ;;  %v1966_v1 = vld [vmem:[#allocation2 + $0x4c8] sm:$0xff] }
  0x71   : > { %719 = vmatpush1.msra.mxu0 %v1944_v16  ;;  %802 = vmatpush1.msra.mxu1 %v1506_v3  ;;  %v1972_v3 = vld [vmem:[#allocation2 + $0x4c0] sm:$0xff] }
  0x72   : > { %720 = vmatprep.subr.mxu0 %v1948_v20  ;;  %803 = vmatprep.subr.mxu1 %v1512_v5  ;;  %v1976_v5 = vld [vmem:[#allocation2 + $0x4b8] sm:$0xff] }
  0x73   : > { %541 = vmatprep.mubr.f32.mxu0 %v2412_v18  ;;  %721 = vmatpush1.msra.mxu0 %v1952_v22 }
  0x74   : > { %804 = vmatpush1.msra.mxu1 %v1518_v7  ;;  %542 = vmatmul.mubr.f32.gmra.mxu0 %v1905_v50  ;;  %v1980_v7 = vld [vmem:[#allocation2 + $0x4b0] sm:$0xff] }
  0x75   : > { %722 = vmatprep.subr.mxu0 %v1958_v34  ;;  %805 = vmatprep.subr.mxu1 %v1522_v9  ;;  %v1984_v9 = vld [vmem:[#allocation2 + $0x4a8] sm:$0xff] }
  0x76   : > { %664 = vmatprep.mubr.f32.mxu1 %v2412_v18  ;;  %723 = vmatpush1.msra.mxu0 %v1962_v42 }
  0x77   : > { %806 = vmatpush1.msra.mxu1 %v1528_v11  ;;  %724 = vmatprep.subr.mxu0 %v1966_v1  ;;  %v1988_v11 = vld [vmem:[#allocation2 + $0x4a0] sm:$0xff] }
  0x78   : > { %665 = vmatmul.mubr.f32.gmra.mxu1 %v1918_v30  ;;  %807 = vmatprep.subr.mxu1 %v1534_v13  ;;  %v1996_v13 = vld [vmem:[#allocation2 + $0x490] sm:$0xff] }
  0x79   : > { %725 = vmatpush1.msra.mxu0 %v1972_v3  ;;  %808 = vmatpush1.msra.mxu1 %v1540_v15  ;;  %v2000_v15 = vld [vmem:[#allocation2 + $0x488] sm:$0xff] }
  0x7a   : > { %726 = vmatprep.subr.mxu0 %v1976_v5  ;;  %809 = vmatprep.subr.mxu1 %v1546_v17  ;;  %v2004_v17 = vld [vmem:[#allocation2 + $0x480] sm:$0xff] }
  0x7b   : > { %727 = vmatpush1.msra.mxu0 %v1980_v7  ;;  %810 = vmatpush1.msra.mxu1 %v1552_v19  ;;  %v2008_v19 = vld [vmem:[#allocation2 + $0x478] sm:$0xff] }
  0x7c   : > { %728 = vmatprep.subr.mxu0 %v1984_v9  ;;  %811 = vmatprep.subr.mxu1 %v1558_v21  ;;  %v2012_v21 = vld [vmem:[#allocation2 + $0x470] sm:$0xff] }
  0x7d   : > { %729 = vmatpush1.msra.mxu0 %v1988_v11  ;;  %812 = vmatpush1.msra.mxu1 %v1564_v23  ;;  %v2016_v23 = vld [vmem:[#allocation2 + $0x468] sm:$0xff] }
  0x7e   : > { %730 = vmatprep.subr.mxu0 %v1992_v48  ;;  %813 = vmatprep.subr.mxu1 %v1570_v25  ;;  %v2020_v25 = vld [vmem:[#allocation2 + $0x460] sm:$0xff] }
  0x7f   : > { %731 = vmatpush1.msra.mxu0 %v1996_v13  ;;  %814 = vmatpush1.msra.mxu1 %v1576_v27  ;;  %v2024_v27 = vld [vmem:[#allocation2 + $0x458] sm:$0xff] }
  0x80   : > { %732 = vmatprep.subr.mxu0 %v2000_v15  ;;  %815 = vmatprep.subr.mxu1 %v1582_v29  ;;  %v2028_v29 = vld [vmem:[#allocation2 + $0x450] sm:$0xff] }
  0x81   : > { %733 = vmatpush1.msra.mxu0 %v2004_v17  ;;  %816 = vmatpush1.msra.mxu1 %v1588_v31  ;;  %2419 = vst [vmem:[#allocation89_spill] sm:$0xff] %v2028_v29  ;;  %v2032_v31 = vld [vmem:[#allocation2 + $0x448] sm:$0xff] }
  0x82   : > { %734 = vmatprep.subr.mxu0 %v2008_v19  ;;  %817 = vmatprep.subr.mxu1 %v1598_v33  ;;  %2420 = vst [vmem:[#allocation90_spill] sm:$0xff] %v2032_v31  ;;  %v2036_v33 = vld [vmem:[#allocation2 + $0x440] sm:$0xff] }
  0x83   : > { %735 = vmatpush1.msra.mxu0 %v2012_v21  ;;  %818 = vmatpush1.msra.mxu1 %v1604_v35  ;;  %v2040_v35 = vld [vmem:[#allocation2 + $0x438] sm:$0xff] }
  0x84   : > { %736 = vmatprep.subr.mxu0 %v2016_v23  ;;  %819 = vmatprep.subr.mxu1 %v1610_v37  ;;  %v2044_v37 = vld [vmem:[#allocation2 + $0x430] sm:$0xff] }
  0x85   : > { %737 = vmatpush1.msra.mxu0 %v2020_v25  ;;  %820 = vmatpush1.msra.mxu1 %v1617_v39  ;;  %v675_v39 = vld [vmem:[%s1690_s7] sm:$0xfc] }
  0x86   : > { %738 = vmatprep.subr.mxu0 %v2024_v27  ;;  %821 = vmatprep.subr.mxu1 %v1623_v41  ;;  %v2050_v41 = vld [vmem:[#allocation2 + $0x428] sm:$0xff] }
  0x87   : > { %739 = vmatpush1.msra.mxu0 %v2028_v29  ;;  %822 = vmatpush1.msra.mxu1 %v1629_v43  ;;  %v2054_v43 = vld [vmem:[#allocation2 + $0x420] sm:$0xff]  ;;  %v2060_v29 = vrot.slane %v676_v32, 2 }
  0x88   : > { %740 = vmatprep.subr.mxu0 %v2032_v31  ;;  %823 = vmatprep.subr.mxu1 %v1635_v45  ;;  %v2058_v45 = vld [vmem:[#allocation2 + $0x418] sm:$0xff]  ;;  %v713_v31 = vrot.slane %v675_v39, 2 }
  0x89   : > { %741 = vmatpush1.msra.mxu0 %v2036_v33  ;;  %824 = vmatpush1.msra.mxu1 %v1646_v47  ;;  %v2064_v47 = vld [vmem:[#allocation2 + $0x410] sm:$0xff] }
  0x8a   : > { %742 = vmatprep.subr.mxu0 %v2040_v35  ;;  %825 = vmatprep.subr.mxu1 %v1652_v49  ;;  %v2068_v49 = vld [vmem:[#allocation2 + $0x408] sm:$0xff]  ;;  %v2078_v32 = vsel %vm712_vm0, %v713_v31, %v2060_v29  ;;  %v2440_v31 = vld [vmem:[#allocation59_spill] sm:$0xff]  ;;  %v2441_v39 = vld [vmem:[#allocation18_spill] sm:$0xff] }
  0x8b   : > { %743 = vmatpush1.msra.mxu0 %v2044_v37  ;;  %826 = vmatpush1.msra.mxu1 %v1658_v51  ;;  %v2072_v51 = vld [vmem:[#allocation2 + $0x400] sm:$0xff] }
  0x8c   : > { %744 = vmatprep.subr.mxu0 %v2050_v41  ;;  %827 = vmatprep.subr.mxu1 %v1664_v53  ;;  %v2426_v53 = vld [vmem:[#allocation45_spill] sm:$0xff] }
  0x8d   : > { %745 = vmatpush1.msra.mxu0 %v2054_v43  ;;  %828 = vmatpush1.msra.mxu1 %v1671_v55  ;;  %v2427_v55 = vld [vmem:[#allocation11_spill] sm:$0xff] }
  0x8e   : > { %746 = vmatprep.subr.mxu0 %v2058_v45  ;;  %829 = vmatprep.subr.mxu1 %v1677_v57  ;;  %v2432_v57 = vld [vmem:[#allocation51_spill] sm:$0xff] }
  0x8f   : > { %747 = vmatpush1.msra.mxu0 %v2064_v47  ;;  %830 = vmatpush1.msra.mxu1 %v1683_v59  ;;  %v2434_v59 = vld [vmem:[#allocation53_spill] sm:$0xff] }
  0x90   : > { %748 = vmatprep.subr.mxu0 %v2068_v49  ;;  %831 = vmatprep.subr.mxu1 %v1694_v61  ;;  %v2436_v61 = vld [vmem:[#allocation55_spill] sm:$0xff] }
  0x91   : > { %749 = vmatpush1.msra.mxu0 %v2072_v51  ;;  %782 = vmatprep.mubr.f32.mxu0 %v2412_v18 }
  0x92   : > { %832 = vmatpush1.msra.mxu1 %v1700_v63  ;;  %783 = vmatmul.mubr.f32.vlgmr.msra.gmra.mxu0 %v2078_v32  ;;  %v2438_v63 = vld [vmem:[#allocation57_spill] sm:$0xff] }
  0x93   : > { %865 = vmatprep.mubr.f32.mxu1 %v2412_v18  ;;  %878 = vmatprep.subr.mxu0 %v1504_v2  ;;  %v2421_v2 = vld [vmem:[#allocation8_spill] sm:$0xff] }
  0x94   : > { %955 = vmatprep.subr.mxu1 %v1712_v56  ;;  %866 = vmatmul.mubr.f32.vlgmr.msra.gmra.mxu1 %v1930_v26  ;;  %v2424_v26 = vld [vmem:[#allocation43_spill] sm:$0xff]  ;;  %v2431_v56 = vld [vmem:[#allocation13_spill] sm:$0xff] }
  0x95   : > { %879 = vmatpush1.msra.mxu0 %v1510_v4  ;;  %956 = vmatpush1.msra.mxu1 %v1718_v58  ;;  %v2422_v4 = vld [vmem:[#allocation41_spill] sm:$0xff]  ;;  %v2433_v58 = vld [vmem:[#allocation14_spill] sm:$0xff] }
  0x96   : > { %880 = vmatprep.subr.mxu0 %v1514_v6  ;;  %957 = vmatprep.subr.mxu1 %v1723_v60  ;;  %v2423_v6 = vld [vmem:[#allocation9_spill] sm:$0xff]  ;;  %v2435_v60 = vld [vmem:[#allocation15_spill] sm:$0xff] }
  0x97   : > { %788 = vmatprep.mubr.f32.mxu0 %v2412_v18  ;;  %881 = vmatpush1.msra.mxu0 %v1520_v8  ;;  %v2425_v8 = vld [vmem:[#allocation10_spill] sm:$0xff] }
  0x98   : > { %958 = vmatpush1.msra.mxu1 %v1729_v62  ;;  %789 = vmatmul.mubr.f32.gmra.mxu0 %v2060_v29  ;;  %v2437_v62 = vld [vmem:[#allocation16_spill] sm:$0xff] }
  0x99   : > { %882 = vmatprep.subr.mxu0 %v1526_v10  ;;  %959 = vmatprep.subr.mxu1 %v1735_v0  ;;  %v2428_v10 = vld [vmem:[#allocation47_spill] sm:$0xff]  ;;  %v2429_v0 = vld [vmem:[#allocation12_spill] sm:$0xff] }
  0x9a   : > { %883 = vmatpush1.msra.mxu0 %v1530_v12  ;;  %960 = vmatpush1.msra.mxu1 %v1741_v52  ;;  %v2430_v12 = vld [vmem:[#allocation49_spill] sm:$0xff] }
  0x9b   : > { %884 = vmatprep.subr.mxu0 %v2421_v2  ;;  %961 = vmatprep.subr.mxu1 %v2422_v4  ;;  %v2439_v52 = vld [vmem:[#allocation17_spill] sm:$0xff]  ;;  %v2443_v4 = vld [vmem:[#allocation19_spill] sm:$0xff] }
  0x9c   : > { %885 = vmatpush1.msra.mxu0 %v2423_v6  ;;  %962 = vmatpush1.msra.mxu1 %v2424_v26  ;;  %v2442_v2 = vld [vmem:[#allocation61_spill] sm:$0xff]  ;;  %v2444_v6 = vld [vmem:[#allocation63_spill] sm:$0xff]  ;;  %v2445_v26 = vld [vmem:[#allocation20_spill] sm:$0xff] }
  0x9d   : > { %886 = vmatprep.subr.mxu0 %v2425_v8  ;;  %963 = vmatprep.subr.mxu1 %v2426_v53  ;;  %v2446_v8 = vld [vmem:[#allocation65_spill] sm:$0xff] }
  0x9e   : > { %887 = vmatpush1.msra.mxu0 %v2427_v55  ;;  %964 = vmatpush1.msra.mxu1 %v2428_v10  ;;  %v2447_v53 = vld [vmem:[#allocation21_spill] sm:$0xff]  ;;  %v2448_v55 = vld [vmem:[#allocation67_spill] sm:$0xff]  ;;  %v2449_v10 = vld [vmem:[#allocation22_spill] sm:$0xff] }
  0x9f   : > { %888 = vmatprep.subr.mxu0 %v2429_v0  ;;  %965 = vmatprep.subr.mxu1 %v2430_v12  ;;  %v2450_v0 = vld [vmem:[#allocation69_spill] sm:$0xff]  ;;  %v2451_v12 = vld [vmem:[#allocation23_spill] sm:$0xff] }
  0xa0   : > { %889 = vmatpush1.msra.mxu0 %v2431_v56  ;;  %966 = vmatpush1.msra.mxu1 %v2432_v57  ;;  %v2452_v56 = vld [vmem:[#allocation71_spill] sm:$0xff]  ;;  %v2453_v57 = vld [vmem:[#allocation24_spill] sm:$0xff] }
  0xa1   : > { %890 = vmatprep.subr.mxu0 %v2433_v58  ;;  %967 = vmatprep.subr.mxu1 %v2434_v59  ;;  %v2454_v58 = vld [vmem:[#allocation73_spill] sm:$0xff] }
  0xa2   : > { %891 = vmatpush1.msra.mxu0 %v2435_v60  ;;  %968 = vmatpush1.msra.mxu1 %v2436_v61  ;;  %v2455_v59 = vld [vmem:[#allocation25_spill] sm:$0xff]  ;;  %v2456_v60 = vld [vmem:[#allocation75_spill] sm:$0xff]  ;;  %v2457_v61 = vld [vmem:[#allocation26_spill] sm:$0xff] }
  0xa3   : > { %892 = vmatprep.subr.mxu0 %v2437_v62  ;;  %969 = vmatprep.subr.mxu1 %v2438_v63  ;;  %v2458_v62 = vld [vmem:[#allocation77_spill] sm:$0xff]  ;;  %v2459_v63 = vld [vmem:[#allocation27_spill] sm:$0xff] }
  0xa4   : > { %893 = vmatpush1.msra.mxu0 %v2439_v52  ;;  %970 = vmatpush1.msra.mxu1 %v2440_v31  ;;  %v2460_v52 = vld [vmem:[#allocation79_spill] sm:$0xff]  ;;  %v2461_v31 = vld [vmem:[#allocation28_spill] sm:$0xff] }
  0xa5   : > { %894 = vmatprep.subr.mxu0 %v2441_v39  ;;  %971 = vmatprep.subr.mxu1 %v2442_v2  ;;  %v2462_v39 = vld [vmem:[#allocation29_spill] sm:$0xff]  ;;  %v2463_v2 = vld [vmem:[#allocation30_spill] sm:$0xff] }
  0xa6   : > { %895 = vmatpush1.msra.mxu0 %v2443_v4  ;;  %972 = vmatpush1.msra.mxu1 %v2444_v6  ;;  %v2464_v4 = vld [vmem:[#allocation31_spill] sm:$0xff]  ;;  %v2465_v6 = vld [vmem:[#allocation32_spill] sm:$0xff] }
  0xa7   : > { %896 = vmatprep.subr.mxu0 %v2445_v26  ;;  %973 = vmatprep.subr.mxu1 %v2446_v8  ;;  %v2497_v26 = vld [vmem:[#allocation83_spill] sm:$0xff]  ;;  %v2498_v8 = vld [vmem:[#allocation85_spill] sm:$0xff] }
  0xa8   : > { %897 = vmatpush1.msra.mxu0 %v2447_v53  ;;  %974 = vmatpush1.msra.mxu1 %v2448_v55 }
  0xa9   : > { %898 = vmatprep.subr.mxu0 %v2449_v10  ;;  %975 = vmatprep.subr.mxu1 %v2450_v0 }
  0xaa   : > { %899 = vmatpush1.msra.mxu0 %v2451_v12  ;;  %976 = vmatpush1.msra.mxu1 %v2452_v56 }
  0xab   : > { %900 = vmatprep.subr.mxu0 %v2453_v57  ;;  %977 = vmatprep.subr.mxu1 %v2454_v58 }
  0xac   : > { %901 = vmatpush1.msra.mxu0 %v2455_v59  ;;  %978 = vmatpush1.msra.mxu1 %v2456_v60 }
  0xad   : > { %902 = vmatprep.subr.mxu0 %v2457_v61  ;;  %979 = vmatprep.subr.mxu1 %v2458_v62 }
  0xae   : > { %903 = vmatpush1.msra.mxu0 %v2459_v63  ;;  %980 = vmatpush1.msra.mxu1 %v2460_v52 }
  0xaf   : > { %904 = vmatprep.subr.mxu0 %v2461_v31  ;;  %981 = vmatprep.subr.mxu1 %v1865_v28  ;;  %v2466_v28 = vld [vmem:[#allocation33_spill] sm:$0xff] }
  0xb0   : > { %905 = vmatpush1.msra.mxu0 %v2462_v39  ;;  %982 = vmatpush1.msra.mxu1 %v1886_v46  ;;  %v2467_v46 = vld [vmem:[#allocation34_spill] sm:$0xff] }
  0xb1   : > { %871 = vmatprep.mubr.f32.mxu1 %v2412_v18  ;;  %906 = vmatprep.subr.mxu0 %v2463_v2 }
  0xb2   : > { %983 = vmatprep.subr.mxu1 %v1901_v24  ;;  %872 = vmatmul.mubr.f32.gmra.mxu1 %v1905_v50  ;;  %v2468_v24 = vld [vmem:[#allocation35_spill] sm:$0xff]  ;;  %v2470_v50 = vld [vmem:[#allocation37_spill] sm:$0xff] }
  0xb3   : > { %907 = vmatpush1.msra.mxu0 %v2464_v4  ;;  %984 = vmatpush1.msra.mxu1 %v1908_v14  ;;  %v2469_v14 = vld [vmem:[#allocation36_spill] sm:$0xff] }
  0xb4   : > { %908 = vmatprep.subr.mxu0 %v2465_v6  ;;  %985 = vmatprep.subr.mxu1 %v1914_v44  ;;  %v2471_v44 = vld [vmem:[#allocation38_spill] sm:$0xff] }
  0xb5   : > { %909 = vmatpush1.msra.mxu0 %v2466_v28  ;;  %942 = vmatprep.mubr.f32.mxu0 %v2412_v18 }
  0xb6   : > { %986 = vmatpush1.msra.mxu1 %v1922_v40  ;;  %943 = vmatmul.mubr.f32.vlgmr.msra.gmra.mxu0 %v2467_v46  ;;  %v2472_v40 = vld [vmem:[#allocation39_spill] sm:$0xff] }
  0xb7   : > { %1019 = vmatprep.mubr.f32.mxu1 %v2412_v18  ;;  %1036 = vmatprep.subr.mxu0 %v2468_v24 }
  0xb8   : > { %1126 = vmatprep.subr.mxu1 %v1934_v36  ;;  %1020 = vmatmul.mubr.f32.vlgmr.msra.gmra.mxu1 %v1940_v54  ;;  %v2473_v36 = vld [vmem:[#allocation40_spill] sm:$0xff]  ;;  %v2474_v54 = vld [vmem:[#allocation42_spill] sm:$0xff] }
  0xb9   : > { %1037 = vmatpush1.msra.mxu0 %v2469_v14  ;;  %1127 = vmatpush1.msra.mxu1 %v1944_v16  ;;  %v2478_v16 = vld [vmem:[#allocation50_spill] sm:$0xff] }
  0xba   : > { %1038 = vmatprep.subr.mxu0 %v2470_v50  ;;  %1128 = vmatprep.subr.mxu1 %v1948_v20  ;;  %v2475_v20 = vld [vmem:[#allocation44_spill] sm:$0xff] }
  0xbb   : > { %948 = vmatprep.mubr.f32.mxu0 %v2412_v18  ;;  %1039 = vmatpush1.msra.mxu0 %v2471_v44 }
  0xbc   : > { %1129 = vmatpush1.msra.mxu1 %v1952_v22  ;;  %949 = vmatmul.mubr.f32.gmra.mxu0 %v1883_v38  ;;  %v2476_v22 = vld [vmem:[#allocation46_spill] sm:$0xff]  ;;  %v2477_v38 = vld [vmem:[#allocation48_spill] sm:$0xff] }
  0xbd   : > { %1040 = vmatprep.subr.mxu0 %v2472_v40  ;;  %1130 = vmatprep.subr.mxu1 %v1958_v34  ;;  %v2481_v34 = vld [vmem:[#allocation56_spill] sm:$0xff] }
  0xbe   : > { %1025 = vmatprep.mubr.f32.mxu1 %v2412_v18  ;;  %1041 = vmatpush1.msra.mxu0 %v2473_v36 }
  0xbf   : > { %1131 = vmatpush1.msra.mxu1 %v1962_v42  ;;  %1042 = vmatprep.subr.mxu0 %v2474_v54  ;;  %v2479_v42 = vld [vmem:[#allocation52_spill] sm:$0xff] }
  0xc0   : > { %1026 = vmatmul.mubr.f32.gmra.mxu1 %v1918_v30  ;;  %1132 = vmatprep.subr.mxu1 %v1966_v1  ;;  %v2480_v30 = vld [vmem:[#allocation54_spill] sm:$0xff] }
  0xc1   : > { %1043 = vmatpush1.msra.mxu0 %v2475_v20  ;;  %1133 = vmatpush1.msra.mxu1 %v1972_v3  ;;  %v2482_v1 = vld [vmem:[#allocation58_spill] sm:$0xff]  ;;  %v2483_v3 = vld [vmem:[#allocation60_spill] sm:$0xff] }
  0xc2   : > { %1044 = vmatprep.subr.mxu0 %v2476_v22  ;;  %1134 = vmatprep.subr.mxu1 %v1976_v5  ;;  %v2484_v5 = vld [vmem:[#allocation62_spill] sm:$0xff] }
  0xc3   : > { %1045 = vmatpush1.msra.mxu0 %v2477_v38  ;;  %1135 = vmatpush1.msra.mxu1 %v1980_v7  ;;  %v2485_v7 = vld [vmem:[#allocation64_spill] sm:$0xff] }
  0xc4   : > { %1046 = vmatprep.subr.mxu0 %v2478_v16  ;;  %1136 = vmatprep.subr.mxu1 %v1984_v9  ;;  %v2487_v9 = vld [vmem:[#allocation68_spill] sm:$0xff] }
  0xc5   : > { %1047 = vmatpush1.msra.mxu0 %v2479_v42  ;;  %1137 = vmatpush1.msra.mxu1 %v1988_v11  ;;  %v2488_v11 = vld [vmem:[#allocation70_spill] sm:$0xff] }
  0xc6   : > { %1048 = vmatprep.subr.mxu0 %v2480_v30  ;;  %1138 = vmatprep.subr.mxu1 %v1992_v48  ;;  %v2486_v48 = vld [vmem:[#allocation66_spill] sm:$0xff] }
  0xc7   : > { %1049 = vmatpush1.msra.mxu0 %v2481_v34  ;;  %1139 = vmatpush1.msra.mxu1 %v1996_v13  ;;  %v2489_v13 = vld [vmem:[#allocation72_spill] sm:$0xff] }
  0xc8   : > { %1050 = vmatprep.subr.mxu0 %v2482_v1  ;;  %1140 = vmatprep.subr.mxu1 %v2000_v15  ;;  %v2490_v15 = vld [vmem:[#allocation89_spill] sm:$0xff] }
  0xc9   : > { %1051 = vmatpush1.msra.mxu0 %v2483_v3  ;;  %1141 = vmatpush1.msra.mxu1 %v2004_v17  ;;  %v2491_v17 = vld [vmem:[#allocation74_spill] sm:$0xff] }
  0xca   : > { %1052 = vmatprep.subr.mxu0 %v2484_v5  ;;  %1142 = vmatprep.subr.mxu1 %v2008_v19  ;;  %v2492_v19 = vld [vmem:[#allocation90_spill] sm:$0xff] }
  0xcb   : > { %1053 = vmatpush1.msra.mxu0 %v2485_v7  ;;  %1143 = vmatpush1.msra.mxu1 %v2012_v21  ;;  %v2493_v21 = vld [vmem:[#allocation76_spill] sm:$0xff] }
  0xcc   : > { %1054 = vmatprep.subr.mxu0 %v2486_v48  ;;  %1144 = vmatprep.subr.mxu1 %v2016_v23  ;;  %v2494_v23 = vld [vmem:[#allocation78_spill] sm:$0xff] }
  0xcd   : > { %1055 = vmatpush1.msra.mxu0 %v2487_v9  ;;  %1145 = vmatpush1.msra.mxu1 %v2020_v25  ;;  %v2495_v25 = vld [vmem:[#allocation80_spill] sm:$0xff] }
  0xce   : > { %1056 = vmatprep.subr.mxu0 %v2488_v11  ;;  %1146 = vmatprep.subr.mxu1 %v2024_v27  ;;  %v2496_v27 = vld [vmem:[#allocation81_spill] sm:$0xff] }
  0xcf   : > { %1057 = vmatpush1.msra.mxu0 %v2489_v13  ;;  %1147 = vmatpush1.msra.mxu1 %v2490_v15 }
  0xd0   : > { %1058 = vmatprep.subr.mxu0 %v2491_v17  ;;  %1148 = vmatprep.subr.mxu1 %v2492_v19 }
  0xd1   : > { %1059 = vmatpush1.msra.mxu0 %v2493_v21  ;;  %1149 = vmatpush1.msra.mxu1 %v2036_v33  ;;  %v2499_v33 = vld [vmem:[#allocation86_spill] sm:$0xff] }
  0xd2   : > { %1060 = vmatprep.subr.mxu0 %v2494_v23  ;;  %1150 = vmatprep.subr.mxu1 %v2040_v35  ;;  %v2500_v35 = vld [vmem:[#allocation87_spill] sm:$0xff] }
  0xd3   : > { %1061 = vmatpush1.msra.mxu0 %v2495_v25  ;;  %1151 = vmatpush1.msra.mxu1 %v2044_v37  ;;  %v2501_v37 = vld [vmem:[#allocation88_spill] sm:$0xff] }
  0xd4   : > { %1062 = vmatprep.subr.mxu0 %v2496_v27  ;;  %1152 = vmatprep.subr.mxu1 %v2050_v41  ;;  %v2502_v41 = vld [vmem:[#allocation84_spill] sm:$0xff] }
  0xd5   : > { %1063 = vmatpush1.msra.mxu0 %v2497_v26  ;;  %1153 = vmatpush1.msra.mxu1 %v2054_v43  ;;  %v2503_v43 = vld [vmem:[#allocation82_spill] sm:$0xff] }
  0xd6   : > { %1064 = vmatprep.subr.mxu0 %v2498_v8  ;;  %1154 = vmatprep.subr.mxu1 %v2058_v45  ;;  %v2504_v45 = vrot.slane %v2503_v43, 2 }
  0xd7   : > { %1065 = vmatpush1.msra.mxu0 %v2499_v33  ;;  %1155 = vmatpush1.msra.mxu1 %v2064_v47 }
  0xd8   : > { %1066 = vmatprep.subr.mxu0 %v2500_v35  ;;  %1156 = vmatprep.subr.mxu1 %v2068_v49 }
  0xd9   : > { %1067 = vmatpush1.msra.mxu0 %v2501_v37  ;;  %1100 = vmatprep.mubr.f32.mxu0 %v2412_v18 }
  0xda   : > { %1157 = vmatpush1.msra.mxu1 %v2072_v51  ;;  %1190 = vmatprep.mubr.f32.mxu1 %v2412_v18 }
  0xdb   : > { %1101 = vmatmul.mubr.f32.vlgmr.msra.gmra.mxu0 %v2078_v32  ;;  %1191 = vmatmul.mubr.f32.vlgmr.msra.gmra.mxu1 %v2502_v41 }
  0xdc   : > { %1106 = vmatprep.mubr.f32.mxu0 %v2412_v18  ;;  %1196 = vmatprep.mubr.f32.mxu1 %v2412_v18 }
  0xdf   : > { %1107 = vmatmul.mubr.f32.gmra.mxu0 %v2060_v29  ;;  %1197 = vmatmul.mubr.f32.gmra.mxu1 %v2504_v45 }
 0x10b   : > { %v340_v47 = vpop.f32.mrf.mxu0  ;;  %v417_v49 = vpop.f32.mrf.mxu1 }
 0x10c   : > { %v418_v54 = vadd.f32 %v417_v49, %v340_v47 }
 0x10d   : > { %v342_v53 = vpop.f32.mrf.mxu0  ;;  %v419_v55 = vpop.f32.mrf.mxu1 }
 0x10e   : > { %v420_v40 = vadd.f32 %v419_v55, %v342_v53 }
 0x128   : > { %v346_v51 = vpop.f32.mrf.mxu0  ;;  %v423_v10 = vpop.f32.mrf.mxu1 }
 0x129   : > { %v424_v3 = vadd.f32 %v423_v10, %v346_v51 }
 0x12a   : > { %v348_v0 = vpop.f32.mrf.mxu0  ;;  %v425_v12 = vpop.f32.mrf.mxu1 }
 0x12b   : > { %v426_v38 = vadd.f32 %v425_v12, %v348_v0  ;;  %v1317_v12 = vld [vmem:[#allocation4] ss:$0 sm:$0xff] }
 0x12e   : > { %v537_v32 = vpop.f32.mrf.mxu0 }
 0x12f   : > { %v548_v16 = vadd.f32 %v537_v32, %v418_v54 }
 0x130   : > { %v660_v56 = vpop.f32.mrf.mxu1  ;;  %v539_v57 = vpop.f32.mrf.mxu0 }
 0x131   : > { %v549_v20 = vadd.f32 %v539_v57, %v420_v40  ;;  %v671_v17 = vadd.f32 %v660_v56, %v548_v16 }
 0x132   : > { %v662_v58 = vpop.f32.mrf.mxu1 }
 0x133   : > { %v672_v9 = vadd.f32 %v662_v58, %v549_v20 }
 0x134   : > { %v543_v59 = vpop.f32.mrf.mxu0 }
 0x135   : > { %v550_v19 = vadd.f32 %v543_v59, %v424_v3 }
 0x136   : > { %v545_v61 = vpop.f32.mrf.mxu0 }
 0x137   : > { %v551_v5 = vadd.f32 %v545_v61, %v426_v38 }
 0x138   : > { %v666_v60 = vpop.f32.mrf.mxu1 }
 0x139   : > { %v673_v49 = vadd.f32 %v666_v60, %v550_v19 }
 0x13a   : > { %v668_v62 = vpop.f32.mrf.mxu1 }
 0x13b   : > { %v674_v8 = vadd.f32 %v668_v62, %v551_v5 }
 0x152   : > { %v784_v29 = vpop.f32.mrf.mxu0 }
 0x153   : > { %v795_v33 = vadd.f32 %v784_v29, %v671_v17 }
 0x154   : > { %v867_v63 = vpop.f32.mrf.mxu1  ;;  %v786_v52 = vpop.f32.mrf.mxu0 }
 0x155   : > { %v796_v25 = vadd.f32 %v786_v52, %v672_v9 }
 0x156   : > { %v869_v31 = vpop.f32.mrf.mxu1 }
 0x157   : > { %v799_v55 = vmax.f32 %v795_v33, %v796_v25 }
 0x158   : > { %v790_v2 = vpop.f32.mrf.mxu0 }
 0x159   : > { %v797_v56 = vadd.f32 %v790_v2, %v673_v49 }
 0x15a   : > { %v792_v6 = vpop.f32.mrf.mxu0 }
 0x15b   : > { %v798_v51 = vadd.f32 %v792_v6, %v674_v8 }
 0x15d   : > { %v800_v61 = vmax.f32 %v797_v56, %v798_v51 }
 0x172   : > { %v873_v39 = vpop.f32.mrf.mxu1 }
 0x174   : > { %v875_v4 = vpop.f32.mrf.mxu1 }
 0x176   : > { %v944_v28 = vpop.f32.mrf.mxu0 }
 0x177   : > { %v945_v36 = vadd.f32 %v944_v28, %v867_v63 }
 0x178   : > { %v1021_v46 = vpop.f32.mrf.mxu1  ;;  %v946_v24 = vpop.f32.mrf.mxu0 }
 0x179   : > { %v947_v22 = vadd.f32 %v946_v24, %v869_v31  ;;  %v1032_v34 = vadd.f32 %v1021_v46, %v945_v36 }
 0x17a   : > { %v1023_v14 = vpop.f32.mrf.mxu1 }
 0x17b   : > { %v1033_v11 = vadd.f32 %v1023_v14, %v947_v22 }
 0x17c   : > { %v950_v50 = vpop.f32.mrf.mxu0 }
 0x17d   : > { %v951_v1 = vadd.f32 %v950_v50, %v873_v39 }
 0x17e   : > { %v952_v42 = vpop.f32.mrf.mxu0 }
 0x17f   : > { %v953_v13 = vadd.f32 %v952_v42, %v875_v4 }
 0x180   : > { %v1027_v44 = vpop.f32.mrf.mxu1 }
 0x181   : > { %v1034_v27 = vadd.f32 %v1027_v44, %v951_v1 }
 0x182   : > { %v1029_v30 = vpop.f32.mrf.mxu1 }
 0x183   : > { %v1035_v41 = vadd.f32 %v1029_v30, %v953_v13 }
 0x19b   : > { %v1102_v7 = vpop.f32.mrf.mxu0  ;;  %v1192_v48 = vpop.f32.mrf.mxu1 }
 0x19c   : > { %v1113_v15 = vadd.f32 %v1102_v7, %v1032_v34 }
 0x19d   : > { %v1104_v21 = vpop.f32.mrf.mxu0  ;;  %v1194_v23 = vpop.f32.mrf.mxu1 }
 0x19e   : > { %v1114_v26 = vadd.f32 %v1104_v21, %v1033_v11  ;;  %v1203_v43 = vadd.f32 %v1192_v48, %v1113_v15 }
 0x19f   : > { %v1108_v35 = vpop.f32.mrf.mxu0  ;;  %v1198_v37 = vpop.f32.mrf.mxu1 }
 0x1a0   : > { %v1204_v45 = vadd.f32 %v1194_v23, %v1114_v26  ;;  %v1115_v47 = vadd.f32 %v1108_v35, %v1034_v27 }
 0x1a1   : > { %v1110_v53 = vpop.f32.mrf.mxu0  ;;  %v1200_v32 = vpop.f32.mrf.mxu1 }
 0x1a2   : > { %v1207_v10 = vmax.f32 %v1203_v43, %v1204_v45  ;;  %v1116_v0 = vadd.f32 %v1110_v53, %v1035_v41  ;;  %v1205_v58 = vadd.f32 %v1198_v37, %v1115_v47 }
 0x1a4   : > { %v1209_v57 = vmax.f32 %v799_v55, %v1207_v10  ;;  %v1206_v59 = vadd.f32 %v1200_v32, %v1116_v0 }
 0x1a6   : > { %v1218_v62 = vadd.f32 %v1317_v12, %v1209_v57  ;;  %v1208_v29 = vmax.f32 %v1205_v58, %v1206_v59 }
 0x1a8   : > { %v1220_v60 = vmax.f32 %v1218_v62, 0.0  ;;  %v1210_v63 = vmax.f32 %v800_v61, %v1208_v29 }
 0x1aa   : > { %1222 = vst [vmem:[%s203_s11] sm:$0xff] %v1220_v60  ;;  %v1219_v52 = vadd.f32 %v1317_v12, %v1210_v63 }
 0x1ac   : > { %v1221_v31 = vmax.f32 %v1219_v52, 0.0 }
 0x1ae   : > { %1223 = vst [vmem:[%s203_s11 + $0x8] sm:$0x3f] %v1221_v31 }
 0x1af PF: > { %s15_s12 = sadd.s32 1, %s1419_s12  }
 0x1b0   : > { %p12_p3 = scmp.ge.s32.totalorder %s15_s12, 4  }
 0x1b2   :  { %14 = sbr.rel (!%p12_p3) target bundleno = 2 (0x2), region = 75 }
 0x1b7   :  { %1247 = vsyncpa [#allocation3], 1 }
 0x1b8   :  { %1249 = vsyncpa [#allocation3 + $0x1], 1 }
 0x1b9   :  { %1250 = vsyncpa [#allocation5], 1 }

</bundles_post_ra>
